<compile_context>
chip_gen: v5e
topology: v5e:2x2
jax: 0.10.0
libtpu: 0.0.40
codegen_flags: <defaults>
</compile_context>

<pallas_src>
import functools

import jax
import jax.numpy as jnp
from jax.experimental import pallas as pl
from jax.experimental.pallas import tpu as pltpu

D_MODEL = 240
N_HEADS = 8
HEAD_DIM = D_MODEL // N_HEADS   # 30
D_FF = 512
N_SPKS = 600
IN_DIM = 40
LN_EPS = 1e-5
BN_EPS = 1e-5


# ------------------------------ kernel helpers ------------------------------

def _vmem():
    return pl.BlockSpec(memory_space=pltpu.MemorySpace.VMEM)


def _full_spec(a):
    """Whole-array block with a constant index_map (loaded once, kept resident)."""
    zeros = (0,) * a.ndim
    return pl.BlockSpec(a.shape, lambda b: zeros)


def _layernorm(y, g, b):
    mu = jnp.mean(y, axis=-1, keepdims=True)
    yc = y - mu
    var = jnp.mean(yc * yc, axis=-1, keepdims=True)
    return yc * jax.lax.rsqrt(var + LN_EPS) * g + b


# ------------------------ fused encoder kernel (per batch) ------------------------

def _encoder_kernel(x_ref, wp_ref, bp_ref, wqkv_ref, bqkv_ref, wo_ref, bo_ref,
                    ln1g_ref, ln1b_ref, w1_ref, b1_ref, w2_ref, b2_ref,
                    ln2g_ref, ln2b_ref, stats_ref, *, n_heads, head_dim, inv_l):
    f32 = jnp.float32
    bf16 = jnp.bfloat16
    d = n_heads * head_dim
    scale = 1.0 / (head_dim ** 0.5)

    x = x_ref[0]                                                   # (L, 40) f32

    # prenet: Linear(40 -> 240)
    h = jnp.dot(x.astype(bf16), wp_ref[...],
                preferred_element_type=f32) + bp_ref[...]          # (L, D) f32

    # fused qkv projection: Linear(240 -> 720)
    qkv = jnp.dot(h.astype(bf16), wqkv_ref[...],
                  preferred_element_type=f32) + bqkv_ref[...]      # (L, 3D) f32

    # multi-head self-attention; out-projection folded into a per-head sum so
    # no head concat / transpose is needed.
    attn = jnp.zeros(h.shape, f32)
    for hh in range(n_heads):
        lo = hh * head_dim
        q = qkv[:, lo:lo + head_dim] * scale                       # (L, hd)
        k = qkv[:, d + lo:d + lo + head_dim]                       # (L, hd)
        v = qkv[:, 2 * d + lo:2 * d + lo + head_dim]               # (L, hd)

        s = jnp.einsum("qd,kd->qk", q.astype(bf16), k.astype(bf16),
                       preferred_element_type=f32)                 # (L, L) f32
        m = jnp.max(s, axis=-1, keepdims=True)
        e = jnp.exp(s - m)
        p = e * pl.reciprocal(jnp.sum(e, axis=-1, keepdims=True), approx=True)

        ctx = jnp.dot(p.astype(bf16), v.astype(bf16),
                      preferred_element_type=f32)                  # (L, hd)
        # out-projection slice for this head: (hd, D)
        attn = attn + jnp.dot(ctx.astype(bf16), wo_ref[hh],
                              preferred_element_type=f32)
    attn = attn + bo_ref[...]

    # post-norm residual 1
    h1 = _layernorm(h + attn, ln1g_ref[...], ln1b_ref[...])

    # feed-forward 240 -> 512 (ReLU) -> 240
    f = jnp.dot(h1.astype(bf16), w1_ref[...],
                preferred_element_type=f32) + b1_ref[...]
    f = jnp.maximum(f, 0.0)
    y = jnp.dot(f.astype(bf16), w2_ref[...],
                preferred_element_type=f32) + b2_ref[...]

    # post-norm residual 2
    h2 = _layernorm(h1 + y, ln2g_ref[...], ln2b_ref[...])

    # fused mean pool over the sequence (stats = out.mean(dim=1))
    pooled = jnp.sum(h2, axis=0, keepdims=True) * inv_l            # (1, D)
    stats_ref[...] = pooled.reshape(1, 1, d).astype(stats_ref.dtype)


# ------------------------ fused prediction head kernel ------------------------

def _pred_head_kernel(x_ref, w1_ref, b1_ref, bng_ref, bnb_ref, rm_ref, rv_ref,
                      w2_ref, b2_ref, o_ref, *, eps):
    f32 = jnp.float32
    bf16 = jnp.bfloat16
    # Linear(240 -> 120) + ReLU
    p = jnp.dot(x_ref[...].astype(bf16), w1_ref[...],
                preferred_element_type=f32) + b1_ref[...]
    p = jnp.maximum(p, 0.0)
    # BatchNorm1d(120) in eval mode (running statistics)
    inv = jax.lax.rsqrt(rv_ref[...] + eps)
    p = (p - rm_ref[...]) * inv * bng_ref[...] + bnb_ref[...]
    # Linear(120 -> 600)
    o = jnp.dot(p.astype(bf16), w2_ref[...],
                preferred_element_type=f32) + b2_ref[...]
    o_ref[...] = o.astype(o_ref.dtype)


# ------------------------------ parameters ------------------------------

def init_params(key):
    ks = jax.random.split(key, 12)

    def w(k, shape, scale=0.05):
        return (scale * jax.random.normal(k, shape)).astype(jnp.float32)

    return {
        # prenet: nn.Linear(40, 240)
        "prenet_w": w(ks[0], (IN_DIM, D_MODEL)),
        "prenet_b": w(ks[1], (D_MODEL,), 0.01),
        # MultiheadAttention in/out projections
        "attn_in_w": w(ks[2], (D_MODEL, 3 * D_MODEL)),
        "attn_in_b": w(ks[3], (3 * D_MODEL,), 0.01),
        "attn_out_w": w(ks[4], (D_MODEL, D_MODEL)),
        "attn_out_b": w(ks[5], (D_MODEL,), 0.01),
        # LayerNorms (PyTorch init: gamma=1, beta=0)
        "ln1_g": jnp.ones((D_MODEL,), jnp.float32),
        "ln1_b": jnp.zeros((D_MODEL,), jnp.float32),
        "ln2_g": jnp.ones((D_MODEL,), jnp.float32),
        "ln2_b": jnp.zeros((D_MODEL,), jnp.float32),
        # feed-forward 240 -> 512 -> 240
        "ff1_w": w(ks[6], (D_MODEL, D_FF)),
        "ff1_b": w(ks[7], (D_FF,), 0.01),
        "ff2_w": w(ks[8], (D_FF, D_MODEL)),
        "ff2_b": w(ks[9], (D_MODEL,), 0.01),
        # pred_layer: Linear(240,120) -> ReLU -> BatchNorm1d(120) -> Linear(120,600)
        "pred1_w": w(ks[10], (D_MODEL, D_MODEL // 2)),
        "pred1_b": jnp.zeros((D_MODEL // 2,), jnp.float32),
        "bn_g": jnp.ones((D_MODEL // 2,), jnp.float32),
        "bn_b": jnp.zeros((D_MODEL // 2,), jnp.float32),
        "bn_rm": jnp.zeros((D_MODEL // 2,), jnp.float32),
        "bn_rv": jnp.ones((D_MODEL // 2,), jnp.float32),
        "pred2_w": w(ks[11], (D_MODEL // 2, N_SPKS)),
        "pred2_b": jnp.zeros((N_SPKS,), jnp.float32),
    }


# ------------------------------ forward ------------------------------

def classifier3_forward(params, mels):
    """mels: (B, L, 40) -> logits (B, n_spks)."""
    B, L, _ = mels.shape
    f32, bf16 = jnp.float32, jnp.bfloat16
    half = D_MODEL // 2

    # --- weight packing (done once under jit; bf16 matmul operands, f32 elsewhere) ---
    wp = params["prenet_w"].astype(bf16)
    wqkv = params["attn_in_w"].astype(bf16)
    # out-projection split per head: (D, D) -> (H, head_dim, D)
    wo = params["attn_out_w"].reshape(N_HEADS, HEAD_DIM, D_MODEL).astype(bf16)
    w1 = params["ff1_w"].astype(bf16)
    w2 = params["ff2_w"].astype(bf16)

    bp = params["prenet_b"].reshape(1, D_MODEL)
    bqkv = params["attn_in_b"].reshape(1, 3 * D_MODEL)
    bo = params["attn_out_b"].reshape(1, D_MODEL)
    b1 = params["ff1_b"].reshape(1, D_FF)
    b2 = params["ff2_b"].reshape(1, D_MODEL)
    ln1g = params["ln1_g"].reshape(1, D_MODEL)
    ln1b = params["ln1_b"].reshape(1, D_MODEL)
    ln2g = params["ln2_g"].reshape(1, D_MODEL)
    ln2b = params["ln2_b"].reshape(1, D_MODEL)

    enc_weights = [wp, bp, wqkv, bqkv, wo, bo, ln1g, ln1b,
                   w1, b1, w2, b2, ln2g, ln2b]

    # --- fused encoder: one grid step per batch element (parallel across TCs) ---
    stats = pl.pallas_call(
        functools.partial(_encoder_kernel, n_heads=N_HEADS, head_dim=HEAD_DIM,
                          inv_l=1.0 / L),
        grid=(B,),
        out_shape=jax.ShapeDtypeStruct((B, 1, D_MODEL), f32),
        in_specs=[pl.BlockSpec((1, L, IN_DIM), lambda b: (b, 0, 0))]
                 + [_full_spec(a) for a in enc_weights],
        out_specs=pl.BlockSpec((1, 1, D_MODEL), lambda b: (b, 0, 0)),
        compiler_params=pltpu.CompilerParams(
            dimension_semantics=("parallel",),
            vmem_limit_bytes=48 * 1024 * 1024),
    )(mels, *enc_weights)
    stats = stats.reshape(B, D_MODEL)

    # --- fused prediction head on the small pooled tensor ---
    # TODO(synk): N_SPKS=600 / D_MODEL=240 are not multiples of 128; left unpadded
    # (lane padding would require an extra XLA slice pass that negates the gain here).
    logits = pl.pallas_call(
        functools.partial(_pred_head_kernel, eps=BN_EPS),
        out_shape=jax.ShapeDtypeStruct((B, N_SPKS), f32),
        in_specs=[_vmem()] * 9,
        out_specs=_vmem(),
    )(stats,
      params["pred1_w"].astype(bf16), params["pred1_b"].reshape(1, half),
      params["bn_g"].reshape(1, half), params["bn_b"].reshape(1, half),
      params["bn_rm"].reshape(1, half), params["bn_rv"].reshape(1, half),
      params["pred2_w"].astype(bf16), params["pred2_b"].reshape(1, N_SPKS))
    return logits


if __name__ == "__main__":
    key = jax.random.PRNGKey(0)
    pkey, xkey = jax.random.split(key)
    params = init_params(pkey)

    B, L = 2, 8
    mels = jax.random.normal(xkey, (B, L, IN_DIM), dtype=jnp.float32)

    out = jax.jit(classifier3_forward)(params, mels)
    out = jax.block_until_ready(out)

    assert out.shape == (B, N_SPKS), out.shape
    assert bool(jnp.all(jnp.isfinite(out)))
    print("KERNEL_OK")
</pallas_src>

<mosaic_0001>
module attributes {stable_mosaic.version = 11 : i64} {
  func.func @_encoder_kernel(%arg0: i32, %arg1: memref<1x8x40xf32, #tpu.memory_space<vmem>>, %arg2: memref<40x240xbf16, #tpu.memory_space<vmem>>, %arg3: memref<1x240xf32, #tpu.memory_space<vmem>>, %arg4: memref<240x720xbf16, #tpu.memory_space<vmem>>, %arg5: memref<1x720xf32, #tpu.memory_space<vmem>>, %arg6: memref<8x30x240xbf16, #tpu.memory_space<vmem>>, %arg7: memref<1x240xf32, #tpu.memory_space<vmem>>, %arg8: memref<1x240xf32, #tpu.memory_space<vmem>>, %arg9: memref<1x240xf32, #tpu.memory_space<vmem>>, %arg10: memref<240x512xbf16, #tpu.memory_space<vmem>>, %arg11: memref<1x512xf32, #tpu.memory_space<vmem>>, %arg12: memref<512x240xbf16, #tpu.memory_space<vmem>>, %arg13: memref<1x240xf32, #tpu.memory_space<vmem>>, %arg14: memref<1x240xf32, #tpu.memory_space<vmem>>, %arg15: memref<1x240xf32, #tpu.memory_space<vmem>>, %arg16: memref<1x1x240xf32, #tpu.memory_space<vmem>>) attributes {dimension_semantics = [#tpu.dimension_semantics<parallel>], iteration_bounds = array<i64: 2>, scalar_prefetch = 0 : i64, scratch_operands = 0 : i64, tpu.core_type = #tpu.core_type<tc>, window_params = [{transform_indices = @transform_0, window_bounds = array<i64: 1, 8, 40>}, {pipeline_mode = #tpu.pipeline_mode<synchronous>, transform_indices = @transform_1, window_bounds = array<i64: 40, 240>}, {pipeline_mode = #tpu.pipeline_mode<synchronous>, transform_indices = @transform_2, window_bounds = array<i64: 1, 240>}, {pipeline_mode = #tpu.pipeline_mode<synchronous>, transform_indices = @transform_3, window_bounds = array<i64: 240, 720>}, {pipeline_mode = #tpu.pipeline_mode<synchronous>, transform_indices = @transform_4, window_bounds = array<i64: 1, 720>}, {pipeline_mode = #tpu.pipeline_mode<synchronous>, transform_indices = @transform_5, window_bounds = array<i64: 8, 30, 240>}, {pipeline_mode = #tpu.pipeline_mode<synchronous>, transform_indices = @transform_6, window_bounds = array<i64: 1, 240>}, {pipeline_mode = #tpu.pipeline_mode<synchronous>, transform_indices = @transform_7, window_bounds = array<i64: 1, 240>}, {pipeline_mode = #tpu.pipeline_mode<synchronous>, transform_indices = @transform_8, window_bounds = array<i64: 1, 240>}, {pipeline_mode = #tpu.pipeline_mode<synchronous>, transform_indices = @transform_9, window_bounds = array<i64: 240, 512>}, {pipeline_mode = #tpu.pipeline_mode<synchronous>, transform_indices = @transform_10, window_bounds = array<i64: 1, 512>}, {pipeline_mode = #tpu.pipeline_mode<synchronous>, transform_indices = @transform_11, window_bounds = array<i64: 512, 240>}, {pipeline_mode = #tpu.pipeline_mode<synchronous>, transform_indices = @transform_12, window_bounds = array<i64: 1, 240>}, {pipeline_mode = #tpu.pipeline_mode<synchronous>, transform_indices = @transform_13, window_bounds = array<i64: 1, 240>}, {pipeline_mode = #tpu.pipeline_mode<synchronous>, transform_indices = @transform_14, window_bounds = array<i64: 1, 240>}, {transform_indices = @transform_15, window_bounds = array<i64: 1, 1, 240>}]} {
    %c0 = arith.constant 0 : index
    %c0_0 = arith.constant 0 : index
    %c0_1 = arith.constant 0 : index
    %0 = vector.load %arg1[%c0, %c0_0, %c0_1] : memref<1x8x40xf32, #tpu.memory_space<vmem>>, vector<1x8x40xf32>
    %1 = vector.shape_cast %0 : vector<1x8x40xf32> to vector<8x40xf32>
    %2 = arith.truncf %1 : vector<8x40xf32> to vector<8x40xbf16>
    %c0_2 = arith.constant 0 : index
    %c0_3 = arith.constant 0 : index
    %3 = vector.load %arg2[%c0_2, %c0_3] : memref<40x240xbf16, #tpu.memory_space<vmem>>, vector<40x240xbf16>
    %cst = arith.constant dense<0.000000e+00> : vector<8x240xf32>
    %4 = tpu.matmul %2, %3, %cst {dimension_numbers = #tpu.dot_dimension_numbers<[1], [0], [0], [1], [0, 0, 1, 1], [], []>} : vector<8x40xbf16>, vector<40x240xbf16>, vector<8x240xf32> -> vector<8x240xf32>
    %c0_4 = arith.constant 0 : index
    %c0_5 = arith.constant 0 : index
    %5 = vector.load %arg3[%c0_4, %c0_5] : memref<1x240xf32, #tpu.memory_space<vmem>>, vector<1x240xf32>
    %6 = vector.broadcast %5 : vector<1x240xf32> to vector<8x240xf32>
    %7 = arith.addf %4, %6 : vector<8x240xf32>
    %8 = arith.truncf %7 : vector<8x240xf32> to vector<8x240xbf16>
    %c0_6 = arith.constant 0 : index
    %c0_7 = arith.constant 0 : index
    %9 = vector.load %arg4[%c0_6, %c0_7] : memref<240x720xbf16, #tpu.memory_space<vmem>>, vector<240x720xbf16>
    %cst_8 = arith.constant dense<0.000000e+00> : vector<8x720xf32>
    %10 = tpu.matmul %8, %9, %cst_8 {dimension_numbers = #tpu.dot_dimension_numbers<[1], [0], [0], [1], [0, 0, 1, 1], [], []>} : vector<8x240xbf16>, vector<240x720xbf16>, vector<8x720xf32> -> vector<8x720xf32>
    %c0_9 = arith.constant 0 : index
    %c0_10 = arith.constant 0 : index
    %11 = vector.load %arg5[%c0_9, %c0_10] : memref<1x720xf32, #tpu.memory_space<vmem>>, vector<1x720xf32>
    %12 = vector.broadcast %11 : vector<1x720xf32> to vector<8x720xf32>
    %13 = arith.addf %10, %12 : vector<8x720xf32>
    %cst_11 = arith.constant 0.000000e+00 : f32
    %14 = vector.broadcast %cst_11 : f32 to vector<8x240xf32>
    %15 = vector.extract_strided_slice %13 {offsets = [0, 0], sizes = [8, 30], strides = [1, 1]} : vector<8x720xf32> to vector<8x30xf32>
    %cst_12 = arith.constant 0.182574183 : f32
    %16 = vector.broadcast %cst_12 : f32 to vector<8x30xf32>
    %17 = arith.mulf %15, %16 : vector<8x30xf32>
    %18 = vector.extract_strided_slice %13 {offsets = [0, 240], sizes = [8, 30], strides = [1, 1]} : vector<8x720xf32> to vector<8x30xf32>
    %19 = vector.extract_strided_slice %13 {offsets = [0, 480], sizes = [8, 30], strides = [1, 1]} : vector<8x720xf32> to vector<8x30xf32>
    %20 = arith.truncf %17 : vector<8x30xf32> to vector<8x30xbf16>
    %21 = arith.truncf %18 : vector<8x30xf32> to vector<8x30xbf16>
    "tpu.trace_start"() <{level = 10 : i32, message = "qd,kd->qk"}> : () -> ()
    %cst_13 = arith.constant dense<0.000000e+00> : vector<8x8xf32>
    %22 = tpu.matmul %20, %21, %cst_13 {dimension_numbers = #tpu.dot_dimension_numbers<[1], [1], [0], [0], [0, 0, 1, 0], [], []>} : vector<8x30xbf16>, vector<8x30xbf16>, vector<8x8xf32> -> vector<8x8xf32>
    "tpu.trace_stop"() : () -> ()
    %cst_14 = arith.constant dense<0xFF800000> : vector<8xf32>
    %23 = vector.multi_reduction <maximumf>, %22, %cst_14 [1] : vector<8x8xf32> to vector<8xf32>
    %24 = vector.shape_cast %23 : vector<8xf32> to vector<8x1xf32>
    %25 = vector.broadcast %24 : vector<8x1xf32> to vector<8x8xf32>
    %26 = arith.subf %22, %25 : vector<8x8xf32>
    %27 = math.exp %26 : vector<8x8xf32>
    %cst_15 = arith.constant dense<0.000000e+00> : vector<8xf32>
    %28 = vector.multi_reduction <add>, %27, %cst_15 [1] : vector<8x8xf32> to vector<8xf32>
    %29 = vector.shape_cast %28 : vector<8xf32> to vector<8x1xf32>
    %30 = tpu.reciprocal %29 {approx = true} : vector<8x1xf32> -> vector<8x1xf32>
    %31 = vector.broadcast %30 : vector<8x1xf32> to vector<8x8xf32>
    %32 = arith.mulf %27, %31 : vector<8x8xf32>
    %33 = arith.truncf %32 : vector<8x8xf32> to vector<8x8xbf16>
    %34 = arith.truncf %19 : vector<8x30xf32> to vector<8x30xbf16>
    %cst_16 = arith.constant dense<0.000000e+00> : vector<8x30xf32>
    %35 = tpu.matmul %33, %34, %cst_16 {dimension_numbers = #tpu.dot_dimension_numbers<[1], [0], [0], [1], [0, 0, 1, 1], [], []>} : vector<8x8xbf16>, vector<8x30xbf16>, vector<8x30xf32> -> vector<8x30xf32>
    %36 = arith.truncf %35 : vector<8x30xf32> to vector<8x30xbf16>
    %c0_17 = arith.constant 0 : index
    %c0_18 = arith.constant 0 : index
    %c0_19 = arith.constant 0 : index
    %37 = vector.load %arg6[%c0_17, %c0_18, %c0_19] : memref<8x30x240xbf16, #tpu.memory_space<vmem>>, vector<1x30x240xbf16>
    %38 = vector.shape_cast %37 : vector<1x30x240xbf16> to vector<30x240xbf16>
    %cst_20 = arith.constant dense<0.000000e+00> : vector<8x240xf32>
    %39 = tpu.matmul %36, %38, %cst_20 {dimension_numbers = #tpu.dot_dimension_numbers<[1], [0], [0], [1], [0, 0, 1, 1], [], []>} : vector<8x30xbf16>, vector<30x240xbf16>, vector<8x240xf32> -> vector<8x240xf32>
    %40 = arith.addf %14, %39 : vector<8x240xf32>
    %41 = vector.extract_strided_slice %13 {offsets = [0, 30], sizes = [8, 30], strides = [1, 1]} : vector<8x720xf32> to vector<8x30xf32>
    %cst_21 = arith.constant 0.182574183 : f32
    %42 = vector.broadcast %cst_21 : f32 to vector<8x30xf32>
    %43 = arith.mulf %41, %42 : vector<8x30xf32>
    %44 = vector.extract_strided_slice %13 {offsets = [0, 270], sizes = [8, 30], strides = [1, 1]} : vector<8x720xf32> to vector<8x30xf32>
    %45 = vector.extract_strided_slice %13 {offsets = [0, 510], sizes = [8, 30], strides = [1, 1]} : vector<8x720xf32> to vector<8x30xf32>
    %46 = arith.truncf %43 : vector<8x30xf32> to vector<8x30xbf16>
    %47 = arith.truncf %44 : vector<8x30xf32> to vector<8x30xbf16>
    "tpu.trace_start"() <{level = 10 : i32, message = "qd,kd->qk"}> : () -> ()
    %cst_22 = arith.constant dense<0.000000e+00> : vector<8x8xf32>
    %48 = tpu.matmul %46, %47, %cst_22 {dimension_numbers = #tpu.dot_dimension_numbers<[1], [1], [0], [0], [0, 0, 1, 0], [], []>} : vector<8x30xbf16>, vector<8x30xbf16>, vector<8x8xf32> -> vector<8x8xf32>
    "tpu.trace_stop"() : () -> ()
    %cst_23 = arith.constant dense<0xFF800000> : vector<8xf32>
    %49 = vector.multi_reduction <maximumf>, %48, %cst_23 [1] : vector<8x8xf32> to vector<8xf32>
    %50 = vector.shape_cast %49 : vector<8xf32> to vector<8x1xf32>
    %51 = vector.broadcast %50 : vector<8x1xf32> to vector<8x8xf32>
    %52 = arith.subf %48, %51 : vector<8x8xf32>
    %53 = math.exp %52 : vector<8x8xf32>
    %cst_24 = arith.constant dense<0.000000e+00> : vector<8xf32>
    %54 = vector.multi_reduction <add>, %53, %cst_24 [1] : vector<8x8xf32> to vector<8xf32>
    %55 = vector.shape_cast %54 : vector<8xf32> to vector<8x1xf32>
    %56 = tpu.reciprocal %55 {approx = true} : vector<8x1xf32> -> vector<8x1xf32>
    %57 = vector.broadcast %56 : vector<8x1xf32> to vector<8x8xf32>
    %58 = arith.mulf %53, %57 : vector<8x8xf32>
    %59 = arith.truncf %58 : vector<8x8xf32> to vector<8x8xbf16>
    %60 = arith.truncf %45 : vector<8x30xf32> to vector<8x30xbf16>
    %cst_25 = arith.constant dense<0.000000e+00> : vector<8x30xf32>
    %61 = tpu.matmul %59, %60, %cst_25 {dimension_numbers = #tpu.dot_dimension_numbers<[1], [0], [0], [1], [0, 0, 1, 1], [], []>} : vector<8x8xbf16>, vector<8x30xbf16>, vector<8x30xf32> -> vector<8x30xf32>
    %62 = arith.truncf %61 : vector<8x30xf32> to vector<8x30xbf16>
    %c1 = arith.constant 1 : index
    %c0_26 = arith.constant 0 : index
    %c0_27 = arith.constant 0 : index
    %63 = vector.load %arg6[%c1, %c0_26, %c0_27] : memref<8x30x240xbf16, #tpu.memory_space<vmem>>, vector<1x30x240xbf16>
    %64 = vector.shape_cast %63 : vector<1x30x240xbf16> to vector<30x240xbf16>
    %cst_28 = arith.constant dense<0.000000e+00> : vector<8x240xf32>
    %65 = tpu.matmul %62, %64, %cst_28 {dimension_numbers = #tpu.dot_dimension_numbers<[1], [0], [0], [1], [0, 0, 1, 1], [], []>} : vector<8x30xbf16>, vector<30x240xbf16>, vector<8x240xf32> -> vector<8x240xf32>
    %66 = arith.addf %40, %65 : vector<8x240xf32>
    %67 = vector.extract_strided_slice %13 {offsets = [0, 60], sizes = [8, 30], strides = [1, 1]} : vector<8x720xf32> to vector<8x30xf32>
    %cst_29 = arith.constant 0.182574183 : f32
    %68 = vector.broadcast %cst_29 : f32 to vector<8x30xf32>
    %69 = arith.mulf %67, %68 : vector<8x30xf32>
    %70 = vector.extract_strided_slice %13 {offsets = [0, 300], sizes = [8, 30], strides = [1, 1]} : vector<8x720xf32> to vector<8x30xf32>
    %71 = vector.extract_strided_slice %13 {offsets = [0, 540], sizes = [8, 30], strides = [1, 1]} : vector<8x720xf32> to vector<8x30xf32>
    %72 = arith.truncf %69 : vector<8x30xf32> to vector<8x30xbf16>
    %73 = arith.truncf %70 : vector<8x30xf32> to vector<8x30xbf16>
    "tpu.trace_start"() <{level = 10 : i32, message = "qd,kd->qk"}> : () -> ()
    %cst_30 = arith.constant dense<0.000000e+00> : vector<8x8xf32>
    %74 = tpu.matmul %72, %73, %cst_30 {dimension_numbers = #tpu.dot_dimension_numbers<[1], [1], [0], [0], [0, 0, 1, 0], [], []>} : vector<8x30xbf16>, vector<8x30xbf16>, vector<8x8xf32> -> vector<8x8xf32>
    "tpu.trace_stop"() : () -> ()
    %cst_31 = arith.constant dense<0xFF800000> : vector<8xf32>
    %75 = vector.multi_reduction <maximumf>, %74, %cst_31 [1] : vector<8x8xf32> to vector<8xf32>
    %76 = vector.shape_cast %75 : vector<8xf32> to vector<8x1xf32>
    %77 = vector.broadcast %76 : vector<8x1xf32> to vector<8x8xf32>
    %78 = arith.subf %74, %77 : vector<8x8xf32>
    %79 = math.exp %78 : vector<8x8xf32>
    %cst_32 = arith.constant dense<0.000000e+00> : vector<8xf32>
    %80 = vector.multi_reduction <add>, %79, %cst_32 [1] : vector<8x8xf32> to vector<8xf32>
    %81 = vector.shape_cast %80 : vector<8xf32> to vector<8x1xf32>
    %82 = tpu.reciprocal %81 {approx = true} : vector<8x1xf32> -> vector<8x1xf32>
    %83 = vector.broadcast %82 : vector<8x1xf32> to vector<8x8xf32>
    %84 = arith.mulf %79, %83 : vector<8x8xf32>
    %85 = arith.truncf %84 : vector<8x8xf32> to vector<8x8xbf16>
    %86 = arith.truncf %71 : vector<8x30xf32> to vector<8x30xbf16>
    %cst_33 = arith.constant dense<0.000000e+00> : vector<8x30xf32>
    %87 = tpu.matmul %85, %86, %cst_33 {dimension_numbers = #tpu.dot_dimension_numbers<[1], [0], [0], [1], [0, 0, 1, 1], [], []>} : vector<8x8xbf16>, vector<8x30xbf16>, vector<8x30xf32> -> vector<8x30xf32>
    %88 = arith.truncf %87 : vector<8x30xf32> to vector<8x30xbf16>
    %c2 = arith.constant 2 : index
    %c0_34 = arith.constant 0 : index
    %c0_35 = arith.constant 0 : index
    %89 = vector.load %arg6[%c2, %c0_34, %c0_35] : memref<8x30x240xbf16, #tpu.memory_space<vmem>>, vector<1x30x240xbf16>
    %90 = vector.shape_cast %89 : vector<1x30x240xbf16> to vector<30x240xbf16>
    %cst_36 = arith.constant dense<0.000000e+00> : vector<8x240xf32>
    %91 = tpu.matmul %88, %90, %cst_36 {dimension_numbers = #tpu.dot_dimension_numbers<[1], [0], [0], [1], [0, 0, 1, 1], [], []>} : vector<8x30xbf16>, vector<30x240xbf16>, vector<8x240xf32> -> vector<8x240xf32>
    %92 = arith.addf %66, %91 : vector<8x240xf32>
    %93 = vector.extract_strided_slice %13 {offsets = [0, 90], sizes = [8, 30], strides = [1, 1]} : vector<8x720xf32> to vector<8x30xf32>
    %cst_37 = arith.constant 0.182574183 : f32
    %94 = vector.broadcast %cst_37 : f32 to vector<8x30xf32>
    %95 = arith.mulf %93, %94 : vector<8x30xf32>
    %96 = vector.extract_strided_slice %13 {offsets = [0, 330], sizes = [8, 30], strides = [1, 1]} : vector<8x720xf32> to vector<8x30xf32>
    %97 = vector.extract_strided_slice %13 {offsets = [0, 570], sizes = [8, 30], strides = [1, 1]} : vector<8x720xf32> to vector<8x30xf32>
    %98 = arith.truncf %95 : vector<8x30xf32> to vector<8x30xbf16>
    %99 = arith.truncf %96 : vector<8x30xf32> to vector<8x30xbf16>
    "tpu.trace_start"() <{level = 10 : i32, message = "qd,kd->qk"}> : () -> ()
    %cst_38 = arith.constant dense<0.000000e+00> : vector<8x8xf32>
    %100 = tpu.matmul %98, %99, %cst_38 {dimension_numbers = #tpu.dot_dimension_numbers<[1], [1], [0], [0], [0, 0, 1, 0], [], []>} : vector<8x30xbf16>, vector<8x30xbf16>, vector<8x8xf32> -> vector<8x8xf32>
    "tpu.trace_stop"() : () -> ()
    %cst_39 = arith.constant dense<0xFF800000> : vector<8xf32>
    %101 = vector.multi_reduction <maximumf>, %100, %cst_39 [1] : vector<8x8xf32> to vector<8xf32>
    %102 = vector.shape_cast %101 : vector<8xf32> to vector<8x1xf32>
    %103 = vector.broadcast %102 : vector<8x1xf32> to vector<8x8xf32>
    %104 = arith.subf %100, %103 : vector<8x8xf32>
    %105 = math.exp %104 : vector<8x8xf32>
    %cst_40 = arith.constant dense<0.000000e+00> : vector<8xf32>
    %106 = vector.multi_reduction <add>, %105, %cst_40 [1] : vector<8x8xf32> to vector<8xf32>
    %107 = vector.shape_cast %106 : vector<8xf32> to vector<8x1xf32>
    %108 = tpu.reciprocal %107 {approx = true} : vector<8x1xf32> -> vector<8x1xf32>
    %109 = vector.broadcast %108 : vector<8x1xf32> to vector<8x8xf32>
    %110 = arith.mulf %105, %109 : vector<8x8xf32>
    %111 = arith.truncf %110 : vector<8x8xf32> to vector<8x8xbf16>
    %112 = arith.truncf %97 : vector<8x30xf32> to vector<8x30xbf16>
    %cst_41 = arith.constant dense<0.000000e+00> : vector<8x30xf32>
    %113 = tpu.matmul %111, %112, %cst_41 {dimension_numbers = #tpu.dot_dimension_numbers<[1], [0], [0], [1], [0, 0, 1, 1], [], []>} : vector<8x8xbf16>, vector<8x30xbf16>, vector<8x30xf32> -> vector<8x30xf32>
    %114 = arith.truncf %113 : vector<8x30xf32> to vector<8x30xbf16>
    %c3 = arith.constant 3 : index
    %c0_42 = arith.constant 0 : index
    %c0_43 = arith.constant 0 : index
    %115 = vector.load %arg6[%c3, %c0_42, %c0_43] : memref<8x30x240xbf16, #tpu.memory_space<vmem>>, vector<1x30x240xbf16>
    %116 = vector.shape_cast %115 : vector<1x30x240xbf16> to vector<30x240xbf16>
    %cst_44 = arith.constant dense<0.000000e+00> : vector<8x240xf32>
    %117 = tpu.matmul %114, %116, %cst_44 {dimension_numbers = #tpu.dot_dimension_numbers<[1], [0], [0], [1], [0, 0, 1, 1], [], []>} : vector<8x30xbf16>, vector<30x240xbf16>, vector<8x240xf32> -> vector<8x240xf32>
    %118 = arith.addf %92, %117 : vector<8x240xf32>
    %119 = vector.extract_strided_slice %13 {offsets = [0, 120], sizes = [8, 30], strides = [1, 1]} : vector<8x720xf32> to vector<8x30xf32>
    %cst_45 = arith.constant 0.182574183 : f32
    %120 = vector.broadcast %cst_45 : f32 to vector<8x30xf32>
    %121 = arith.mulf %119, %120 : vector<8x30xf32>
    %122 = vector.extract_strided_slice %13 {offsets = [0, 360], sizes = [8, 30], strides = [1, 1]} : vector<8x720xf32> to vector<8x30xf32>
    %123 = vector.extract_strided_slice %13 {offsets = [0, 600], sizes = [8, 30], strides = [1, 1]} : vector<8x720xf32> to vector<8x30xf32>
    %124 = arith.truncf %121 : vector<8x30xf32> to vector<8x30xbf16>
    %125 = arith.truncf %122 : vector<8x30xf32> to vector<8x30xbf16>
    "tpu.trace_start"() <{level = 10 : i32, message = "qd,kd->qk"}> : () -> ()
    %cst_46 = arith.constant dense<0.000000e+00> : vector<8x8xf32>
    %126 = tpu.matmul %124, %125, %cst_46 {dimension_numbers = #tpu.dot_dimension_numbers<[1], [1], [0], [0], [0, 0, 1, 0], [], []>} : vector<8x30xbf16>, vector<8x30xbf16>, vector<8x8xf32> -> vector<8x8xf32>
    "tpu.trace_stop"() : () -> ()
    %cst_47 = arith.constant dense<0xFF800000> : vector<8xf32>
    %127 = vector.multi_reduction <maximumf>, %126, %cst_47 [1] : vector<8x8xf32> to vector<8xf32>
    %128 = vector.shape_cast %127 : vector<8xf32> to vector<8x1xf32>
    %129 = vector.broadcast %128 : vector<8x1xf32> to vector<8x8xf32>
    %130 = arith.subf %126, %129 : vector<8x8xf32>
    %131 = math.exp %130 : vector<8x8xf32>
    %cst_48 = arith.constant dense<0.000000e+00> : vector<8xf32>
    %132 = vector.multi_reduction <add>, %131, %cst_48 [1] : vector<8x8xf32> to vector<8xf32>
    %133 = vector.shape_cast %132 : vector<8xf32> to vector<8x1xf32>
    %134 = tpu.reciprocal %133 {approx = true} : vector<8x1xf32> -> vector<8x1xf32>
    %135 = vector.broadcast %134 : vector<8x1xf32> to vector<8x8xf32>
    %136 = arith.mulf %131, %135 : vector<8x8xf32>
    %137 = arith.truncf %136 : vector<8x8xf32> to vector<8x8xbf16>
    %138 = arith.truncf %123 : vector<8x30xf32> to vector<8x30xbf16>
    %cst_49 = arith.constant dense<0.000000e+00> : vector<8x30xf32>
    %139 = tpu.matmul %137, %138, %cst_49 {dimension_numbers = #tpu.dot_dimension_numbers<[1], [0], [0], [1], [0, 0, 1, 1], [], []>} : vector<8x8xbf16>, vector<8x30xbf16>, vector<8x30xf32> -> vector<8x30xf32>
    %140 = arith.truncf %139 : vector<8x30xf32> to vector<8x30xbf16>
    %c4 = arith.constant 4 : index
    %c0_50 = arith.constant 0 : index
    %c0_51 = arith.constant 0 : index
    %141 = vector.load %arg6[%c4, %c0_50, %c0_51] : memref<8x30x240xbf16, #tpu.memory_space<vmem>>, vector<1x30x240xbf16>
    %142 = vector.shape_cast %141 : vector<1x30x240xbf16> to vector<30x240xbf16>
    %cst_52 = arith.constant dense<0.000000e+00> : vector<8x240xf32>
    %143 = tpu.matmul %140, %142, %cst_52 {dimension_numbers = #tpu.dot_dimension_numbers<[1], [0], [0], [1], [0, 0, 1, 1], [], []>} : vector<8x30xbf16>, vector<30x240xbf16>, vector<8x240xf32> -> vector<8x240xf32>
    %144 = arith.addf %118, %143 : vector<8x240xf32>
    %145 = vector.extract_strided_slice %13 {offsets = [0, 150], sizes = [8, 30], strides = [1, 1]} : vector<8x720xf32> to vector<8x30xf32>
    %cst_53 = arith.constant 0.182574183 : f32
    %146 = vector.broadcast %cst_53 : f32 to vector<8x30xf32>
    %147 = arith.mulf %145, %146 : vector<8x30xf32>
    %148 = vector.extract_strided_slice %13 {offsets = [0, 390], sizes = [8, 30], strides = [1, 1]} : vector<8x720xf32> to vector<8x30xf32>
    %149 = vector.extract_strided_slice %13 {offsets = [0, 630], sizes = [8, 30], strides = [1, 1]} : vector<8x720xf32> to vector<8x30xf32>
    %150 = arith.truncf %147 : vector<8x30xf32> to vector<8x30xbf16>
    %151 = arith.truncf %148 : vector<8x30xf32> to vector<8x30xbf16>
    "tpu.trace_start"() <{level = 10 : i32, message = "qd,kd->qk"}> : () -> ()
    %cst_54 = arith.constant dense<0.000000e+00> : vector<8x8xf32>
    %152 = tpu.matmul %150, %151, %cst_54 {dimension_numbers = #tpu.dot_dimension_numbers<[1], [1], [0], [0], [0, 0, 1, 0], [], []>} : vector<8x30xbf16>, vector<8x30xbf16>, vector<8x8xf32> -> vector<8x8xf32>
    "tpu.trace_stop"() : () -> ()
    %cst_55 = arith.constant dense<0xFF800000> : vector<8xf32>
    %153 = vector.multi_reduction <maximumf>, %152, %cst_55 [1] : vector<8x8xf32> to vector<8xf32>
    %154 = vector.shape_cast %153 : vector<8xf32> to vector<8x1xf32>
    %155 = vector.broadcast %154 : vector<8x1xf32> to vector<8x8xf32>
    %156 = arith.subf %152, %155 : vector<8x8xf32>
    %157 = math.exp %156 : vector<8x8xf32>
    %cst_56 = arith.constant dense<0.000000e+00> : vector<8xf32>
    %158 = vector.multi_reduction <add>, %157, %cst_56 [1] : vector<8x8xf32> to vector<8xf32>
    %159 = vector.shape_cast %158 : vector<8xf32> to vector<8x1xf32>
    %160 = tpu.reciprocal %159 {approx = true} : vector<8x1xf32> -> vector<8x1xf32>
    %161 = vector.broadcast %160 : vector<8x1xf32> to vector<8x8xf32>
    %162 = arith.mulf %157, %161 : vector<8x8xf32>
    %163 = arith.truncf %162 : vector<8x8xf32> to vector<8x8xbf16>
    %164 = arith.truncf %149 : vector<8x30xf32> to vector<8x30xbf16>
    %cst_57 = arith.constant dense<0.000000e+00> : vector<8x30xf32>
    %165 = tpu.matmul %163, %164, %cst_57 {dimension_numbers = #tpu.dot_dimension_numbers<[1], [0], [0], [1], [0, 0, 1, 1], [], []>} : vector<8x8xbf16>, vector<8x30xbf16>, vector<8x30xf32> -> vector<8x30xf32>
    %166 = arith.truncf %165 : vector<8x30xf32> to vector<8x30xbf16>
    %c5 = arith.constant 5 : index
    %c0_58 = arith.constant 0 : index
    %c0_59 = arith.constant 0 : index
    %167 = vector.load %arg6[%c5, %c0_58, %c0_59] : memref<8x30x240xbf16, #tpu.memory_space<vmem>>, vector<1x30x240xbf16>
    %168 = vector.shape_cast %167 : vector<1x30x240xbf16> to vector<30x240xbf16>
    %cst_60 = arith.constant dense<0.000000e+00> : vector<8x240xf32>
    %169 = tpu.matmul %166, %168, %cst_60 {dimension_numbers = #tpu.dot_dimension_numbers<[1], [0], [0], [1], [0, 0, 1, 1], [], []>} : vector<8x30xbf16>, vector<30x240xbf16>, vector<8x240xf32> -> vector<8x240xf32>
    %170 = arith.addf %144, %169 : vector<8x240xf32>
    %171 = vector.extract_strided_slice %13 {offsets = [0, 180], sizes = [8, 30], strides = [1, 1]} : vector<8x720xf32> to vector<8x30xf32>
    %cst_61 = arith.constant 0.182574183 : f32
    %172 = vector.broadcast %cst_61 : f32 to vector<8x30xf32>
    %173 = arith.mulf %171, %172 : vector<8x30xf32>
    %174 = vector.extract_strided_slice %13 {offsets = [0, 420], sizes = [8, 30], strides = [1, 1]} : vector<8x720xf32> to vector<8x30xf32>
    %175 = vector.extract_strided_slice %13 {offsets = [0, 660], sizes = [8, 30], strides = [1, 1]} : vector<8x720xf32> to vector<8x30xf32>
    %176 = arith.truncf %173 : vector<8x30xf32> to vector<8x30xbf16>
    %177 = arith.truncf %174 : vector<8x30xf32> to vector<8x30xbf16>
    "tpu.trace_start"() <{level = 10 : i32, message = "qd,kd->qk"}> : () -> ()
    %cst_62 = arith.constant dense<0.000000e+00> : vector<8x8xf32>
    %178 = tpu.matmul %176, %177, %cst_62 {dimension_numbers = #tpu.dot_dimension_numbers<[1], [1], [0], [0], [0, 0, 1, 0], [], []>} : vector<8x30xbf16>, vector<8x30xbf16>, vector<8x8xf32> -> vector<8x8xf32>
    "tpu.trace_stop"() : () -> ()
    %cst_63 = arith.constant dense<0xFF800000> : vector<8xf32>
    %179 = vector.multi_reduction <maximumf>, %178, %cst_63 [1] : vector<8x8xf32> to vector<8xf32>
    %180 = vector.shape_cast %179 : vector<8xf32> to vector<8x1xf32>
    %181 = vector.broadcast %180 : vector<8x1xf32> to vector<8x8xf32>
    %182 = arith.subf %178, %181 : vector<8x8xf32>
    %183 = math.exp %182 : vector<8x8xf32>
    %cst_64 = arith.constant dense<0.000000e+00> : vector<8xf32>
    %184 = vector.multi_reduction <add>, %183, %cst_64 [1] : vector<8x8xf32> to vector<8xf32>
    %185 = vector.shape_cast %184 : vector<8xf32> to vector<8x1xf32>
    %186 = tpu.reciprocal %185 {approx = true} : vector<8x1xf32> -> vector<8x1xf32>
    %187 = vector.broadcast %186 : vector<8x1xf32> to vector<8x8xf32>
    %188 = arith.mulf %183, %187 : vector<8x8xf32>
    %189 = arith.truncf %188 : vector<8x8xf32> to vector<8x8xbf16>
    %190 = arith.truncf %175 : vector<8x30xf32> to vector<8x30xbf16>
    %cst_65 = arith.constant dense<0.000000e+00> : vector<8x30xf32>
    %191 = tpu.matmul %189, %190, %cst_65 {dimension_numbers = #tpu.dot_dimension_numbers<[1], [0], [0], [1], [0, 0, 1, 1], [], []>} : vector<8x8xbf16>, vector<8x30xbf16>, vector<8x30xf32> -> vector<8x30xf32>
    %192 = arith.truncf %191 : vector<8x30xf32> to vector<8x30xbf16>
    %c6 = arith.constant 6 : index
    %c0_66 = arith.constant 0 : index
    %c0_67 = arith.constant 0 : index
    %193 = vector.load %arg6[%c6, %c0_66, %c0_67] : memref<8x30x240xbf16, #tpu.memory_space<vmem>>, vector<1x30x240xbf16>
    %194 = vector.shape_cast %193 : vector<1x30x240xbf16> to vector<30x240xbf16>
    %cst_68 = arith.constant dense<0.000000e+00> : vector<8x240xf32>
    %195 = tpu.matmul %192, %194, %cst_68 {dimension_numbers = #tpu.dot_dimension_numbers<[1], [0], [0], [1], [0, 0, 1, 1], [], []>} : vector<8x30xbf16>, vector<30x240xbf16>, vector<8x240xf32> -> vector<8x240xf32>
    %196 = arith.addf %170, %195 : vector<8x240xf32>
    %197 = vector.extract_strided_slice %13 {offsets = [0, 210], sizes = [8, 30], strides = [1, 1]} : vector<8x720xf32> to vector<8x30xf32>
    %cst_69 = arith.constant 0.182574183 : f32
    %198 = vector.broadcast %cst_69 : f32 to vector<8x30xf32>
    %199 = arith.mulf %197, %198 : vector<8x30xf32>
    %200 = vector.extract_strided_slice %13 {offsets = [0, 450], sizes = [8, 30], strides = [1, 1]} : vector<8x720xf32> to vector<8x30xf32>
    %201 = vector.extract_strided_slice %13 {offsets = [0, 690], sizes = [8, 30], strides = [1, 1]} : vector<8x720xf32> to vector<8x30xf32>
    %202 = arith.truncf %199 : vector<8x30xf32> to vector<8x30xbf16>
    %203 = arith.truncf %200 : vector<8x30xf32> to vector<8x30xbf16>
    "tpu.trace_start"() <{level = 10 : i32, message = "qd,kd->qk"}> : () -> ()
    %cst_70 = arith.constant dense<0.000000e+00> : vector<8x8xf32>
    %204 = tpu.matmul %202, %203, %cst_70 {dimension_numbers = #tpu.dot_dimension_numbers<[1], [1], [0], [0], [0, 0, 1, 0], [], []>} : vector<8x30xbf16>, vector<8x30xbf16>, vector<8x8xf32> -> vector<8x8xf32>
    "tpu.trace_stop"() : () -> ()
    %cst_71 = arith.constant dense<0xFF800000> : vector<8xf32>
    %205 = vector.multi_reduction <maximumf>, %204, %cst_71 [1] : vector<8x8xf32> to vector<8xf32>
    %206 = vector.shape_cast %205 : vector<8xf32> to vector<8x1xf32>
    %207 = vector.broadcast %206 : vector<8x1xf32> to vector<8x8xf32>
    %208 = arith.subf %204, %207 : vector<8x8xf32>
    %209 = math.exp %208 : vector<8x8xf32>
    %cst_72 = arith.constant dense<0.000000e+00> : vector<8xf32>
    %210 = vector.multi_reduction <add>, %209, %cst_72 [1] : vector<8x8xf32> to vector<8xf32>
    %211 = vector.shape_cast %210 : vector<8xf32> to vector<8x1xf32>
    %212 = tpu.reciprocal %211 {approx = true} : vector<8x1xf32> -> vector<8x1xf32>
    %213 = vector.broadcast %212 : vector<8x1xf32> to vector<8x8xf32>
    %214 = arith.mulf %209, %213 : vector<8x8xf32>
    %215 = arith.truncf %214 : vector<8x8xf32> to vector<8x8xbf16>
    %216 = arith.truncf %201 : vector<8x30xf32> to vector<8x30xbf16>
    %cst_73 = arith.constant dense<0.000000e+00> : vector<8x30xf32>
    %217 = tpu.matmul %215, %216, %cst_73 {dimension_numbers = #tpu.dot_dimension_numbers<[1], [0], [0], [1], [0, 0, 1, 1], [], []>} : vector<8x8xbf16>, vector<8x30xbf16>, vector<8x30xf32> -> vector<8x30xf32>
    %218 = arith.truncf %217 : vector<8x30xf32> to vector<8x30xbf16>
    %c7 = arith.constant 7 : index
    %c0_74 = arith.constant 0 : index
    %c0_75 = arith.constant 0 : index
    %219 = vector.load %arg6[%c7, %c0_74, %c0_75] : memref<8x30x240xbf16, #tpu.memory_space<vmem>>, vector<1x30x240xbf16>
    %220 = vector.shape_cast %219 : vector<1x30x240xbf16> to vector<30x240xbf16>
    %cst_76 = arith.constant dense<0.000000e+00> : vector<8x240xf32>
    %221 = tpu.matmul %218, %220, %cst_76 {dimension_numbers = #tpu.dot_dimension_numbers<[1], [0], [0], [1], [0, 0, 1, 1], [], []>} : vector<8x30xbf16>, vector<30x240xbf16>, vector<8x240xf32> -> vector<8x240xf32>
    %222 = arith.addf %196, %221 : vector<8x240xf32>
    %c0_77 = arith.constant 0 : index
    %c0_78 = arith.constant 0 : index
    %223 = vector.load %arg7[%c0_77, %c0_78] : memref<1x240xf32, #tpu.memory_space<vmem>>, vector<1x240xf32>
    %224 = vector.broadcast %223 : vector<1x240xf32> to vector<8x240xf32>
    %225 = arith.addf %222, %224 : vector<8x240xf32>
    %226 = arith.addf %7, %225 : vector<8x240xf32>
    %c0_79 = arith.constant 0 : index
    %c0_80 = arith.constant 0 : index
    %227 = vector.load %arg8[%c0_79, %c0_80] : memref<1x240xf32, #tpu.memory_space<vmem>>, vector<1x240xf32>
    %c0_81 = arith.constant 0 : index
    %c0_82 = arith.constant 0 : index
    %228 = vector.load %arg9[%c0_81, %c0_82] : memref<1x240xf32, #tpu.memory_space<vmem>>, vector<1x240xf32>
    %cst_83 = arith.constant dense<0.000000e+00> : vector<8xf32>
    %229 = vector.multi_reduction <add>, %226, %cst_83 [1] : vector<8x240xf32> to vector<8xf32>
    %230 = vector.shape_cast %229 : vector<8xf32> to vector<8x1xf32>
    %cst_84 = arith.constant 2.400000e+02 : f32
    %231 = vector.broadcast %cst_84 : f32 to vector<8x1xf32>
    %232 = arith.divf %230, %231 : vector<8x1xf32>
    %233 = vector.broadcast %232 : vector<8x1xf32> to vector<8x240xf32>
    %234 = arith.subf %226, %233 : vector<8x240xf32>
    %235 = arith.mulf %234, %234 : vector<8x240xf32>
    %cst_85 = arith.constant dense<0.000000e+00> : vector<8xf32>
    %236 = vector.multi_reduction <add>, %235, %cst_85 [1] : vector<8x240xf32> to vector<8xf32>
    %237 = vector.shape_cast %236 : vector<8xf32> to vector<8x1xf32>
    %cst_86 = arith.constant 2.400000e+02 : f32
    %238 = vector.broadcast %cst_86 : f32 to vector<8x1xf32>
    %239 = arith.divf %237, %238 : vector<8x1xf32>
    %cst_87 = arith.constant 9.99999974E-6 : f32
    %240 = vector.broadcast %cst_87 : f32 to vector<8x1xf32>
    %241 = arith.addf %239, %240 : vector<8x1xf32>
    %242 = math.rsqrt %241 : vector<8x1xf32>
    %243 = vector.broadcast %242 : vector<8x1xf32> to vector<8x240xf32>
    %244 = arith.mulf %234, %243 : vector<8x240xf32>
    %245 = vector.broadcast %227 : vector<1x240xf32> to vector<8x240xf32>
    %246 = arith.mulf %244, %245 : vector<8x240xf32>
    %247 = vector.broadcast %228 : vector<1x240xf32> to vector<8x240xf32>
    %248 = arith.addf %246, %247 : vector<8x240xf32>
    %249 = arith.truncf %248 : vector<8x240xf32> to vector<8x240xbf16>
    %c0_88 = arith.constant 0 : index
    %c0_89 = arith.constant 0 : index
    %250 = vector.load %arg10[%c0_88, %c0_89] : memref<240x512xbf16, #tpu.memory_space<vmem>>, vector<240x512xbf16>
    %cst_90 = arith.constant dense<0.000000e+00> : vector<8x512xf32>
    %251 = tpu.matmul %249, %250, %cst_90 {dimension_numbers = #tpu.dot_dimension_numbers<[1], [0], [0], [1], [0, 0, 1, 1], [], []>} : vector<8x240xbf16>, vector<240x512xbf16>, vector<8x512xf32> -> vector<8x512xf32>
    %c0_91 = arith.constant 0 : index
    %c0_92 = arith.constant 0 : index
    %252 = vector.load %arg11[%c0_91, %c0_92] : memref<1x512xf32, #tpu.memory_space<vmem>>, vector<1x512xf32>
    %253 = vector.broadcast %252 : vector<1x512xf32> to vector<8x512xf32>
    %254 = arith.addf %251, %253 : vector<8x512xf32>
    %cst_93 = arith.constant 0.000000e+00 : f32
    %255 = vector.broadcast %cst_93 : f32 to vector<8x512xf32>
    %256 = arith.maximumf %254, %255 : vector<8x512xf32>
    %257 = arith.truncf %256 : vector<8x512xf32> to vector<8x512xbf16>
    %c0_94 = arith.constant 0 : index
    %c0_95 = arith.constant 0 : index
    %258 = vector.load %arg12[%c0_94, %c0_95] : memref<512x240xbf16, #tpu.memory_space<vmem>>, vector<512x240xbf16>
    %cst_96 = arith.constant dense<0.000000e+00> : vector<8x240xf32>
    %259 = tpu.matmul %257, %258, %cst_96 {dimension_numbers = #tpu.dot_dimension_numbers<[1], [0], [0], [1], [0, 0, 1, 1], [], []>} : vector<8x512xbf16>, vector<512x240xbf16>, vector<8x240xf32> -> vector<8x240xf32>
    %c0_97 = arith.constant 0 : index
    %c0_98 = arith.constant 0 : index
    %260 = vector.load %arg13[%c0_97, %c0_98] : memref<1x240xf32, #tpu.memory_space<vmem>>, vector<1x240xf32>
    %261 = vector.broadcast %260 : vector<1x240xf32> to vector<8x240xf32>
    %262 = arith.addf %259, %261 : vector<8x240xf32>
    %263 = arith.addf %248, %262 : vector<8x240xf32>
    %c0_99 = arith.constant 0 : index
    %c0_100 = arith.constant 0 : index
    %264 = vector.load %arg14[%c0_99, %c0_100] : memref<1x240xf32, #tpu.memory_space<vmem>>, vector<1x240xf32>
    %c0_101 = arith.constant 0 : index
    %c0_102 = arith.constant 0 : index
    %265 = vector.load %arg15[%c0_101, %c0_102] : memref<1x240xf32, #tpu.memory_space<vmem>>, vector<1x240xf32>
    %cst_103 = arith.constant dense<0.000000e+00> : vector<8xf32>
    %266 = vector.multi_reduction <add>, %263, %cst_103 [1] : vector<8x240xf32> to vector<8xf32>
    %267 = vector.shape_cast %266 : vector<8xf32> to vector<8x1xf32>
    %cst_104 = arith.constant 2.400000e+02 : f32
    %268 = vector.broadcast %cst_104 : f32 to vector<8x1xf32>
    %269 = arith.divf %267, %268 : vector<8x1xf32>
    %270 = vector.broadcast %269 : vector<8x1xf32> to vector<8x240xf32>
    %271 = arith.subf %263, %270 : vector<8x240xf32>
    %272 = arith.mulf %271, %271 : vector<8x240xf32>
    %cst_105 = arith.constant dense<0.000000e+00> : vector<8xf32>
    %273 = vector.multi_reduction <add>, %272, %cst_105 [1] : vector<8x240xf32> to vector<8xf32>
    %274 = vector.shape_cast %273 : vector<8xf32> to vector<8x1xf32>
    %cst_106 = arith.constant 2.400000e+02 : f32
    %275 = vector.broadcast %cst_106 : f32 to vector<8x1xf32>
    %276 = arith.divf %274, %275 : vector<8x1xf32>
    %cst_107 = arith.constant 9.99999974E-6 : f32
    %277 = vector.broadcast %cst_107 : f32 to vector<8x1xf32>
    %278 = arith.addf %276, %277 : vector<8x1xf32>
    %279 = math.rsqrt %278 : vector<8x1xf32>
    %280 = vector.broadcast %279 : vector<8x1xf32> to vector<8x240xf32>
    %281 = arith.mulf %271, %280 : vector<8x240xf32>
    %282 = vector.broadcast %264 : vector<1x240xf32> to vector<8x240xf32>
    %283 = arith.mulf %281, %282 : vector<8x240xf32>
    %284 = vector.broadcast %265 : vector<1x240xf32> to vector<8x240xf32>
    %285 = arith.addf %283, %284 : vector<8x240xf32>
    %cst_108 = arith.constant dense<0.000000e+00> : vector<240xf32>
    %286 = vector.multi_reduction <add>, %285, %cst_108 [0] : vector<8x240xf32> to vector<240xf32>
    %287 = vector.shape_cast %286 : vector<240xf32> to vector<1x240xf32>
    %cst_109 = arith.constant 1.250000e-01 : f32
    %288 = vector.broadcast %cst_109 : f32 to vector<1x240xf32>
    %289 = arith.mulf %287, %288 : vector<1x240xf32>
    %290 = vector.shape_cast %289 : vector<1x240xf32> to vector<1x1x240xf32>
    %c0_110 = arith.constant 0 : index
    %c0_111 = arith.constant 0 : index
    %c0_112 = arith.constant 0 : index
    %291 = vector.load %arg16[%c0_110, %c0_111, %c0_112] : memref<1x1x240xf32, #tpu.memory_space<vmem>>, vector<1x1x240xf32>
    tpu.vector_store %arg16[%c0_110, %c0_111, %c0_112], %290 {strides = array<i32>} : memref<1x1x240xf32, #tpu.memory_space<vmem>>, vector<1x1x240xf32>,
    return
  }
  func.func @transform_0(%arg0: i32) -> (i32, i32, i32) {
    %c0_i32 = arith.constant 0 : i32
    %c0_i32_0 = arith.constant 0 : i32
    %c0_i32_1 = arith.constant 0 : i32
    return %arg0, %c0_i32, %c0_i32_0 : i32, i32, i32
  }
  func.func @transform_1(%arg0: i32) -> (i32, i32) {
    %c0_i32 = arith.constant 0 : i32
    %c0_i32_0 = arith.constant 0 : i32
    %c0_i32_1 = arith.constant 0 : i32
    return %c0_i32, %c0_i32_0 : i32, i32
  }
  func.func @transform_2(%arg0: i32) -> (i32, i32) {
    %c0_i32 = arith.constant 0 : i32
    %c0_i32_0 = arith.constant 0 : i32
    %c0_i32_1 = arith.constant 0 : i32
    return %c0_i32, %c0_i32_0 : i32, i32
  }
  func.func @transform_3(%arg0: i32) -> (i32, i32) {
    %c0_i32 = arith.constant 0 : i32
    %c0_i32_0 = arith.constant 0 : i32
    %c0_i32_1 = arith.constant 0 : i32
    return %c0_i32, %c0_i32_0 : i32, i32
  }
  func.func @transform_4(%arg0: i32) -> (i32, i32) {
    %c0_i32 = arith.constant 0 : i32
    %c0_i32_0 = arith.constant 0 : i32
    %c0_i32_1 = arith.constant 0 : i32
    return %c0_i32, %c0_i32_0 : i32, i32
  }
  func.func @transform_5(%arg0: i32) -> (i32, i32, i32) {
    %c0_i32 = arith.constant 0 : i32
    %c0_i32_0 = arith.constant 0 : i32
    %c0_i32_1 = arith.constant 0 : i32
    %c0_i32_2 = arith.constant 0 : i32
    return %c0_i32, %c0_i32_0, %c0_i32_1 : i32, i32, i32
  }
  func.func @transform_6(%arg0: i32) -> (i32, i32) {
    %c0_i32 = arith.constant 0 : i32
    %c0_i32_0 = arith.constant 0 : i32
    %c0_i32_1 = arith.constant 0 : i32
    return %c0_i32, %c0_i32_0 : i32, i32
  }
  func.func @transform_7(%arg0: i32) -> (i32, i32) {
    %c0_i32 = arith.constant 0 : i32
    %c0_i32_0 = arith.constant 0 : i32
    %c0_i32_1 = arith.constant 0 : i32
    return %c0_i32, %c0_i32_0 : i32, i32
  }
  func.func @transform_8(%arg0: i32) -> (i32, i32) {
    %c0_i32 = arith.constant 0 : i32
    %c0_i32_0 = arith.constant 0 : i32
    %c0_i32_1 = arith.constant 0 : i32
    return %c0_i32, %c0_i32_0 : i32, i32
  }
  func.func @transform_9(%arg0: i32) -> (i32, i32) {
    %c0_i32 = arith.constant 0 : i32
    %c0_i32_0 = arith.constant 0 : i32
    %c0_i32_1 = arith.constant 0 : i32
    return %c0_i32, %c0_i32_0 : i32, i32
  }
  func.func @transform_10(%arg0: i32) -> (i32, i32) {
    %c0_i32 = arith.constant 0 : i32
    %c0_i32_0 = arith.constant 0 : i32
    %c0_i32_1 = arith.constant 0 : i32
    return %c0_i32, %c0_i32_0 : i32, i32
  }
  func.func @transform_11(%arg0: i32) -> (i32, i32) {
    %c0_i32 = arith.constant 0 : i32
    %c0_i32_0 = arith.constant 0 : i32
    %c0_i32_1 = arith.constant 0 : i32
    return %c0_i32, %c0_i32_0 : i32, i32
  }
  func.func @transform_12(%arg0: i32) -> (i32, i32) {
    %c0_i32 = arith.constant 0 : i32
    %c0_i32_0 = arith.constant 0 : i32
    %c0_i32_1 = arith.constant 0 : i32
    return %c0_i32, %c0_i32_0 : i32, i32
  }
  func.func @transform_13(%arg0: i32) -> (i32, i32) {
    %c0_i32 = arith.constant 0 : i32
    %c0_i32_0 = arith.constant 0 : i32
    %c0_i32_1 = arith.constant 0 : i32
    return %c0_i32, %c0_i32_0 : i32, i32
  }
  func.func @transform_14(%arg0: i32) -> (i32, i32) {
    %c0_i32 = arith.constant 0 : i32
    %c0_i32_0 = arith.constant 0 : i32
    %c0_i32_1 = arith.constant 0 : i32
    return %c0_i32, %c0_i32_0 : i32, i32
  }
  func.func @transform_15(%arg0: i32) -> (i32, i32, i32) {
    %c0_i32 = arith.constant 0 : i32
    %c0_i32_0 = arith.constant 0 : i32
    %c0_i32_1 = arith.constant 0 : i32
    return %arg0, %c0_i32, %c0_i32_0 : i32, i32, i32
  }
}

module attributes {stable_mosaic.version = 11 : i64} {
  func.func @_pred_head_kernel(%arg0: memref<2x240xf32, #tpu.memory_space<vmem>>, %arg1: memref<240x120xbf16, #tpu.memory_space<vmem>>, %arg2: memref<1x120xf32, #tpu.memory_space<vmem>>, %arg3: memref<1x120xf32, #tpu.memory_space<vmem>>, %arg4: memref<1x120xf32, #tpu.memory_space<vmem>>, %arg5: memref<1x120xf32, #tpu.memory_space<vmem>>, %arg6: memref<1x120xf32, #tpu.memory_space<vmem>>, %arg7: memref<120x600xbf16, #tpu.memory_space<vmem>>, %arg8: memref<1x600xf32, #tpu.memory_space<vmem>>, %arg9: memref<2x600xf32, #tpu.memory_space<vmem>>) attributes {dimension_semantics = [], scalar_prefetch = 0 : i64, scratch_operands = 0 : i64, tpu.core_type = #tpu.core_type<tc>} {
    %c0 = arith.constant 0 : index
    %c0_0 = arith.constant 0 : index
    %0 = vector.load %arg0[%c0, %c0_0] : memref<2x240xf32, #tpu.memory_space<vmem>>, vector<2x240xf32>
    %1 = arith.truncf %0 : vector<2x240xf32> to vector<2x240xbf16>
    %c0_1 = arith.constant 0 : index
    %c0_2 = arith.constant 0 : index
    %2 = vector.load %arg1[%c0_1, %c0_2] : memref<240x120xbf16, #tpu.memory_space<vmem>>, vector<240x120xbf16>
    %cst = arith.constant dense<0.000000e+00> : vector<2x120xf32>
    %3 = tpu.matmul %1, %2, %cst {dimension_numbers = #tpu.dot_dimension_numbers<[1], [0], [0], [1], [0, 0, 1, 1], [], []>} : vector<2x240xbf16>, vector<240x120xbf16>, vector<2x120xf32> -> vector<2x120xf32>
    %c0_3 = arith.constant 0 : index
    %c0_4 = arith.constant 0 : index
    %4 = vector.load %arg2[%c0_3, %c0_4] : memref<1x120xf32, #tpu.memory_space<vmem>>, vector<1x120xf32>
    %5 = vector.broadcast %4 : vector<1x120xf32> to vector<2x120xf32>
    %6 = arith.addf %3, %5 : vector<2x120xf32>
    %cst_5 = arith.constant 0.000000e+00 : f32
    %7 = vector.broadcast %cst_5 : f32 to vector<2x120xf32>
    %8 = arith.maximumf %6, %7 : vector<2x120xf32>
    %c0_6 = arith.constant 0 : index
    %c0_7 = arith.constant 0 : index
    %9 = vector.load %arg6[%c0_6, %c0_7] : memref<1x120xf32, #tpu.memory_space<vmem>>, vector<1x120xf32>
    %cst_8 = arith.constant 9.99999974E-6 : f32
    %10 = vector.broadcast %cst_8 : f32 to vector<1x120xf32>
    %11 = arith.addf %9, %10 : vector<1x120xf32>
    %12 = math.rsqrt %11 : vector<1x120xf32>
    %c0_9 = arith.constant 0 : index
    %c0_10 = arith.constant 0 : index
    %13 = vector.load %arg5[%c0_9, %c0_10] : memref<1x120xf32, #tpu.memory_space<vmem>>, vector<1x120xf32>
    %14 = vector.broadcast %13 : vector<1x120xf32> to vector<2x120xf32>
    %15 = arith.subf %8, %14 : vector<2x120xf32>
    %16 = vector.broadcast %12 : vector<1x120xf32> to vector<2x120xf32>
    %17 = arith.mulf %15, %16 : vector<2x120xf32>
    %c0_11 = arith.constant 0 : index
    %c0_12 = arith.constant 0 : index
    %18 = vector.load %arg3[%c0_11, %c0_12] : memref<1x120xf32, #tpu.memory_space<vmem>>, vector<1x120xf32>
    %19 = vector.broadcast %18 : vector<1x120xf32> to vector<2x120xf32>
    %20 = arith.mulf %17, %19 : vector<2x120xf32>
    %c0_13 = arith.constant 0 : index
    %c0_14 = arith.constant 0 : index
    %21 = vector.load %arg4[%c0_13, %c0_14] : memref<1x120xf32, #tpu.memory_space<vmem>>, vector<1x120xf32>
    %22 = vector.broadcast %21 : vector<1x120xf32> to vector<2x120xf32>
    %23 = arith.addf %20, %22 : vector<2x120xf32>
    %24 = arith.truncf %23 : vector<2x120xf32> to vector<2x120xbf16>
    %c0_15 = arith.constant 0 : index
    %c0_16 = arith.constant 0 : index
    %25 = vector.load %arg7[%c0_15, %c0_16] : memref<120x600xbf16, #tpu.memory_space<vmem>>, vector<120x600xbf16>
    %cst_17 = arith.constant dense<0.000000e+00> : vector<2x600xf32>
    %26 = tpu.matmul %24, %25, %cst_17 {dimension_numbers = #tpu.dot_dimension_numbers<[1], [0], [0], [1], [0, 0, 1, 1], [], []>} : vector<2x120xbf16>, vector<120x600xbf16>, vector<2x600xf32> -> vector<2x600xf32>
    %c0_18 = arith.constant 0 : index
    %c0_19 = arith.constant 0 : index
    %27 = vector.load %arg8[%c0_18, %c0_19] : memref<1x600xf32, #tpu.memory_space<vmem>>, vector<1x600xf32>
    %28 = vector.broadcast %27 : vector<1x600xf32> to vector<2x600xf32>
    %29 = arith.addf %26, %28 : vector<2x600xf32>
    %c0_20 = arith.constant 0 : index
    %c0_21 = arith.constant 0 : index
    %30 = vector.load %arg9[%c0_20, %c0_21] : memref<2x600xf32, #tpu.memory_space<vmem>>, vector<2x600xf32>
    tpu.vector_store %arg9[%c0_20, %c0_21], %29 {strides = array<i32>} : memref<2x600xf32, #tpu.memory_space<vmem>>, vector<2x600xf32>,
    return
  }
}

</mosaic_0001>

<bundles_post_ra>
// kernel: classifier3_forward.3
= control target key start
LH: loop header
LB: loop body
LE: loop exit
PB: predicated region body
PF: predicated region fallthrough
CT: control target
= control target key end

     0   :  { %vm486_vm0 = vcmask 1043456   ;;  %s1238_s0 = inlined_call_operand.vmem [shape: f32[2,240], index: 0, kind: input, shape index: {}]   ;;  %s1239_s1 = inlined_call_operand.vmem [shape: bf16[240,120], index: 1, kind: input, shape index: {}]   ;;  %s1240_s2 = inlined_call_operand.vmem [shape: f32[1,120], index: 2, kind: input, shape index: {}]   ;;  %s1241_s3 = inlined_call_operand.vmem [shape: f32[1,120], index: 3, kind: input, shape index: {}]   ;;  %s1242_s4 = inlined_call_operand.vmem [shape: f32[1,120], index: 4, kind: input, shape index: {}]   ;;  %s1243_s5 = inlined_call_operand.vmem [shape: f32[1,120], index: 5, kind: input, shape index: {}]   ;;  %s1244_s6 = inlined_call_operand.vmem [shape: f32[1,120], index: 6, kind: input, shape index: {}]   ;;  %s1245_s7 = inlined_call_operand.vmem [shape: bf16[120,600], index: 7, kind: input, shape index: {}]   ;;  %s1246_s8 = inlined_call_operand.vmem [shape: f32[1,600], index: 8, kind: input, shape index: {}]   ;;  %s1247_s9 = inlined_call_operand.hbm [shape: f32[2,600], index: 9, kind: output, shape index: {}]  }
   0x1   :  { %v812_v0 = vld [vmem:[%s1239_s1 + $0x38] sm:$0xff]  ;;  %v819_v1 = vld [vmem:[%s1239_s1 + $0x70] sm:$0xff]  ;;  %v818_v3 = vld [vmem:[%s1239_s1 + $0x68] sm:$0xff] }
   0x2   :  { %171 = vmatpush.bf16.msra.mxu0 %v812_v0  ;;  %185 = vmatpush.bf16.msra.mxu1 %v819_v1  ;;  %v811_v2 = vld [vmem:[%s1239_s1 + $0x30] sm:$0xff]  ;;  %v34_v4 = vld [vmem:[%s1238_s0] sm:$0xf]  ;;  %v272_v5 = vld [vmem:[%s1245_s7 + $0x118] sm:$0xff] }
   0x3   :  { %36 = vst [vmem:[#allocation1] ss:$4 sm:$0xff] %v34_v4  ;;  %v810_v6 = vld [vmem:[%s1239_s1 + $0x28] sm:$0xff]  ;;  %v817_v7 = vld [vmem:[%s1239_s1 + $0x60] sm:$0xff]  ;;  %v402_v8 = vunpack.c.l.b16 %v272_v5  ;;  %v403_v9 = vunpack.c.h.b16 %v272_v5  ;;  %v782_v11 = vld [vmem:[%s1245_s7 + $0xf0] sm:$0xf] }
   0x4   :  { %v852_v12 = vld [vmem:[%s1245_s7 + $0x100] sm:$0xf0]  ;;  %v850_v14 = vld [vmem:[%s1245_s7 + $0xf4] sm:$0xf]  ;;  %v784_v15 = vld [vmem:[%s1245_s7 + $0x104] sm:$0xf0] }
   0x5   :  { %v442_v10 = vpack.c.b16 %v402_v8, %v402_v8  ;;  %v443_v13 = vpack.c.b16 %v403_v9, %v403_v9  ;;  %v809_v16 = vld [vmem:[%s1239_s1 + $0x20] sm:$0xff]  ;;  %v816_v17 = vld [vmem:[%s1239_s1 + $0x58] sm:$0xff]  ;;  %v783_v20 = vor.u32 %v852_v12, %v782_v11  ;;  %v787_v21 = vor.u32 %v850_v14, %v784_v15  ;;  %v762_v22 = vld [vmem:[%s1245_s7 + $0xc8] sm:$0xf] }
   0x6   :  { %172 = vmatpush.bf16.msra.mxu0 %v811_v2  ;;  %186 = vmatpush.bf16.msra.mxu1 %v818_v3  ;;  %v847_v23 = vld [vmem:[%s1245_s7 + $0xd8] sm:$0xf0]  ;;  %v845_v24 = vld [vmem:[%s1245_s7 + $0xcc] sm:$0xf]  ;;  %v273_v25 = vld [vmem:[%s1245_s7 + $0x120] sm:$0xff] }
   0x7   :  { %v488_v18 = vsel %vm486_vm0, %v442_v10, 0  ;;  %v491_v19 = vsel %vm486_vm0, %v443_v13, 0  ;;  %v764_v26 = vld [vmem:[%s1245_s7 + $0xdc] sm:$0xf0]  ;;  %v808_v27 = vld [vmem:[%s1239_s1 + $0x18] sm:$0xff]  ;;  %v815_v28 = vld [vmem:[%s1239_s1 + $0x50] sm:$0xff]  ;;  %v763_v30 = vor.u32 %v847_v23, %v762_v22  ;;  %v404_v33 = vunpack.c.l.b16 %v273_v25 }
   0x8   :  { %502 = vmatpush.bf16.msra.mxu2 %v488_v18  ;;  %515 = vmatpush.bf16.msra.mxu3 %v491_v19  ;;  %v742_v29 = vld [vmem:[%s1245_s7 + $0xa0] sm:$0xf]  ;;  %v767_v31 = vor.u32 %v845_v24, %v764_v26  ;;  %v842_v32 = vld [vmem:[%s1245_s7 + $0xb0] sm:$0xf0] }
   0xa   :  { %173 = vmatpush.bf16.msra.mxu0 %v810_v6  ;;  %187 = vmatpush.bf16.msra.mxu1 %v817_v7 }
   0xc   :  { %503 = vmatpush.bf16.msra.mxu2 %v783_v20  ;;  %516 = vmatpush.bf16.msra.mxu3 %v787_v21 }
   0xe   :  { %174 = vmatpush.bf16.msra.mxu0 %v809_v16  ;;  %188 = vmatpush.bf16.msra.mxu1 %v816_v17 }
   0xf   :  { %14 = vsyncpa [#allocation3], 0  ;;  %v807_v34 = vld [vmem:[%s1239_s1 + $0x10] sm:$0xff]  ;;  %v814_v35 = vld [vmem:[%s1239_s1 + $0x48] sm:$0xff]  ;;  %v743_v36 = vor.u32 %v842_v32, %v742_v29  ;;  %v444_v37 = vpack.c.b16 %v404_v33, %v404_v33  ;;  %v405_v38 = vunpack.c.h.b16 %v273_v25  ;;  %vm167_vm1 = vcmask 916480   ;;  %s590_s12 = sshll.u32 %s1247_s9, 4  ;;  %s591_s12 = int_to_ptr.hbm [resolvable:$true] %s590_s12 }
  0x10   :  { %504 = vmatpush.bf16.msra.mxu2 %v763_v30  ;;  %517 = vmatpush.bf16.msra.mxu3 %v767_v31  ;;  %v722_v39 = vld [vmem:[%s1245_s7 + $0x78] sm:$0xf]  ;;  %v837_v40 = vld [vmem:[%s1245_s7 + $0x88] sm:$0xf0]  ;;  %v813_v42 = vld [vmem:[%s1239_s1 + $0x40] sm:$0xff]  ;;  %vm482_vm5 = vcmask 982016  }
  0x11   :  { %v806_v41 = vld [vmem:[%s1239_s1 + $0x8] sm:$0xff]  ;;  %v723_v44 = vor.u32 %v837_v40, %v722_v39  ;;  %v494_v45 = vsel %vm486_vm0, %v444_v37, 0  ;;  %v445_v46 = vpack.c.b16 %v405_v38, %v405_v38  ;;  %v790_v47 = vld [vmem:[%s1245_s7 + $0xf8] sm:$0xf]  ;;  %v702_v50 = vld [vmem:[%s1245_s7 + $0x50] sm:$0xf] }
  0x12   :  { %175 = vmatpush.bf16.msra.mxu0 %v808_v27  ;;  %189 = vmatpush.bf16.msra.mxu1 %v815_v28  ;;  %v38_v43 = vld.sshfl [vmem:[#allocation1 + $0x8] sm:$0xff pattern:$0x73625140]  ;;  %v832_v51 = vld [vmem:[%s1245_s7 + $0x60] sm:$0xf0]  ;;  %vm576_vm6 = vcmask 1045508  }
  0x13   :  { %v853_v48 = vld [vmem:[%s1245_s7 + $0x108] sm:$0xf0]  ;;  %v42_v49 = vpack.c.bf16 %v38_v43, %v38_v43  ;;  %v805_v52 = vld [vmem:[%s1239_s1] sm:$0xff]  ;;  %v851_v55 = vld [vmem:[%s1245_s7 + $0xfc] sm:$0xf]  ;;  %v497_v57 = vsel %vm486_vm0, %v445_v46, 0  ;;  %v703_v58 = vor.u32 %v832_v51, %v702_v50 }
  0x14   :  { %505 = vmatpush.bf16.msra.mxu2 %v743_v36  ;;  %v37_v53 = vld.sshfl [vmem:[#allocation1] sm:$0xff pattern:$0x73625140]  ;;  %v791_v54 = vor.u32 %v853_v48, %v790_v47  ;;  %v792_v56 = vld [vmem:[%s1245_s7 + $0x10c] sm:$0xf0]  ;;  %vm574_vm7 = vcmask 1041408  }
  0x15   :  { %v770_v59 = vld [vmem:[%s1245_s7 + $0xd0] sm:$0xf]  ;;  %v848_v60 = vld [vmem:[%s1245_s7 + $0xe0] sm:$0xf0]  ;;  %v41_v61 = vpack.c.bf16 %v37_v53, %v37_v53  ;;  %v795_v62 = vor.u32 %v851_v55, %v792_v56  ;;  %v846_v0 = vld [vmem:[%s1245_s7 + $0xd4] sm:$0xf] }
  0x16   :  { %176 = vmatpush.bf16.msra.mxu0 %v807_v34  ;;  %190 = vmatpush.bf16.msra.mxu1 %v814_v35  ;;  %v771_v63 = vor.u32 %v848_v60, %v770_v59  ;;  %v772_v1 = vld [vmem:[%s1245_s7 + $0xe4] sm:$0xf0]  ;;  %v827_v4 = vld [vmem:[%s1245_s7 + $0x38] sm:$0xf0]  ;;  %v840_v6 = vld [vmem:[%s1245_s7 + $0xa4] sm:$0xf] }
  0x17   :  { %v775_v2 = vor.u32 %v846_v0, %v772_v1  ;;  %v682_v3 = vld [vmem:[%s1245_s7 + $0x28] sm:$0xf]  ;;  %v744_v7 = vld [vmem:[%s1245_s7 + $0xb4] sm:$0xf0]  ;;  %v843_v10 = vld [vmem:[%s1245_s7 + $0xb8] sm:$0xf0] }
  0x18   :  { %506 = vmatpush.bf16.msra.mxu2 %v723_v44  ;;  %v683_v5 = vor.u32 %v827_v4, %v682_v3  ;;  %v750_v8 = vld [vmem:[%s1245_s7 + $0xa8] sm:$0xf]  ;;  %v747_v9 = vor.u32 %v840_v6, %v744_v7  ;;  %v841_v11 = vld [vmem:[%s1245_s7 + $0xac] sm:$0xf]  ;;  %v752_v12 = vld [vmem:[%s1245_s7 + $0xbc] sm:$0xf0] }
  0x19   :  { %v751_v13 = vor.u32 %v843_v10, %v750_v8  ;;  %v755_v14 = vor.u32 %v841_v11, %v752_v12  ;;  %v274_v15 = vld [vmem:[%s1245_s7 + $0x128] sm:$0xf]  ;;  %v198_v16 = vld [vmem:[%s1244_s6] sm:$0x1]  ;;  %v822_v18 = vld [vmem:[%s1245_s7 + $0x10] sm:$0xf0] }
  0x1a   :  { %177 = vmatpush.bf16.msra.mxu0 %v806_v41  ;;  %191 = vmatpush.bf16.msra.mxu1 %v813_v42  ;;  %v662_v17 = vld [vmem:[%s1245_s7] sm:$0xf]  ;;  %v406_v19 = vunpack.c.l.b16 %v274_v15  ;;  %v835_v21 = vld [vmem:[%s1245_s7 + $0x7c] sm:$0xf]  ;;  %v724_v22 = vld [vmem:[%s1245_s7 + $0x8c] sm:$0xf0] }
  0x1b   :  { %518 = vmatpush.bf16.msra.mxu3 %v747_v9  ;;  %v663_v20 = vor.u32 %v822_v18, %v662_v17  ;;  %v730_v23 = vld [vmem:[%s1245_s7 + $0x80] sm:$0xf]  ;;  %v727_v24 = vor.u32 %v835_v21, %v724_v22  ;;  %v838_v25 = vld [vmem:[%s1245_s7 + $0x90] sm:$0xf0]  ;;  %v836_v26 = vld [vmem:[%s1245_s7 + $0x84] sm:$0xf] }
  0x1c   :  { %507 = vmatpush.bf16.msra.mxu2 %v703_v58  ;;  %v446_v27 = vpack.c.b16 %v406_v19, %v406_v19  ;;  %v1114_v28 = vadd.f32 1e-05, %v198_v16  ;;  %v731_v29 = vor.u32 %v838_v25, %v730_v23  ;;  %v732_v30 = vld [vmem:[%s1245_s7 + $0x94] sm:$0xf0]  ;;  %v830_v33 = vld [vmem:[%s1245_s7 + $0x54] sm:$0xf] }
  0x1d   :  { %659 = vmatmul.msk.bf16.vlgmr.msra.gmra.mxu1 %vm167_vm1, %v42_v49  ;;  %v735_v31 = vor.u32 %v836_v26, %v732_v30  ;;  %v704_v34 = vld [vmem:[%s1245_s7 + $0x64] sm:$0xf0]  ;;  %v710_v35 = vld [vmem:[%s1245_s7 + $0x58] sm:$0xf]  ;;  %v833_v37 = vld [vmem:[%s1245_s7 + $0x68] sm:$0xf0] }
  0x1e   :  { %528 = vmatpush.bf16.msrb.mxu1 %v494_v45  ;;  %178 = vmatpush.bf16.msra.mxu0 %v805_v52  ;;  %v500_v32 = vsel %vm486_vm0, %v446_v27, 0  ;;  %v707_v36 = vor.u32 %v830_v33, %v704_v34  ;;  %v831_v38 = vld [vmem:[%s1245_s7 + $0x5c] sm:$0xf]  ;;  %v712_v39 = vld [vmem:[%s1245_s7 + $0x6c] sm:$0xf0]  ;;  %860 = vrsqrt.f32 %v1114_v28  ;;  %v711_v40 = vor.u32 %v833_v37, %v710_v35 }
  0x1f   :  { %519 = vmatpush.bf16.msra.mxu3 %v727_v24  ;;  %v715_v41 = vor.u32 %v831_v38, %v712_v39  ;;  %v798_v42 = vld [vmem:[%s1245_s7 + $0x100] sm:$0xf]  ;;  %v854_v43 = vld [vmem:[%s1245_s7 + $0x110] sm:$0xf0]  ;;  %v825_v45 = vld [vmem:[%s1245_s7 + $0x2c] sm:$0xf]  ;;  %vm206_vm2 = vweird.f32 %v1114_v28 }
  0x20   :  { %508 = vmatpush.bf16.msra.mxu2 %v683_v5  ;;  %v799_v44 = vor.u32 %v854_v43, %v798_v42  ;;  %v684_v46 = vld [vmem:[%s1245_s7 + $0x3c] sm:$0xf0]  ;;  %v690_v48 = vld [vmem:[%s1245_s7 + $0x30] sm:$0xf]  ;;  %v828_v49 = vld [vmem:[%s1245_s7 + $0x40] sm:$0xf0] }
  0x21   :  { %179 = vmatmul.bf16.vlgmr.msra.gmra.mxu0 %v41_v61  ;;  %v687_v47 = vor.u32 %v825_v45, %v684_v46  ;;  %v826_v50 = vld [vmem:[%s1245_s7 + $0x34] sm:$0xf]  ;;  %v691_v51 = vor.u32 %v828_v49, %v690_v48  ;;  %v692_v52 = vld [vmem:[%s1245_s7 + $0x44] sm:$0xf0]  ;;  %v778_v53 = vld [vmem:[%s1245_s7 + $0xd8] sm:$0xf] }
  0x22   :  { %541 = vmatpush.bf16.msrb.mxu0 %v497_v57  ;;  %529 = vmatpush.bf16.msrb.mxu1 %v791_v54  ;;  %v695_v54 = vor.u32 %v826_v50, %v692_v52  ;;  %v849_v55 = vld [vmem:[%s1245_s7 + $0xe8] sm:$0xf0]  ;;  %v820_v58 = vld [vmem:[%s1245_s7 + $0x4] sm:$0xf]  ;;  %v664_v59 = vld [vmem:[%s1245_s7 + $0x14] sm:$0xf0] }
  0x23   :  { %520 = vmatpush.bf16.msra.mxu3 %v707_v36  ;;  %v779_v57 = vor.u32 %v849_v55, %v778_v53  ;;  %v667_v60 = vor.u32 %v820_v58, %v664_v59  ;;  %v670_v61 = vld [vmem:[%s1245_s7 + $0x8] sm:$0xf]  ;;  %v672_v1 = vld [vmem:[%s1245_s7 + $0x1c] sm:$0xf0]  ;;  %v844_v3 = vld [vmem:[%s1245_s7 + $0xc0] sm:$0xf0] }
  0x24   :  { %509 = vmatpush.bf16.msra.mxu2 %v663_v20  ;;  %v861_v56 = vpop.eup %860  ;;  %v738_v7 = vld [vmem:[%s1245_s7 + $0x88] sm:$0xf]  ;;  %v839_v8 = vld [vmem:[%s1245_s7 + $0x98] sm:$0xf0]  ;;  %v718_v11 = vld [vmem:[%s1245_s7 + $0x60] sm:$0xf] }
  0x25   :  { %v201_v4 = vmul.f32 %v861_v56, %v1114_v28  ;;  %v739_v9 = vor.u32 %v839_v8, %v738_v7  ;;  %v834_v12 = vld [vmem:[%s1245_s7 + $0x70] sm:$0xf0]  ;;  %v698_v15 = vld [vmem:[%s1245_s7 + $0x38] sm:$0xf]  ;;  %v829_v16 = vld [vmem:[%s1245_s7 + $0x48] sm:$0xf0]  ;;  %vm207_vm3 = vweird.f32 %v861_v56 }
  0x26   :  { %542 = vmatpush.bf16.msrb.mxu0 %v795_v62  ;;  %530 = vmatpush.bf16.msrb.mxu1 %v771_v63  ;;  %v823_v62 = vld [vmem:[%s1245_s7 + $0x18] sm:$0xf0]  ;;  %v821_v63 = vld [vmem:[%s1245_s7 + $0xc] sm:$0xf]  ;;  %v699_v17 = vor.u32 %v829_v16, %v698_v15  ;;  %v678_v19 = vld [vmem:[%s1245_s7 + $0x10] sm:$0xf] }
  0x27   :  { %521 = vmatpush.bf16.msra.mxu3 %v687_v47  ;;  %v671_v0 = vor.u32 %v823_v62, %v670_v61  ;;  %v675_v5 = vor.u32 %v821_v63, %v672_v1  ;;  %v202_v10 = vmul.f32 %v861_v56, %v201_v4  ;;  %v824_v20 = vld [vmem:[%s1245_s7 + $0x20] sm:$0xf0]  ;;  %v856_v22 = vld [vmem:[%s1240_s2] ss:$0 sm:$0xff]  ;;  %vm208_vm4 = vmor %vm206_vm2, %vm207_vm3  ;;  %vm581_vm8 = vcmask 713728  }
  0x28   :  { %554 = vmatpush.bf16.msrb.mxu2 %v500_v32  ;;  %v679_v23 = vor.u32 %v824_v20, %v678_v19  ;;  %v857_v30 = vld [vmem:[%s1243_s5] ss:$0 sm:$0xff] }
  0x29   :  { %v858_v34 = vld [vmem:[%s1241_s3] ss:$0 sm:$0xff]  ;;  %s888_s3 = smov [#allocation2]  }
  0x2a   :  { %543 = vmatpush.bf16.msrb.mxu0 %v775_v2  ;;  %531 = vmatpush.bf16.msrb.mxu1 %v751_v13  ;;  %v758_v2 = vld [vmem:[%s1245_s7 + $0xb0] sm:$0xf]  ;;  %v719_v13 = vor.u32 %v834_v12, %v718_v11  ;;  %v859_v37 = vld [vmem:[%s1242_s4] ss:$0 sm:$0xff]  ;;  %s588_s4 = sshll.u32 %s888_s3, 4  ;;  %s589_s4 = int_to_ptr.vmem [resolvable:$true] %s588_s4 }
  0x2b   :  { %522 = vmatpush.bf16.msra.mxu3 %v667_v60  ;;  %v759_v6 = vor.u32 %v844_v3, %v758_v2 }
  0x2c   :  { %555 = vmatpush.bf16.msrb.mxu2 %v799_v44 }
  0x2e   :  { %544 = vmatpush.bf16.msrb.mxu0 %v755_v14  ;;  %532 = vmatpush.bf16.msrb.mxu1 %v731_v29  ;;  %v203_v14 = vmul.f32 0.5, %v202_v10 }
  0x30   :  { %556 = vmatpush.bf16.msrb.mxu2 %v779_v57  ;;  %v204_v18 = vsub.f32 1.5, %v203_v14 }
  0x32   :  { %545 = vmatpush.bf16.msrb.mxu0 %v735_v31  ;;  %533 = vmatpush.bf16.msrb.mxu1 %v711_v40  ;;  %v205_v24 = vmul.f32 %v861_v56, %v204_v18 }
  0x34   :  { %557 = vmatpush.bf16.msrb.mxu2 %v759_v6  ;;  %v209_v27 = vsel %vm208_vm4, %v861_v56, %v205_v24 }
  0x35   :  { %v216_v32 = vperm.slane %v209_v27, 0 }
  0x36   :  { %546 = vmatpush.bf16.msrb.mxu0 %v715_v41  ;;  %534 = vmatpush.bf16.msrb.mxu1 %v691_v51  ;;  %v275_v41 = vld [vmem:[%s1246_s8] sm:$0x1f] }
  0x37   :  { %v279_v42 = vperm.slane %v275_v41, 2  ;;  %v280_v43 = vperm.slane %v275_v41, 3  ;;  %v278_v48 = vperm.slane %v275_v41, 1  ;;  %v277_v49 = vperm.slane %v275_v41, 0 }
  0x38   :  { %558 = vmatpush.bf16.msrb.mxu2 %v739_v9 }
  0x3a   :  { %547 = vmatpush.bf16.msrb.mxu0 %v695_v54  ;;  %535 = vmatpush.bf16.msrb.mxu1 %v671_v0  ;;  %v281_v0 = vperm.slane %v275_v41, 4 }
  0x3c   :  { %559 = vmatpush.bf16.msrb.mxu2 %v719_v13 }
  0x3e   :  { %548 = vmatpush.bf16.msrb.mxu0 %v675_v5 }
  0x40   :  { %560 = vmatpush.bf16.msrb.mxu2 %v699_v17 }
  0x44   :  { %561 = vmatpush.bf16.msrb.mxu2 %v679_v23 }
  0x9a   :  { %v193_v21 = vpop.f32.mrf.mxu1 }
  0x9e   :  { %v180_v25 = vpop.f32.mrf.mxu0 }
  0x9f   :  { %v181_v26 = vadd.f32 %v856_v22, %v180_v25 }
  0xa1   :  { %v194_v29 = vadd.f32 %v193_v21, %v181_v26 }
  0xa2   :  { %v195_v31 = vpop.f32.mrf.mxu1 }
  0xa3   :  { %v197_v28 = vmax.f32 %v194_v29, 0.0 }
  0xa5   :  { %v214_v33 = vsub.f32 %v197_v28, %v857_v30 }
  0xa6   :  { %v182_v35 = vpop.f32.mrf.mxu0 }
  0xa7   :  { %v218_v36 = vmul.f32 %v216_v32, %v214_v33 }
  0xa9   :  { %v223_v38 = vmul.f32 %v858_v34, %v218_v36 }
  0xab   :  { %v228_v39 = vadd.f32 %v859_v37, %v223_v38 }
  0xad   :  { %v229_v40 = vpack.c.bf16 %v228_v39, %v228_v39 }
  0xaf   :  { %800 = vmatmul.msk.bf16.vlgmr.msra.gmra.mxu2 %vm482_vm5, %v229_v40  ;;  %801 = vmatmul.msk.bf16.vlgmr.msra.gmra.mxu3 %vm482_vm5, %v229_v40 }
  0xb0   :  { %802 = vmatmul.msk.bf16.vlgmr.msrb.gmra.mxu1 %vm482_vm5, %v229_v40  ;;  %803 = vmatmul.msk.bf16.vlgmr.msrb.gmra.mxu0 %vm482_vm5, %v229_v40 }
  0xbf   :  { %804 = vmatmul.msk.bf16.vlgmr.msrb.gmra.mxu2 %vm482_vm5, %v229_v40 }
 0x12d   :  { %v537_v44 = vpop.f32.mrf.mxu1  ;;  %v550_v45 = vpop.f32.mrf.mxu0 }
 0x12e   :  { %v538_v46 = vadd.f32 %v537_v44, %v279_v42  ;;  %v551_v47 = vadd.f32 %v550_v45, %v280_v43 }
 0x130   :  { %v572_v52 = vrot.slane %v538_v46, 4  ;;  %v573_v53 = vrot.slane %v551_v47, 2 }
 0x132   :  { %v511_v50 = vpop.f32.mrf.mxu2  ;;  %v524_v51 = vpop.f32.mrf.mxu3  ;;  %v577_v59 = vsel %vm576_vm6, %v572_v52, %v573_v53 }
 0x133   :  { %v525_v54 = vadd.f32 %v524_v51, %v278_v48  ;;  %v512_v55 = vadd.f32 %v511_v50, %v277_v49 }
 0x135   :  { %v571_v56 = vrot.slane %v525_v54, 6  ;;  %v539_v57 = vpop.f32.mrf.mxu1  ;;  %v552_v58 = vpop.f32.mrf.mxu0 }
 0x137   :  { %v575_v60 = vsel %vm574_vm7, %v512_v55, %v571_v56 }
 0x138   :  { %v578_v61 = vsel %vm486_vm0, %v575_v60, %v577_v59 }
 0x139   :  { %580 = vst [vmem:[#allocation2] sm:$0xff] %v578_v61 }
 0x13a   :  { %v513_v62 = vpop.f32.mrf.mxu2  ;;  %v526_v63 = vpop.f32.mrf.mxu3 }
 0x142   :  { %v563_v1 = vpop.f32.mrf.mxu2 }
 0x143   :  { %v564_v2 = vadd.f32 %v563_v1, %v281_v0 }
 0x145   :  { %582 = vst.msk [vmem:[#allocation2 + $0x8] sm:$0x3] %vm581_vm8, %v564_v2 }
 0x146   :  { %593 = dma.vmem_to_hbm [thread:$0]  %s589_s4, 160, %s591_s12, [#allocation3]  }
 0x14a   :  { %v565_v3 = vpop.f32.mrf.mxu2 }
 0x14b   :  { %886 = dma.done.wait [#allocation3], 160  }
 0x14c   :  { %887 = vsyncadd [#allocation3], 4294967136 }
 0x14d   :  { %598 = vsyncpa [#allocation3], 1 }

// kernel: classifier3_forward.2
= control target key start
LH: loop header
LB: loop body
LE: loop exit
PB: predicated region body
PF: predicated region fallthrough
CT: control target
= control target key end

     0   :  { %s4928_s18 = smov 0   ;;  %s6744_s0 = inlined_call_operand.vmem [shape: f32[2,8,40], index: 0, kind: input, shape index: {}]   ;;  %s6745_s1 = inlined_call_operand.vmem [shape: bf16[40,240], index: 1, kind: input, shape index: {}]   ;;  %s6746_s2 = inlined_call_operand.vmem [shape: f32[1,240], index: 2, kind: input, shape index: {}]   ;;  %s6747_s3 = inlined_call_operand.vmem [shape: bf16[240,720], index: 3, kind: input, shape index: {}]   ;;  %s6748_s4 = inlined_call_operand.vmem [shape: f32[1,720], index: 4, kind: input, shape index: {}]   ;;  %s6749_s5 = inlined_call_operand.vmem [shape: bf16[8,30,240], index: 5, kind: input, shape index: {}]   ;;  %s6750_s6 = inlined_call_operand.vmem [shape: f32[1,240], index: 6, kind: input, shape index: {}]   ;;  %s6751_s7 = inlined_call_operand.vmem [shape: f32[1,240], index: 7, kind: input, shape index: {}]   ;;  %s6752_s8 = inlined_call_operand.vmem [shape: f32[1,240], index: 8, kind: input, shape index: {}]   ;;  %s6753_s9 = inlined_call_operand.vmem [shape: bf16[240,512], index: 9, kind: input, shape index: {}]   ;;  %s6754_s10 = inlined_call_operand.vmem [shape: f32[1,512], index: 10, kind: input, shape index: {}]   ;;  %s6755_s11 = inlined_call_operand.vmem [shape: bf16[512,240], index: 11, kind: input, shape index: {}]   ;;  %s6756_s12 = inlined_call_operand.vmem [shape: f32[1,240], index: 12, kind: input, shape index: {}]   ;;  %s6757_s13 = inlined_call_operand.vmem [shape: f32[1,240], index: 13, kind: input, shape index: {}]   ;;  %s6758_s14 = inlined_call_operand.vmem [shape: f32[1,240], index: 14, kind: input, shape index: {}]   ;;  %s6759_s15 = inlined_call_operand.vmem [shape: f32[2,1,240], index: 15, kind: output, shape index: {}]  }
   0x1 LB: > { %s3415_s19 = sadd.s32 4294967295, %s4822_s18   ;;  %p3419_p0 = scmp.ge.s32.totalorder %s4822_s18, 1  ;;  %s4822_s18 = sphi %s4928_s18, %s25_s18  }
   0x2   : > { %p436_p1 = scmp.lt.s32.totalorder %s4822_s18, 3 }
   0x4   : > { %p437_p2 = pnand %p3419_p0, %p436_p1 }
   0x5   : > { %p482_p3 = scmp.lt.s32.totalorder (!%p437_p2), %s3415_s19, 1  ;;  %s4824_s30 = smov (!%p437_p2), 2  }
   0x6   : > { %440 = sbr.rel (%p437_p2) target bundleno = 2617 (0xa39), region = 80  ;;  %s4825_s16 = smov (!%p437_p2), 114  }
   0x7   : > { %s4826_s17 = smov (!%p437_p2), 98   ;;  %s4827_s21 = smov (!%p437_p2), 16  }
   0x8   : > { %s4829_s22 = smov (!%p437_p2), 84   ;;  %s4830_s23 = smov (!%p437_p2), 38  }
   0x9   : > { %s4831_s24 = smov (!%p437_p2), 54   ;;  %s4833_s25 = smov (!%p437_p2), 122  }
   0xa   : > { %s4834_s26 = smov (!%p437_p2), 8   ;;  %s4835_s28 = smov (!%p437_p2), 76  }
   0xb   : > { %v497_v0 = vld [vmem:[%s6745_s1 + $0x20] sm:$0xff]  ;;  %vm533_vm0 = vcmask 1043456   ;;  %v3432_v3 = vld [vmem:[%s6745_s1 + $0x10] sm:$0xf]  ;;  %v4499_v4 = vld [vmem:[%s6745_s1 + $0x14] sm:$0xf0] }
   0xc   : > { %v517_v1 = vunpack.c.l.b16 %v497_v0  ;;  %v518_v2 = vunpack.c.h.b16 %v497_v0  ;;  %v4498_v7 = vld [vmem:[%s6745_s1 + $0x14] sm:$0xf]  ;;  %v3434_v8 = vld [vmem:[%s6745_s1 + $0x18] sm:$0xf0]  ;;  %v3424_v11 = vld [vmem:[%s6745_s1] sm:$0xf]  ;;  %v3433_v16 = vor.u32 %v4499_v4, %v3432_v3 }
   0xd   : > { %v4497_v12 = vld [vmem:[%s6745_s1 + $0x4] sm:$0xf0]  ;;  %v4496_v13 = vld [vmem:[%s6745_s1 + $0x4] sm:$0xf]  ;;  %v3426_v14 = vld [vmem:[%s6745_s1 + $0x8] sm:$0xf0]  ;;  %v3437_v17 = vor.u32 %v4498_v7, %v3434_v8 }
   0xe   : > { %v523_v5 = vpack.c.b16 %v517_v1, %v517_v1  ;;  %v524_v6 = vpack.c.b16 %v518_v2, %v518_v2  ;;  %s6761_s19 = smov (!%p482_p3, %s3415_s19), 1  ;;  %v3610_v15 = vld [vmem:[%s6747_s3 + $0x150] sm:$0xf]  ;;  %v4545_v18 = vld [vmem:[%s6747_s3 + $0x164] sm:$0xf0]  ;;  %v3425_v30 = vor.u32 %v4497_v12, %v3424_v11  ;;  %v3429_v31 = vor.u32 %v4496_v13, %v3426_v14  ;;  %s4836_s29 = smov 106  }
   0xf   : > { %v4542_v19 = vld [vmem:[%s6747_s3 + $0x154] sm:$0xf]  ;;  %v3612_v20 = vld [vmem:[%s6747_s3 + $0x168] sm:$0xf0]  ;;  %s3420_s20 = sshll.u32 %s6761_s19, 3  ;;  %v3611_v23 = vor.u32 %v4545_v18, %v3610_v15  ;;  %vm529_vm1 = vcmask 326656  }
  0x10   : > { %v535_v9 = vsel %vm533_vm0, %v523_v5, 0  ;;  %v538_v10 = vsel %vm533_vm0, %v524_v6, 0  ;;  %v3778_v21 = vld [vmem:[%s6747_s3 + $0x2a0] sm:$0xf]  ;;  %v4587_v22 = vld [vmem:[%s6747_s3 + $0x2b4] sm:$0xf0]  ;;  %v3615_v24 = vor.u32 %v4542_v19, %v3612_v20  ;;  %s485_s27 = scalar_lea.vmem %s6744_s0, %s3420_s20 }
  0x11   : > { %545 = vmatpush.bf16.msra.mxu3 %v535_v9  ;;  %558 = vmatpush.bf16.msra.mxu1 %v538_v10  ;;  %v4584_v25 = vld [vmem:[%s6747_s3 + $0x2a4] sm:$0xf]  ;;  %v3780_v26 = vld [vmem:[%s6747_s3 + $0x2b8] sm:$0xf0]  ;;  %v3586_v27 = vld [vmem:[%s6747_s3 + $0x120] sm:$0xf]  ;;  %v3779_v37 = vor.u32 %v4587_v22, %v3778_v21 }
  0x12   : > { %1126 = vmatpush.bf16.msra.mxu2 %v3611_v23  ;;  %1152 = vmatpush.bf16.msra.mxu0 %v3615_v24  ;;  %v4539_v28 = vld [vmem:[%s6747_s3 + $0x134] sm:$0xf0]  ;;  %v4536_v29 = vld [vmem:[%s6747_s3 + $0x124] sm:$0xf]  ;;  %v3754_v33 = vld [vmem:[%s6747_s3 + $0x270] sm:$0xf]  ;;  %v3783_v38 = vor.u32 %v4584_v25, %v3780_v26 }
  0x13   : > { %v491_v32 = vld [vmem:[%s485_s27] sm:$0xff]  ;;  %v4581_v34 = vld [vmem:[%s6747_s3 + $0x284] sm:$0xf0]  ;;  %v3587_v35 = vor.u32 %v4539_v28, %v3586_v27  ;;  %v3588_v36 = vld [vmem:[%s6747_s3 + $0x138] sm:$0xf0]  ;;  %vm1122_vm2 = vcmask 916480  }
  0x14   : > { %v4578_v39 = vld [vmem:[%s6747_s3 + $0x274] sm:$0xf]  ;;  %v3756_v40 = vld [vmem:[%s6747_s3 + $0x288] sm:$0xf0]  ;;  %v3591_v41 = vor.u32 %v4536_v29, %v3588_v36  ;;  %v3562_v42 = vld [vmem:[%s6747_s3 + $0xf0] sm:$0xf]  ;;  %v492_v46 = vpack.c.bf16 %v491_v32, %v491_v32  ;;  %v3755_v51 = vor.u32 %v4581_v34, %v3754_v33 }
  0x15   : > { %546 = vmatpush.bf16.msra.mxu3 %v3433_v16  ;;  %559 = vmatpush.bf16.msra.mxu1 %v3437_v17  ;;  %v4533_v43 = vld [vmem:[%s6747_s3 + $0x104] sm:$0xf0]  ;;  %v4530_v44 = vld [vmem:[%s6747_s3 + $0xf4] sm:$0xf]  ;;  %v3564_v45 = vld [vmem:[%s6747_s3 + $0x108] sm:$0xf0]  ;;  %v3759_v52 = vor.u32 %v4578_v39, %v3756_v40 }
  0x16   : > { %1127 = vmatpush.bf16.msra.mxu2 %v3587_v35  ;;  %1153 = vmatpush.bf16.msra.mxu0 %v3591_v41  ;;  %v3730_v47 = vld [vmem:[%s6747_s3 + $0x240] sm:$0xf]  ;;  %v3563_v48 = vor.u32 %v4533_v43, %v3562_v42  ;;  %v3567_v49 = vor.u32 %v4530_v44, %v3564_v45  ;;  %v4527_v53 = vld [vmem:[%s6747_s3 + $0xd4] sm:$0xf0]  ;;  %v4524_v54 = vld [vmem:[%s6747_s3 + $0xc4] sm:$0xf] }
  0x17   : > { %v3538_v50 = vld [vmem:[%s6747_s3 + $0xc0] sm:$0xf]  ;;  %v3540_v55 = vld [vmem:[%s6747_s3 + $0xd8] sm:$0xf0]  ;;  %v4575_v56 = vld [vmem:[%s6747_s3 + $0x254] sm:$0xf0] }
  0x18   : > { %v4572_v57 = vld [vmem:[%s6747_s3 + $0x244] sm:$0xf]  ;;  %v3732_v58 = vld [vmem:[%s6747_s3 + $0x258] sm:$0xf0]  ;;  %v3706_v59 = vld [vmem:[%s6747_s3 + $0x210] sm:$0xf]  ;;  %v3539_v60 = vor.u32 %v4527_v53, %v3538_v50  ;;  %v3543_v61 = vor.u32 %v4524_v54, %v3540_v55  ;;  %v3731_v63 = vor.u32 %v4575_v56, %v3730_v47 }
  0x19   : > { %547 = vmatpush.bf16.msra.mxu3 %v3425_v30  ;;  %560 = vmatpush.bf16.msra.mxu1 %v3429_v31  ;;  %v3514_v62 = vld [vmem:[%s6747_s3 + $0x90] sm:$0xf]  ;;  %v3735_v0 = vor.u32 %v4572_v57, %v3732_v58  ;;  %v4521_v1 = vld [vmem:[%s6747_s3 + $0xa4] sm:$0xf0]  ;;  %v4518_v2 = vld [vmem:[%s6747_s3 + $0x94] sm:$0xf] }
  0x1a   : > { %1128 = vmatpush.bf16.msra.mxu2 %v3563_v48  ;;  %1154 = vmatpush.bf16.msra.mxu0 %v3567_v49  ;;  %v3516_v3 = vld [vmem:[%s6747_s3 + $0xa8] sm:$0xf0]  ;;  %v4569_v4 = vld [vmem:[%s6747_s3 + $0x224] sm:$0xf0]  ;;  %v4566_v5 = vld [vmem:[%s6747_s3 + $0x214] sm:$0xf]  ;;  %v3515_v8 = vor.u32 %v4521_v1, %v3514_v62 }
  0x1b   : > { %v3708_v6 = vld [vmem:[%s6747_s3 + $0x228] sm:$0xf0]  ;;  %v3682_v7 = vld [vmem:[%s6747_s3 + $0x1e0] sm:$0xf]  ;;  %v3519_v9 = vor.u32 %v4518_v2, %v3516_v3  ;;  %v3707_v11 = vor.u32 %v4569_v4, %v3706_v59  ;;  %v4515_v13 = vld [vmem:[%s6747_s3 + $0x74] sm:$0xf0] }
  0x1c   : > { %3438 = vmatmul.msk.bf16.vlgmr.msra.gmra.mxu3 %vm529_vm1, %v492_v46  ;;  %3439 = vmatmul.msk.bf16.vlgmr.msra.gmra.mxu1 %vm529_vm1, %v492_v46  ;;  %v3490_v10 = vld [vmem:[%s6747_s3 + $0x60] sm:$0xf]  ;;  %v3711_v12 = vor.u32 %v4566_v5, %v3708_v6  ;;  %v4512_v14 = vld [vmem:[%s6747_s3 + $0x64] sm:$0xf]  ;;  %v3492_v15 = vld [vmem:[%s6747_s3 + $0x78] sm:$0xf0] }
  0x1d   : > { %1140 = vmatpush.bf16.msrb.mxu3 %v3779_v37  ;;  %1166 = vmatpush.bf16.msrb.mxu1 %v3783_v38  ;;  %v4563_v16 = vld [vmem:[%s6747_s3 + $0x1f4] sm:$0xf0]  ;;  %v4560_v17 = vld [vmem:[%s6747_s3 + $0x1e4] sm:$0xf]  ;;  %v3684_v18 = vld [vmem:[%s6747_s3 + $0x1f8] sm:$0xf0]  ;;  %v3491_v20 = vor.u32 %v4515_v13, %v3490_v10  ;;  %v3495_v21 = vor.u32 %v4512_v14, %v3492_v15 }
  0x1e   : > { %1129 = vmatpush.bf16.msra.mxu2 %v3539_v60  ;;  %1155 = vmatpush.bf16.msra.mxu0 %v3543_v61  ;;  %v3658_v19 = vld [vmem:[%s6747_s3 + $0x1b0] sm:$0xf]  ;;  %v3683_v23 = vor.u32 %v4563_v16, %v3682_v7  ;;  %v3687_v24 = vor.u32 %v4560_v17, %v3684_v18  ;;  %v4509_v25 = vld [vmem:[%s6747_s3 + $0x44] sm:$0xf0]  ;;  %v4506_v26 = vld [vmem:[%s6747_s3 + $0x34] sm:$0xf] }
  0x1f   : > { %v3466_v22 = vld [vmem:[%s6747_s3 + $0x30] sm:$0xf]  ;;  %v3468_v27 = vld [vmem:[%s6747_s3 + $0x48] sm:$0xf0]  ;;  %v4557_v28 = vld [vmem:[%s6747_s3 + $0x1c4] sm:$0xf0] }
  0x20   : > { %v4554_v29 = vld [vmem:[%s6747_s3 + $0x1b4] sm:$0xf]  ;;  %v3660_v30 = vld [vmem:[%s6747_s3 + $0x1c8] sm:$0xf0]  ;;  %v3634_v31 = vld [vmem:[%s6747_s3 + $0x180] sm:$0xf]  ;;  %v3467_v34 = vor.u32 %v4509_v25, %v3466_v22  ;;  %v3471_v35 = vor.u32 %v4506_v26, %v3468_v27  ;;  %v3659_v37 = vor.u32 %v4557_v28, %v3658_v19 }
  0x21   : > { %1141 = vmatpush.bf16.msrb.mxu3 %v3755_v51  ;;  %1167 = vmatpush.bf16.msrb.mxu1 %v3759_v52  ;;  %v4551_v32 = vld [vmem:[%s6747_s3 + $0x194] sm:$0xf0]  ;;  %v4548_v33 = vld [vmem:[%s6747_s3 + $0x184] sm:$0xf]  ;;  %v3442_v36 = vld [vmem:[%s6747_s3] sm:$0xf]  ;;  %v3663_v38 = vor.u32 %v4554_v29, %v3660_v30 }
  0x22   : > { %1130 = vmatpush.bf16.msra.mxu2 %v3515_v8  ;;  %1156 = vmatpush.bf16.msra.mxu0 %v3519_v9  ;;  %v4503_v39 = vld [vmem:[%s6747_s3 + $0x14] sm:$0xf0]  ;;  %v4500_v40 = vld [vmem:[%s6747_s3 + $0x4] sm:$0xf]  ;;  %v3444_v41 = vld [vmem:[%s6747_s3 + $0x18] sm:$0xf0]  ;;  %v3635_v53 = vor.u32 %v4551_v32, %v3634_v31 }
  0x23   : > { %v3636_v42 = vld [vmem:[%s6747_s3 + $0x198] sm:$0xf0]  ;;  %v3618_v43 = vld [vmem:[%s6747_s3 + $0x158] sm:$0xf]  ;;  %v4546_v44 = vld [vmem:[%s6747_s3 + $0x16c] sm:$0xf0]  ;;  %v3443_v48 = vor.u32 %v4503_v39, %v3442_v36  ;;  %v3447_v49 = vor.u32 %v4500_v40, %v3444_v41 }
  0x24   : > { %v4543_v45 = vld [vmem:[%s6747_s3 + $0x15c] sm:$0xf]  ;;  %v3620_v46 = vld [vmem:[%s6747_s3 + $0x170] sm:$0xf0]  ;;  %v3786_v47 = vld [vmem:[%s6747_s3 + $0x2a8] sm:$0xf]  ;;  %v3639_v54 = vor.u32 %v4548_v33, %v3636_v42  ;;  %v3619_v55 = vor.u32 %v4546_v44, %v3618_v43 }
  0x25   : > { %1142 = vmatpush.bf16.msrb.mxu3 %v3731_v63  ;;  %1168 = vmatpush.bf16.msrb.mxu1 %v3735_v0  ;;  %v4588_v50 = vld [vmem:[%s6747_s3 + $0x2bc] sm:$0xf0]  ;;  %v4585_v51 = vld [vmem:[%s6747_s3 + $0x2ac] sm:$0xf]  ;;  %v3788_v52 = vld [vmem:[%s6747_s3 + $0x2c0] sm:$0xf0]  ;;  %v3623_v56 = vor.u32 %v4543_v45, %v3620_v46 }
  0x26   : > { %1131 = vmatpush.bf16.msra.mxu2 %v3491_v20  ;;  %1157 = vmatpush.bf16.msra.mxu0 %v3495_v21  ;;  %v3594_v57 = vld [vmem:[%s6747_s3 + $0x128] sm:$0xf]  ;;  %v4540_v58 = vld [vmem:[%s6747_s3 + $0x13c] sm:$0xf0]  ;;  %v4537_v59 = vld [vmem:[%s6747_s3 + $0x12c] sm:$0xf]  ;;  %v3787_v61 = vor.u32 %v4588_v50, %v3786_v47  ;;  %v3791_v62 = vor.u32 %v4585_v51, %v3788_v52 }
  0x27   : > { %v3596_v60 = vld [vmem:[%s6747_s3 + $0x140] sm:$0xf0]  ;;  %v3762_v63 = vld [vmem:[%s6747_s3 + $0x278] sm:$0xf]  ;;  %v4582_v0 = vld [vmem:[%s6747_s3 + $0x28c] sm:$0xf0]  ;;  %v3595_v3 = vor.u32 %v4540_v58, %v3594_v57 }
  0x28   : > { %v4579_v1 = vld [vmem:[%s6747_s3 + $0x27c] sm:$0xf]  ;;  %v3764_v2 = vld [vmem:[%s6747_s3 + $0x290] sm:$0xf0]  ;;  %v3599_v4 = vor.u32 %v4537_v59, %v3596_v60  ;;  %v3570_v5 = vld [vmem:[%s6747_s3 + $0xf8] sm:$0xf]  ;;  %v3763_v9 = vor.u32 %v4582_v0, %v3762_v63 }
  0x29   : > { %1143 = vmatpush.bf16.msrb.mxu3 %v3707_v11  ;;  %1169 = vmatpush.bf16.msrb.mxu1 %v3711_v12  ;;  %v4534_v6 = vld [vmem:[%s6747_s3 + $0x10c] sm:$0xf0]  ;;  %v4531_v7 = vld [vmem:[%s6747_s3 + $0xfc] sm:$0xf]  ;;  %v3572_v8 = vld [vmem:[%s6747_s3 + $0x110] sm:$0xf0]  ;;  %v3767_v10 = vor.u32 %v4579_v1, %v3764_v2 }
  0x2a   : > { %1132 = vmatpush.bf16.msra.mxu2 %v3467_v34  ;;  %1158 = vmatpush.bf16.msra.mxu0 %v3471_v35  ;;  %v3738_v11 = vld [vmem:[%s6747_s3 + $0x248] sm:$0xf]  ;;  %v4576_v12 = vld [vmem:[%s6747_s3 + $0x25c] sm:$0xf0]  ;;  %v4573_v13 = vld [vmem:[%s6747_s3 + $0x24c] sm:$0xf]  ;;  %v3571_v15 = vor.u32 %v4534_v6, %v3570_v5  ;;  %v3575_v16 = vor.u32 %v4531_v7, %v3572_v8 }
  0x2b   : > { %v3740_v14 = vld [vmem:[%s6747_s3 + $0x260] sm:$0xf0]  ;;  %v3546_v17 = vld [vmem:[%s6747_s3 + $0xc8] sm:$0xf]  ;;  %v4528_v18 = vld [vmem:[%s6747_s3 + $0xdc] sm:$0xf0]  ;;  %v3739_v21 = vor.u32 %v4576_v12, %v3738_v11 }
  0x2c   : > { %v4525_v19 = vld [vmem:[%s6747_s3 + $0xcc] sm:$0xf]  ;;  %v3548_v20 = vld [vmem:[%s6747_s3 + $0xe0] sm:$0xf0]  ;;  %v3743_v22 = vor.u32 %v4573_v13, %v3740_v14  ;;  %v4567_v25 = vld [vmem:[%s6747_s3 + $0x21c] sm:$0xf]  ;;  %v3547_v27 = vor.u32 %v4528_v18, %v3546_v17 }
  0x2d   : > { %1144 = vmatpush.bf16.msrb.mxu3 %v3683_v23  ;;  %1170 = vmatpush.bf16.msrb.mxu1 %v3687_v24  ;;  %v3714_v23 = vld [vmem:[%s6747_s3 + $0x218] sm:$0xf]  ;;  %v4570_v24 = vld [vmem:[%s6747_s3 + $0x22c] sm:$0xf0]  ;;  %v3716_v26 = vld [vmem:[%s6747_s3 + $0x230] sm:$0xf0]  ;;  %v3551_v28 = vor.u32 %v4525_v19, %v3548_v20 }
  0x2e   : > { %1133 = vmatpush.bf16.msra.mxu2 %v3443_v48  ;;  %1159 = vmatpush.bf16.msra.mxu0 %v3447_v49  ;;  %v3522_v29 = vld [vmem:[%s6747_s3 + $0x98] sm:$0xf]  ;;  %v4522_v30 = vld [vmem:[%s6747_s3 + $0xac] sm:$0xf0]  ;;  %v4519_v31 = vld [vmem:[%s6747_s3 + $0x9c] sm:$0xf]  ;;  %v3715_v33 = vor.u32 %v4570_v24, %v3714_v23  ;;  %v3719_v34 = vor.u32 %v4567_v25, %v3716_v26 }
  0x2f   : > { %v3524_v32 = vld [vmem:[%s6747_s3 + $0xb0] sm:$0xf0]  ;;  %v3523_v35 = vor.u32 %v4522_v30, %v3522_v29  ;;  %v4513_v39 = vld [vmem:[%s6747_s3 + $0x6c] sm:$0xf]  ;;  %v3500_v41 = vld [vmem:[%s6747_s3 + $0x80] sm:$0xf0] }
  0x30   : > { %v3527_v36 = vor.u32 %v4519_v31, %v3524_v32  ;;  %v3503_v42 = vor.u32 %v4513_v39, %v3500_v41  ;;  %v3690_v43 = vld [vmem:[%s6747_s3 + $0x1e8] sm:$0xf]  ;;  %v4564_v44 = vld [vmem:[%s6747_s3 + $0x1fc] sm:$0xf0]  ;;  %v4561_v45 = vld [vmem:[%s6747_s3 + $0x1ec] sm:$0xf] }
  0x31   : > { %1145 = vmatpush.bf16.msrb.mxu3 %v3659_v37  ;;  %1171 = vmatpush.bf16.msrb.mxu1 %v3663_v38  ;;  %v3498_v37 = vld [vmem:[%s6747_s3 + $0x68] sm:$0xf]  ;;  %v4516_v38 = vld [vmem:[%s6747_s3 + $0x7c] sm:$0xf0]  ;;  %v3691_v46 = vor.u32 %v4564_v44, %v3690_v43  ;;  %v3692_v47 = vld [vmem:[%s6747_s3 + $0x200] sm:$0xf0] }
  0x32   : > { %1192 = vmatpush.bf16.msrb.mxu2 %v3787_v61  ;;  %1218 = vmatpush.bf16.msrb.mxu0 %v3791_v62  ;;  %v3499_v40 = vor.u32 %v4516_v38, %v3498_v37  ;;  %v3695_v48 = vor.u32 %v4561_v45, %v3692_v47  ;;  %v3474_v49 = vld [vmem:[%s6747_s3 + $0x38] sm:$0xf]  ;;  %v4510_v50 = vld [vmem:[%s6747_s3 + $0x4c] sm:$0xf0]  ;;  %v4507_v51 = vld [vmem:[%s6747_s3 + $0x3c] sm:$0xf] }
  0x33   : > { %v3475_v52 = vor.u32 %v4510_v50, %v3474_v49  ;;  %v4555_v57 = vld [vmem:[%s6747_s3 + $0x1bc] sm:$0xf]  ;;  %v3668_v59 = vld [vmem:[%s6747_s3 + $0x1d0] sm:$0xf0]  ;;  %v3450_v61 = vld [vmem:[%s6747_s3 + $0x8] sm:$0xf] }
  0x34   : > { %v3671_v60 = vor.u32 %v4555_v57, %v3668_v59  ;;  %v4504_v62 = vld [vmem:[%s6747_s3 + $0x1c] sm:$0xf0]  ;;  %v4501_v63 = vld [vmem:[%s6747_s3 + $0xc] sm:$0xf]  ;;  %v3452_v1 = vld [vmem:[%s6747_s3 + $0x20] sm:$0xf0] }
  0x35   : > { %1146 = vmatpush.bf16.msrb.mxu3 %v3635_v53  ;;  %1172 = vmatpush.bf16.msrb.mxu1 %v3639_v54  ;;  %v3476_v53 = vld [vmem:[%s6747_s3 + $0x50] sm:$0xf0]  ;;  %v3451_v0 = vor.u32 %v4504_v62, %v3450_v61  ;;  %v3455_v2 = vor.u32 %v4501_v63, %v3452_v1  ;;  %v4549_v5 = vld [vmem:[%s6747_s3 + $0x18c] sm:$0xf]  ;;  %v3644_v6 = vld [vmem:[%s6747_s3 + $0x1a0] sm:$0xf0] }
  0x36   : > { %1193 = vmatpush.bf16.msrb.mxu2 %v3763_v9  ;;  %1219 = vmatpush.bf16.msrb.mxu0 %v3767_v10  ;;  %v3479_v54 = vor.u32 %v4507_v51, %v3476_v53  ;;  %v3647_v8 = vor.u32 %v4549_v5, %v3644_v6  ;;  %v498_v9 = vld [vmem:[%s6746_s2] sm:$0x3]  ;;  %v3794_v11 = vld [vmem:[%s6747_s3 + $0x2b0] sm:$0xf]  ;;  %v4589_v12 = vld [vmem:[%s6747_s3 + $0x2c4] sm:$0xf0] }
  0x37   : > { %v501_v10 = vperm.slane %v498_v9, 1  ;;  %v4586_v13 = vld [vmem:[%s6747_s3 + $0x2b4] sm:$0xf]  ;;  %v3796_v14 = vld [vmem:[%s6747_s3 + $0x2c8] sm:$0xf0]  ;;  %v500_v17 = vperm.slane %v498_v9, 0  ;;  %v3795_v18 = vor.u32 %v4589_v12, %v3794_v11 }
  0x38   : > { %v3799_v19 = vor.u32 %v4586_v13, %v3796_v14  ;;  %v3770_v20 = vld [vmem:[%s6747_s3 + $0x280] sm:$0xf]  ;;  %v4580_v23 = vld [vmem:[%s6747_s3 + $0x284] sm:$0xf]  ;;  %v3772_v24 = vld [vmem:[%s6747_s3 + $0x298] sm:$0xf0] }
  0x39   : > { %1178 = vmatpush.bf16.msra.mxu3 %v3619_v55  ;;  %1204 = vmatpush.bf16.msra.mxu1 %v3623_v56  ;;  %v3666_v55 = vld [vmem:[%s6747_s3 + $0x1b8] sm:$0xf]  ;;  %v4558_v56 = vld [vmem:[%s6747_s3 + $0x1cc] sm:$0xf0]  ;;  %v3626_v25 = vld [vmem:[%s6747_s3 + $0x160] sm:$0xf]  ;;  %v3775_v31 = vor.u32 %v4580_v23, %v3772_v24 }
  0x3a   : > { %1194 = vmatpush.bf16.msrb.mxu2 %v3739_v21  ;;  %1220 = vmatpush.bf16.msrb.mxu0 %v3743_v22  ;;  %v3667_v58 = vor.u32 %v4558_v56, %v3666_v55  ;;  %v4583_v22 = vld [vmem:[%s6747_s3 + $0x294] sm:$0xf0]  ;;  %v3746_v32 = vld [vmem:[%s6747_s3 + $0x250] sm:$0xf]  ;;  %v4538_v43 = vld [vmem:[%s6747_s3 + $0x134] sm:$0xf] }
  0x3b   : > { %v4547_v26 = vld [vmem:[%s6747_s3 + $0x174] sm:$0xf0]  ;;  %v3771_v30 = vor.u32 %v4583_v22, %v3770_v20  ;;  %v3604_v44 = vld [vmem:[%s6747_s3 + $0x148] sm:$0xf0]  ;;  %v3722_v47 = vld [vmem:[%s6747_s3 + $0x220] sm:$0xf] }
  0x3c   : > { %v3627_v38 = vor.u32 %v4547_v26, %v3626_v25  ;;  %v4568_v49 = vld [vmem:[%s6747_s3 + $0x224] sm:$0xf]  ;;  %v3724_v50 = vld [vmem:[%s6747_s3 + $0x238] sm:$0xf0]  ;;  %v3578_v53 = vld [vmem:[%s6747_s3 + $0x100] sm:$0xf] }
  0x3d   : > { %1179 = vmatpush.bf16.msra.mxu3 %v3595_v3  ;;  %1205 = vmatpush.bf16.msra.mxu1 %v3599_v4  ;;  %v3642_v3 = vld [vmem:[%s6747_s3 + $0x188] sm:$0xf]  ;;  %v4552_v4 = vld [vmem:[%s6747_s3 + $0x19c] sm:$0xf0]  ;;  %v4532_v55 = vld [vmem:[%s6747_s3 + $0x104] sm:$0xf]  ;;  %v3727_v59 = vor.u32 %v4568_v49, %v3724_v50 }
  0x3e   : > { %1195 = vmatpush.bf16.msrb.mxu2 %v3715_v33  ;;  %1221 = vmatpush.bf16.msrb.mxu0 %v3719_v34  ;;  %v3643_v7 = vor.u32 %v4552_v4, %v3642_v3  ;;  %v4577_v34 = vld [vmem:[%s6747_s3 + $0x264] sm:$0xf0]  ;;  %v3580_v56 = vld [vmem:[%s6747_s3 + $0x118] sm:$0xf0]  ;;  %v4562_v62 = vld [vmem:[%s6747_s3 + $0x1f4] sm:$0xf] }
  0x3f   : > { %v3747_v45 = vor.u32 %v4577_v34, %v3746_v32  ;;  %v4565_v61 = vld [vmem:[%s6747_s3 + $0x204] sm:$0xf0]  ;;  %v3700_v63 = vld [vmem:[%s6747_s3 + $0x208] sm:$0xf0]  ;;  %v3583_v1 = vor.u32 %v4532_v55, %v3580_v56  ;;  %v4526_v4 = vld [vmem:[%s6747_s3 + $0xd4] sm:$0xf] }
  0x40   : > { %v4529_v3 = vld [vmem:[%s6747_s3 + $0xe4] sm:$0xf0]  ;;  %v3556_v5 = vld [vmem:[%s6747_s3 + $0xe8] sm:$0xf0]  ;;  %v4559_v9 = vld [vmem:[%s6747_s3 + $0x1d4] sm:$0xf0] }
  0x41   : > { %1180 = vmatpush.bf16.msra.mxu3 %v3571_v15  ;;  %1206 = vmatpush.bf16.msra.mxu1 %v3575_v16  ;;  %v3676_v11 = vld [vmem:[%s6747_s3 + $0x1d8] sm:$0xf0]  ;;  %v3559_v13 = vor.u32 %v4526_v4, %v3556_v5  ;;  %v3530_v14 = vld [vmem:[%s6747_s3 + $0xa0] sm:$0xf]  ;;  %v3650_v22 = vld [vmem:[%s6747_s3 + $0x190] sm:$0xf] }
  0x42   : > { %1196 = vmatpush.bf16.msrb.mxu2 %v3691_v46  ;;  %1222 = vmatpush.bf16.msrb.mxu0 %v3695_v48  ;;  %v4571_v48 = vld [vmem:[%s6747_s3 + $0x234] sm:$0xf0]  ;;  %v4553_v23 = vld [vmem:[%s6747_s3 + $0x1a4] sm:$0xf0]  ;;  %v4550_v24 = vld [vmem:[%s6747_s3 + $0x194] sm:$0xf] }
  0x43   : > { %v3652_v25 = vld [vmem:[%s6747_s3 + $0x1a8] sm:$0xf0]  ;;  %v3651_v32 = vor.u32 %v4553_v23, %v3650_v22  ;;  %s4828_s27 = smov 68   ;;  %s4832_s20 = smov 24   ;;  %vm1397_vm3 = vcmask 15360   ;;  %vm1294_vm4 = vcmask 244736  }
  0x44   : > { %v3655_v34 = vor.u32 %v4550_v24, %v3652_v25  ;;  %vm1314_vm5 = vcmask 64512   ;;  %vm1292_vm6 = vcmask 130048   ;;  %vm1445_vm7 = vcmask 1046528  }
  0x45   : > { %1181 = vmatpush.bf16.msra.mxu3 %v3547_v27  ;;  %1207 = vmatpush.bf16.msra.mxu1 %v3551_v28  ;;  %v4544_v27 = vld [vmem:[%s6747_s3 + $0x164] sm:$0xf]  ;;  %v3628_v28 = vld [vmem:[%s6747_s3 + $0x178] sm:$0xf0]  ;;  %vm1778_vm8 = vcmask 195584   ;;  %vm1934_vm9 = vcmask 80896  }
  0x46   : > { %1197 = vmatpush.bf16.msrb.mxu2 %v3667_v58  ;;  %1223 = vmatpush.bf16.msrb.mxu0 %v3671_v60  ;;  %v3631_v39 = vor.u32 %v4544_v27, %v3628_v28  ;;  %v3723_v58 = vor.u32 %v4571_v48, %v3722_v47  ;;  %v3698_v60 = vld [vmem:[%s6747_s3 + $0x1f0] sm:$0xf]  ;;  %v3460_v47 = vld [vmem:[%s6747_s3 + $0x28] sm:$0xf0]  ;;  %vm3354_vm1 = vcmask 1040384  }
  0x47   : > { %v3699_v6 = vor.u32 %v4565_v61, %v3698_v60  ;;  %v3506_v28 = vld [vmem:[%s6747_s3 + $0x70] sm:$0xf] }
  0x49   : > { %1182 = vmatpush.bf16.msra.mxu3 %v3523_v35  ;;  %1208 = vmatpush.bf16.msra.mxu1 %v3527_v36  ;;  %v4574_v35 = vld [vmem:[%s6747_s3 + $0x254] sm:$0xf]  ;;  %v3748_v36 = vld [vmem:[%s6747_s3 + $0x268] sm:$0xf0] }
  0x4a   : > { %1198 = vmatpush.bf16.msrb.mxu2 %v3643_v7  ;;  %1224 = vmatpush.bf16.msrb.mxu0 %v3647_v8  ;;  %v3751_v46 = vor.u32 %v4574_v35, %v3748_v36  ;;  %v3703_v7 = vor.u32 %v4562_v62, %v3700_v63  ;;  %v3674_v8 = vld [vmem:[%s6747_s3 + $0x1c0] sm:$0xf] }
  0x4d   : > { %1183 = vmatpush.bf16.msra.mxu3 %v3499_v40  ;;  %1209 = vmatpush.bf16.msra.mxu1 %v3503_v42  ;;  %v3602_v40 = vld [vmem:[%s6747_s3 + $0x130] sm:$0xf]  ;;  %v4541_v42 = vld [vmem:[%s6747_s3 + $0x144] sm:$0xf0] }
  0x4e   : > { %v3603_v51 = vor.u32 %v4541_v42, %v3602_v40  ;;  %v3484_v40 = vld [vmem:[%s6747_s3 + $0x58] sm:$0xf0] }
  0x51   : > { %1184 = vmatpush.bf16.msra.mxu3 %v3475_v52  ;;  %1210 = vmatpush.bf16.msra.mxu1 %v3479_v54  ;;  %v3607_v52 = vor.u32 %v4538_v43, %v3604_v44  ;;  %v4535_v54 = vld [vmem:[%s6747_s3 + $0x114] sm:$0xf0]  ;;  %v3458_v44 = vld [vmem:[%s6747_s3 + $0x10] sm:$0xf] }
  0x55   : > { %1185 = vmatpush.bf16.msra.mxu3 %v3451_v0  ;;  %1211 = vmatpush.bf16.msra.mxu1 %v3455_v2  ;;  %v3579_v0 = vor.u32 %v4535_v54, %v3578_v53  ;;  %v3554_v2 = vld [vmem:[%s6747_s3 + $0xd0] sm:$0xf] }
  0x56   : > { %v3555_v12 = vor.u32 %v4529_v3, %v3554_v2 }
  0x99   : > { %v562_v15 = vpop.f32.mrf.mxu1 }
  0x9a   : > { %v5348_v16 = vadd.f32 %v562_v15, %v501_v10  ;;  %v4556_v10 = vld [vmem:[%s6747_s3 + $0x1c4] sm:$0xf]  ;;  %v4523_v15 = vld [vmem:[%s6747_s3 + $0xb4] sm:$0xf0] }
  0x9b   : > { %v3679_v20 = vor.u32 %v4556_v10, %v3676_v11  ;;  %v3531_v26 = vor.u32 %v4523_v15, %v3530_v14 }
  0x9c   : > { %v5355_v21 = vpack.c.bf16 %v5348_v16, %v5348_v16 }
  0x9e   : > { %3800 = vmatmul.msk.bf16.vlgmr.msrb.gmra.mxu3 %vm1122_vm2, %v5355_v21  ;;  %3801 = vmatmul.msk.bf16.vlgmr.msrb.gmra.mxu1 %vm1122_vm2, %v5355_v21 }
  0x9f   : > { %v549_v29 = vpop.f32.mrf.mxu3  ;;  %1244 = vmatpush.bf16.msrb.mxu3 %v3795_v18  ;;  %1270 = vmatpush.bf16.msrb.mxu1 %v3799_v19  ;;  %v3532_v18 = vld [vmem:[%s6747_s3 + $0xb8] sm:$0xf0]  ;;  %v3675_v19 = vor.u32 %v4559_v9, %v3674_v8 }
  0xa0   : > { %v5385_v33 = vadd.f32 %v549_v29, %v500_v17  ;;  %v4520_v17 = vld [vmem:[%s6747_s3 + $0xa4] sm:$0xf]  ;;  %v4517_v29 = vld [vmem:[%s6747_s3 + $0x84] sm:$0xf0] }
  0xa1   : > { %v564_v37 = vpop.f32.mrf.mxu1  ;;  %v3535_v27 = vor.u32 %v4520_v17, %v3532_v18  ;;  %v3507_v35 = vor.u32 %v4517_v29, %v3506_v28 }
  0xa2   : > { %v5401_v41 = vpack.c.bf16 %v5385_v33, %v5385_v33  ;;  %v3482_v37 = vld [vmem:[%s6747_s3 + $0x40] sm:$0xf] }
  0xa3   : > { %1245 = vmatpush.bf16.msrb.mxu3 %v3771_v30  ;;  %1271 = vmatpush.bf16.msrb.mxu1 %v3775_v31  ;;  %v4514_v30 = vld [vmem:[%s6747_s3 + $0x74] sm:$0xf]  ;;  %v3508_v31 = vld [vmem:[%s6747_s3 + $0x88] sm:$0xf0] }
  0xa4   : > { %1134 = vmatmul.bf16.vlgmr.msra.gmra.mxu2 %v5401_v41  ;;  %1160 = vmatmul.bf16.vlgmr.msra.gmra.mxu0 %v5401_v41  ;;  %v3511_v36 = vor.u32 %v4514_v30, %v3508_v31 }
  0xa5   : > { %1230 = vmatpush.bf16.msra.mxu2 %v3627_v38  ;;  %1256 = vmatpush.bf16.msra.mxu0 %v3631_v39  ;;  %v4511_v38 = vld [vmem:[%s6747_s3 + $0x54] sm:$0xf0]  ;;  %v4508_v39 = vld [vmem:[%s6747_s3 + $0x44] sm:$0xf] }
  0xa6   : > { %v3483_v42 = vor.u32 %v4511_v38, %v3482_v37  ;;  %v3487_v43 = vor.u32 %v4508_v39, %v3484_v40 }
  0xa7   : > { %v551_v57 = vpop.f32.mrf.mxu3  ;;  %1246 = vmatpush.bf16.msrb.mxu3 %v3747_v45  ;;  %1272 = vmatpush.bf16.msrb.mxu1 %v3751_v46  ;;  %v4505_v45 = vld [vmem:[%s6747_s3 + $0x24] sm:$0xf0]  ;;  %v4502_v46 = vld [vmem:[%s6747_s3 + $0x14] sm:$0xf] }
  0xa8   : > { %v3459_v48 = vor.u32 %v4505_v45, %v3458_v44  ;;  %v3463_v49 = vor.u32 %v4502_v46, %v3460_v47  ;;  %v658_v57 = vld [vmem:[%s6748_s4] sm:$0x3f] }
  0xa9   : > { %1231 = vmatpush.bf16.msra.mxu2 %v3603_v51  ;;  %1257 = vmatpush.bf16.msra.mxu0 %v3607_v52  ;;  %v660_v63 = vperm.slane %v658_v57, 0  ;;  %v665_v14 = vperm.slane %v658_v57, 5  ;;  %v664_v25 = vperm.slane %v658_v57, 4 }
  0xab   : > { %1247 = vmatpush.bf16.msrb.mxu3 %v3723_v58  ;;  %1273 = vmatpush.bf16.msrb.mxu1 %v3727_v59  ;;  %v663_v59 = vperm.slane %v658_v57, 3 }
  0xad   : > { %1232 = vmatpush.bf16.msra.mxu2 %v3579_v0  ;;  %1258 = vmatpush.bf16.msra.mxu0 %v3583_v1  ;;  %v662_v0 = vperm.slane %v658_v57, 2 }
  0xae   : > { %1186 = vmatmul.bf16.vlgmr.msra.gmra.mxu3 %v5401_v41  ;;  %1212 = vmatmul.bf16.vlgmr.msra.gmra.mxu1 %v5401_v41 }
  0xaf   : > { %1248 = vmatpush.bf16.msrb.mxu3 %v3699_v6  ;;  %1274 = vmatpush.bf16.msrb.mxu1 %v3703_v7 }
  0xb1   : > { %1233 = vmatpush.bf16.msra.mxu2 %v3555_v12  ;;  %1259 = vmatpush.bf16.msra.mxu0 %v3559_v13  ;;  %v661_v12 = vperm.slane %v658_v57, 1 }
  0xb3   : > { %1249 = vmatpush.bf16.msrb.mxu3 %v3675_v19  ;;  %1275 = vmatpush.bf16.msrb.mxu1 %v3679_v20 }
  0xb4   : > { %3802 = vmatmul.msk.bf16.vlgmr.msrb.gmra.mxu2 %vm1122_vm2, %v5355_v21  ;;  %3803 = vmatmul.msk.bf16.vlgmr.msrb.gmra.mxu0 %vm1122_vm2, %v5355_v21 }
  0xb5   : > { %1234 = vmatpush.bf16.msra.mxu2 %v3531_v26  ;;  %1260 = vmatpush.bf16.msra.mxu0 %v3535_v27 }
  0xb7   : > { %1250 = vmatpush.bf16.msrb.mxu3 %v3651_v32  ;;  %1276 = vmatpush.bf16.msrb.mxu1 %v3655_v34 }
  0xb9   : > { %1235 = vmatpush.bf16.msra.mxu2 %v3507_v35  ;;  %1261 = vmatpush.bf16.msra.mxu0 %v3511_v36 }
  0xbd   : > { %1236 = vmatpush.bf16.msra.mxu2 %v3483_v42  ;;  %1262 = vmatpush.bf16.msra.mxu0 %v3487_v43 }
  0xbe   : > { %3804 = vmatmul.msk.bf16.vlgmr.msrb.gmra.mxu3 %vm1122_vm2, %v5355_v21  ;;  %3805 = vmatmul.msk.bf16.vlgmr.msrb.gmra.mxu1 %vm1122_vm2, %v5355_v21 }
  0xc1   : > { %1237 = vmatpush.bf16.msra.mxu2 %v3459_v48  ;;  %1263 = vmatpush.bf16.msra.mxu0 %v3463_v49 }
  0xc4   : > { %1238 = vmatmul.bf16.vlgmr.msra.gmra.mxu2 %v5401_v41  ;;  %1264 = vmatmul.bf16.vlgmr.msra.gmra.mxu0 %v5401_v41 }
 0x11b   : > { %v1174_v50 = vpop.f32.mrf.mxu1 }
 0x121   : > { %v1148_v51 = vpop.f32.mrf.mxu3  ;;  %v1161_v52 = vpop.f32.mrf.mxu0 }
 0x122   : > { %v1162_v19 = vadd.f32 %v1161_v52, %v661_v12 }
 0x123   : > { %v1176_v53 = vpop.f32.mrf.mxu1 }
 0x124   : > { %v1175_v26 = vadd.f32 %v1174_v50, %v1162_v19 }
 0x126   : > { %v1284_v32 = vpack.c.bf16 %v1175_v26, %v1175_v26  ;;  %v1765_v36 = vmul.f32 0.18257418, %v1175_v26 }
 0x127   : > { %v1135_v54 = vpop.f32.mrf.mxu2 }
 0x128   : > { %v1136_v3 = vadd.f32 %v1135_v54, %v660_v63  ;;  %v1766_v37 = vpack.c.bf16 %v1765_v36, %v1765_v36 }
 0x129   : > { %v1150_v55 = vpop.f32.mrf.mxu3  ;;  %v1163_v56 = vpop.f32.mrf.mxu0 }
 0x12a   : > { %v1149_v9 = vadd.f32 %v1148_v51, %v1136_v3 }
 0x12b   : > { %v1213_v58 = vpop.f32.mrf.mxu1 }
 0x12c   : > { %v1214_v60 = vadd.f32 %v1213_v58, %v663_v59  ;;  %v1282_v13 = vmul.f32 0.18257418, %v1149_v9  ;;  %v3824_v58 = vld [vmem:[%s6749_s5 + $0x30] sm:$0xf]  ;;  %v4597_v59 = vld [vmem:[%s6749_s5 + $0x34] sm:$0x70] }
 0x12e   : > { %v5556_v20 = vpack.c.bf16 %v1282_v13, %v1282_v13 }
 0x12f   : > { %v1137_v21 = vpop.f32.mrf.mxu2 }
 0x130   : > { %v3825_v21 = vor.u32 %v4597_v59, %v3824_v58 }
 0x131   : > { %v1187_v61 = vpop.f32.mrf.mxu3  ;;  %v1226_v62 = vpop.f32.mrf.mxu0 }
 0x132   : > { %v1227_v41 = vadd.f32 %v1226_v62, %v1214_v60  ;;  %v1188_v4 = vadd.f32 %v1187_v61, %v662_v0  ;;  %v1447_v63 = vsel %vm1445_vm7, %v3825_v21, 0  ;;  %v3816_v0 = vld [vmem:[%s6749_s5 + $0x20] sm:$0xf] }
 0x133   : > { %v1215_v1 = vpop.f32.mrf.mxu1 }
 0x134   : > { %v5549_v2 = vpack.c.bf16 %v1227_v41, %v1227_v41  ;;  %v4595_v41 = vld [vmem:[%s6749_s5 + $0x24] sm:$0xf0] }
 0x135   : > { %v3817_v3 = vor.u32 %v4595_v41, %v3816_v0 }
 0x136   : > { %1393 = vrot.lane.b32.xlu2 %v5549_v2, %s4824_s30 }
 0x137   : > { %v1200_v5 = vpop.f32.mrf.mxu2 }
 0x138   : > { %v1201_v6 = vadd.f32 %v1200_v5, %v1188_v4 }
 0x139   : > { %v1189_v7 = vpop.f32.mrf.mxu3  ;;  %v1228_v8 = vpop.f32.mrf.mxu0 }
 0x13a   : > { %v5553_v10 = vpack.c.bf16 %v1201_v6, %v1201_v6 }
 0x13b   : > { %v1278_v11 = vpop.f32.mrf.mxu1 }
 0x13c   : > { %1358 = vrot.lane.b32.xlu0 %v5553_v10, %s4825_s16  ;;  %s4838_s16 = smov 92  }
 0x13f   : > { %v1202_v15 = vpop.f32.mrf.mxu2 }
 0x141   : > { %v1252_v17 = vpop.f32.mrf.mxu3  ;;  %v1265_v18 = vpop.f32.mrf.mxu0 }
 0x142   : > { %v1266_v22 = vadd.f32 %v1265_v18, %v665_v14 }
 0x143   : > { %v1280_v23 = vpop.f32.mrf.mxu1 }
 0x144   : > { %v5558_v24 = vadd.f32 %v1278_v11, %v1266_v22  ;;  %1356 = vrot.lane.b32.xlu0 %v5556_v20, %s4826_s17  ;;  %s4839_s17 = smov 46  }
 0x147   : > { %v1239_v27 = vpop.f32.mrf.mxu2 }
 0x148   : > { %v1240_v28 = vadd.f32 %v1239_v27, %v664_v25 }
 0x149   : > { %v1254_v29 = vpop.f32.mrf.mxu3  ;;  %v1267_v30 = vpop.f32.mrf.mxu0 }
 0x14a   : > { %v1253_v31 = vadd.f32 %v1252_v17, %v1240_v28 }
 0x14c   : > { %v5561_v34 = vpack.c.bf16 %v1253_v31, %v1253_v31  ;;  %1288 = vrot.lane.b32.xlu0 %v1284_v32, %s4827_s21 }
 0x14e   : > { %1395 = vrot.lane.b32.xlu2 %v5561_v34, %s4824_s30  ;;  %s4837_s30 = smov 62  }
 0x14f   : > { %v1241_v35 = vpop.f32.mrf.mxu2 }
 0x154   : > { %1531 = vrot.lane.b32.xlu0 %v5556_v20, %s4828_s27 }
 0x156   : > { %1533 = vrot.lane.b32.xlu2 %v5553_v10, %s4829_s22 }
 0x15c   : > { %1648 = vrot.lane.b32.xlu0 %v5556_v20, %s4830_s23 }
 0x15e   : > { %1650 = vrot.lane.b32.xlu2 %v5553_v10, %s4831_s24 }
 0x164   : > { %1776 = vrot.lane.b32.xlu0 %v5549_v2, %s4832_s20 }
 0x166   : > { %1774 = vrot.lane.b32.xlu2 %v5553_v10, %s4832_s20 }
 0x16c   : > { %1895 = vrot.lane.b32.xlu0 %v5549_v2, %s4833_s25  ;;  %s4843_s25 = smov 10  }
 0x16e   : > { %1768 = vrot.lane.b32.xlu2 %v5556_v20, %s4834_s26 }
 0x174   : > { %2016 = vrot.lane.b32.xlu0 %v1766_v37, %s4835_s28  ;;  %s4840_s28 = smov 32  }
 0x176   : > { %1893 = vrot.lane.b32.xlu2 %v1766_v37, %s4836_s29  ;;  %s4841_s29 = smov 40  }
 0x17e   : > { %2135 = vrot.lane.b32.xlu2 %v5549_v2, %s4837_s30  ;;  %s4842_s30 = smov 100  }
 0x190   : > { %v1394_v38 = vpop.permute.xlu2 %1393 }
 0x1a8   : > { %v1396_v39 = vpop.permute.xlu2 %1395 }
 0x1a9   : > { %v1398_v40 = vsel %vm1397_vm3, %v1394_v38, %v1396_v39 }
 0x1aa   : > { %v1403_v42 = vsel %vm533_vm0, %v1398_v40, 0 }
 0x1ab   : > { %1412 = vmatpush.bf16.msrb.mxu0 %v1403_v42 }
 0x1ae   : > { %v1359_v43 = vpop.permute.xlu0 %1358 }
 0x1af   : > { %v1364_v44 = vsel %vm1294_vm4, %v1359_v43, 0 }
 0x1b0   : > { %1373 = vmatpush.bf16.xpose.msra.mxu1 %v1364_v44  ;;  %v1534_v4 = vpop.permute.xlu2 %1533 }
 0x1b1   : > { %v1539_v5 = vsel %vm1294_vm4, %v1534_v4, 0  ;;  %v3818_v4 = vld [vmem:[%s6749_s5 + $0x28] sm:$0xf0] }
 0x1b6   : > { %v1357_v45 = vpop.permute.xlu0 %1356 }
 0x1b7   : > { %3808 = vmatmul.msk.bf16.vlgmr.msra.gmra.mxu1 %vm1294_vm4, %v1357_v45 }
 0x1b8   : > { %v1651_v7 = vpop.permute.xlu2 %1650 }
 0x1be   : > { %v1289_v60 = vpop.permute.xlu0 %1288 }
 0x1c0   : > { %v1775_v14 = vpop.permute.xlu2 %1774 }
 0x1c6   : > { %v1532_v6 = vpop.permute.xlu0 %1531 }
 0x1c8   : > { %v1769_v26 = vpop.permute.xlu2 %1768 }
 0x1ce   : > { %v1649_v11 = vpop.permute.xlu0 %1648 }
 0x1d0   : > { %v1894_v30 = vpop.permute.xlu2 %1893 }
 0x1d6   : > { %v1777_v13 = vpop.permute.xlu0 %1776 }
 0x1d7   : > { %v1779_v15 = vsel %vm1778_vm8, %v1775_v14, %v1777_v13 }
 0x1d8   : > { %v1784_v17 = vsel %vm1294_vm4, %v1779_v15, 0  ;;  %v2136_v31 = vpop.permute.xlu2 %2135 }
 0x1d9   : > { %v2141_v32 = vsel %vm1294_vm4, %v2136_v31, 0 }
 0x234   : > { %v1375_v46 = vpop.f32.mrf.mxu1 }
 0x235   : > { %v1379_v47 = vsel %vm1314_vm5, %v1375_v46, -inf }
 0x236   : > { %1380 = vmax.xlane.f32.xlu1 %v1379_v47 }
 0x23c   : > { %v1377_v48 = vpop.f32.mrf.mxu1 }
 0x2a9   : > { %v1381_v49 = vpop.xlane.xlu1 %1380 }
 0x2aa   : > { %v1382_v50 = vsub.f32 %v1375_v46, %v1381_v49 }
 0x2ac   : > { %v1383_v51 = vmul.f32 1.442695, %v1382_v50 }
 0x2ae   : > { %4778 = vpow2.f32 %v1383_v51 }
 0x2b4   : > { %v4779_v52 = vpop.eup %4778 }
 0x2b5   : > { %v1385_v53 = vsel %vm1314_vm5, %v4779_v52, 0.0 }
 0x2b6   : > { %1386 = vadd.xlane.f32.xlu1 %v1385_v53 }
 0x2cf   : > { %1290 = vrot.lane.b32.xlu1 %v5553_v10, %s4827_s21  ;;  %v1656_v10 = vsel %vm1294_vm4, %v1651_v7, 0 }
 0x2d7   : > { %1770 = vrot.lane.b32.xlu1 %v1766_v37, %s4834_s26  ;;  %s4844_s26 = smov 70  }
 0x2df   : > { %2018 = vrot.lane.b32.xlu1 %v5549_v2, %s4838_s16  ;;  %s4845_s16 = smov 108  }
 0x2e7   : > { %2133 = vrot.lane.b32.xlu1 %v1766_v37, %s4839_s17  ;;  %s4846_s17 = smov 78  }
 0x329   : > { %v1387_v54 = vpop.xlane.xlu1 %1386 }
 0x32a   : > { %4780 = vrcp.f32 %v1387_v54 }
 0x330   : > { %v4781_v55 = vpop.eup %4780 }
 0x331   : > { %v1389_v56 = vmul.f32 %v4781_v55, %v4779_v52 }
 0x333   : > { %v1390_v57 = vpack.c.bf16 %v1389_v56, %v1389_v56 }
 0x335   : > { %3809 = vmatmul.msk.bf16.vlgmr.msrb.gmra.mxu0 %vm1314_vm5, %v1390_v57 }
 0x341   : > { %v1291_v61 = vpop.permute.xlu1 %1290 }
 0x342   : > { %v1293_v62 = vsel %vm1292_vm6, %v1289_v60, %v1291_v61 }
 0x343   : > { %v1299_v1 = vsel %vm1294_vm4, %v1293_v62, 0  ;;  %v4596_v62 = vld [vmem:[%s6749_s5 + $0x34] sm:$0xf] }
 0x344   : > { %1308 = vmatpush.bf16.xpose.msra.mxu3 %v1299_v1 }
 0x349   : > { %v1771_v25 = vpop.permute.xlu1 %1770 }
 0x34a   : > { %v1773_v28 = vsel %vm1314_vm5, %v1769_v26, %v1771_v25 }
 0x34b   : > { %3806 = vmatmul.msk.bf16.vlgmr.msra.gmra.mxu3 %vm1294_vm4, %v5556_v20  ;;  %v1896_v20 = vpop.permute.xlu0 %1895 }
 0x34c   : > { %1458 = vmatpush.bf16.msrb.mxu3 %v1447_v63  ;;  %v1901_v22 = vsel %vm1294_vm4, %v1896_v20, 0  ;;  %v3826_v63 = vld [vmem:[%s6749_s5 + $0x38] sm:$0x70] }
 0x34d   : > { %v3829_v0 = vor.u32 %v4596_v62, %v3826_v63 }
 0x34f   : > { %v1450_v41 = vsel %vm1445_vm7, %v3829_v0, 0 }
 0x350   : > { %1459 = vmatpush.bf16.msrb.mxu3 %v3817_v3  ;;  %v4594_v3 = vld [vmem:[%s6749_s5 + $0x24] sm:$0xf] }
 0x351   : > { %v2019_v27 = vpop.permute.xlu1 %2018 }
 0x352   : > { %v2024_v29 = vsel %vm1294_vm4, %v2019_v27, 0 }
 0x353   : > { %v2017_v35 = vpop.permute.xlu0 %2016 }
 0x354   : > { %1548 = vmatpush.bf16.xpose.msra.mxu3 %v1539_v5  ;;  %v3821_v5 = vor.u32 %v4594_v3, %v3818_v4 }
 0x359   : > { %v2134_v36 = vpop.permute.xlu1 %2133 }
 0x3b2   : > { %v1414_v8 = vpop.f32.mrf.mxu0 }
 0x3b3   : > { %v5603_v9 = vpack.c.bf16 %v1414_v8, %v1414_v8 }
 0x3b5   : > { %3830 = vmatmul.msk.bf16.vlgmr.msrb.gmra.mxu3 %vm1294_vm4, %v5603_v9 }
 0x3b6   : > { %1665 = vmatpush.bf16.xpose.msrb.mxu3 %v1656_v10 }
 0x3ba   : > { %v1416_v12 = vpop.f32.mrf.mxu0 }
 0x3c5   : > { %3850 = vmatmul.msk.bf16.vlgmr.msra.gmra.mxu3 %vm1294_vm4, %v1532_v6 }
 0x3c6   : > { %1793 = vmatpush.bf16.xpose.msra.mxu3 %v1784_v17 }
 0x3ce   : > { %v1310_v18 = vpop.f32.mrf.mxu3 }
 0x3cf   : > { %v1315_v19 = vsel %vm1314_vm5, %v1310_v18, -inf }
 0x3d0   : > { %1316 = vmax.xlane.f32.xlu0 %v1315_v19 }
 0x3d5   : > { %3874 = vmatmul.msk.bf16.vlgmr.msrb.gmra.mxu3 %vm1294_vm4, %v1649_v11 }
 0x3d6   : > { %1910 = vmatpush.bf16.xpose.msrb.mxu3 %v1901_v22  ;;  %v1312_v23 = vpop.f32.mrf.mxu3 }
 0x3e4   : > { %1329 = vrot.lane.b32.xlu0 %v5549_v2, %s4840_s28  ;;  %s3421_s28 = sshll.u32 %s6761_s19, 1 }
 0x3e5   : > { %3898 = vmatmul.msk.bf16.vlgmr.msra.gmra.mxu3 %vm1294_vm4, %v1773_v28 }
 0x3e6   : > { %2033 = vmatpush.bf16.xpose.msra.mxu3 %v2024_v29 }
 0x3ec   : > { %1811 = vrot.lane.b32.xlu0 %v5561_v34, %s4841_s29 }
 0x3f5   : > { %3922 = vmatmul.msk.bf16.vlgmr.msrb.gmra.mxu3 %vm1294_vm4, %v1894_v30 }
 0x3f6   : > { %2150 = vmatpush.bf16.xpose.msrb.mxu3 %v2141_v32 }
 0x405   : > { %3946 = vmatmul.msk.bf16.vlgmr.msra.gmra.mxu3 %vm1294_vm4, %v2017_v35 }
 0x415   : > { %3970 = vmatmul.msk.bf16.vlgmr.msrb.gmra.mxu3 %vm1294_vm4, %v2134_v36 }
 0x438   : > { %v5622_v2 = vpop.f32.mrf.mxu3 }
 0x440   : > { %v1463_v37 = vpop.f32.mrf.mxu3 }
 0x443   : > { %v1317_v38 = vpop.xlane.xlu0 %1316 }
 0x444   : > { %v1318_v39 = vsub.f32 %v1310_v18, %v1317_v38 }
 0x446   : > { %v1319_v40 = vmul.f32 1.442695, %v1318_v39 }
 0x448   : > { %4782 = vpow2.f32 %v1319_v40  ;;  %v1550_v42 = vpop.f32.mrf.mxu3 }
 0x449   : > { %v1554_v48 = vsel %vm1314_vm5, %v1550_v42, -inf }
 0x44e   : > { %v4783_v43 = vpop.eup %4782 }
 0x44f   : > { %v1321_v44 = vsel %vm1314_vm5, %v4783_v43, 0.0 }
 0x450   : > { %v1552_v45 = vpop.f32.mrf.mxu3  ;;  %1322 = vadd.xlane.f32.xlu2 %v1321_v44  ;;  %v4592_v44 = vld [vmem:[%s6749_s5 + $0x14] sm:$0xf] }
 0x456   : > { %v1330_v46 = vpop.permute.xlu0 %1329 }
 0x457   : > { %v1335_v47 = vsel %vm533_vm0, %v1330_v46, 0  ;;  %v3844_v46 = vld [vmem:[%s6749_s5 + $0x18] sm:$0x70] }
 0x458   : > { %v1667_v49 = vpop.f32.mrf.mxu3  ;;  %1555 = vmax.xlane.f32.xlu2 %v1554_v48  ;;  %1344 = vmatpush.bf16.msrb.mxu2 %v1335_v47  ;;  %v3847_v47 = vor.u32 %v4592_v44, %v3844_v46 }
 0x459   : > { %v1671_v50 = vsel %vm1314_vm5, %v1667_v49, -inf }
 0x45a   : > { %1672 = vmax.xlane.f32.xlu1 %v1671_v50 }
 0x45c   : > { %1471 = vmatpush.bf16.msra.mxu2 %v1450_v41 }
 0x460   : > { %v1669_v51 = vpop.f32.mrf.mxu3  ;;  %1472 = vmatpush.bf16.msra.mxu2 %v3821_v5 }
 0x461   : > { %v1503_v51 = vsel %vm1445_vm7, %v3847_v47, 0  ;;  %v3858_v47 = vld [vmem:[%s6749_s5 + $0x40] sm:$0xf] }
 0x462   : > { %1524 = vmatpush.bf16.msra.mxu0 %v1503_v51 }
 0x468   : > { %v5628_v52 = vpop.f32.mrf.mxu3 }
 0x469   : > { %v1799_v53 = vsel %vm1314_vm5, %v5628_v52, -inf }
 0x46a   : > { %1800 = vmax.xlane.f32.xlu1 %v1799_v53  ;;  %v4591_v53 = vld [vmem:[%s6749_s5 + $0x4] sm:$0xf0] }
 0x470   : > { %v1797_v54 = vpop.f32.mrf.mxu3 }
 0x471   : > { %v4590_v54 = vld [vmem:[%s6749_s5 + $0x4] sm:$0xf] }
 0x478   : > { %v1912_v55 = vpop.f32.mrf.mxu3 }
 0x479   : > { %v1916_v56 = vsel %vm1314_vm5, %v1912_v55, -inf }
 0x47a   : > { %1917 = vmax.xlane.f32.xlu2 %v1916_v56 }
 0x480   : > { %v1914_v57 = vpop.f32.mrf.mxu3 }
 0x481   : > { %v3836_v57 = vld [vmem:[%s6749_s5 + $0x8] sm:$0xf0] }
 0x488   : > { %v2035_v58 = vpop.f32.mrf.mxu3 }
 0x489   : > { %v2039_v59 = vsel %vm1314_vm5, %v2035_v58, -inf }
 0x48a   : > { %2040 = vmax.xlane.f32.xlu1 %v2039_v59 }
 0x490   : > { %v2037_v21 = vpop.f32.mrf.mxu3 }
 0x492   : > { %1566 = vrot.lane.b32.xlu2 %v5561_v34, %s4842_s30 }
 0x498   : > { %v5635_v60 = vpop.f32.mrf.mxu3 }
 0x499   : > { %v2156_v1 = vsel %vm1314_vm5, %v5635_v60, -inf }
 0x4a0   : > { %v2154_v61 = vpop.f32.mrf.mxu3 }
 0x4a1   : > { %v1812_v61 = vpop.permute.xlu0 %1811 }
 0x4bb   : > { %2157 = vmax.xlane.f32.xlu2 %v2156_v1 }
 0x4c3   : > { %v1323_v6 = vpop.xlane.xlu2 %1322 }
 0x4c4   : > { %4784 = vrcp.f32 %v1323_v6 }
 0x4ca   : > { %v4785_v7 = vpop.eup %4784 }
 0x4cb   : > { %v1325_v8 = vmul.f32 %v4785_v7, %v4783_v43  ;;  %v1556_v10 = vpop.xlane.xlu2 %1555  ;;  %v3842_v43 = vld [vmem:[%s6749_s5 + $0x10] sm:$0xf] }
 0x4cc   : > { %v1557_v11 = vsub.f32 %v1550_v42, %v1556_v10 }
 0x4cd   : > { %v1326_v12 = vpack.c.bf16 %v1325_v8, %v1325_v8  ;;  %v1673_v13 = vpop.xlane.xlu1 %1672 }
 0x4ce   : > { %v1558_v14 = vmul.f32 1.442695, %v1557_v11  ;;  %v1674_v15 = vsub.f32 %v1667_v49, %v1673_v13  ;;  %v1817_v11 = vsel %vm533_vm0, %v1812_v61, 0 }
 0x4cf   : > { %3807 = vmatmul.msk.bf16.vlgmr.msrb.gmra.mxu2 %vm1314_vm5, %v1326_v12 }
 0x4d0   : > { %4786 = vpow2.f32 %v1558_v14  ;;  %v1675_v17 = vmul.f32 1.442695, %v1674_v15 }
 0x4d2   : > { %4788 = vpow2.f32 %v1675_v17 }
 0x4d6   : > { %v5653_v18 = vpop.eup %4786 }
 0x4d7   : > { %v1560_v19 = vsel %vm1314_vm5, %v5653_v18, 0.0 }
 0x4d8   : > { %v5657_v20 = vpop.eup %4788  ;;  %1561 = vadd.xlane.f32.xlu1 %v1560_v19 }
 0x4d9   : > { %v1677_v22 = vsel %vm1314_vm5, %v5657_v20, 0.0 }
 0x4da   : > { %1678 = vadd.xlane.f32.xlu0 %v1677_v22 }
 0x4df   : > { %3831 = vmatmul.msk.bf16.vlgmr.msra.gmra.mxu2 %vm1294_vm4, %v5603_v9  ;;  %v1801_v9 = vpop.xlane.xlu1 %1800 }
 0x4e0   : > { %v1802_v35 = vsub.f32 %v5628_v52, %v1801_v9  ;;  %v3834_v52 = vld [vmem:[%s6749_s5] sm:$0xf] }
 0x4e1   : > { %v3835_v56 = vor.u32 %v4591_v53, %v3834_v52  ;;  %v3890_v53 = vld [vmem:[%s6749_s5 + $0x70] sm:$0xf] }
 0x4e2   : > { %v1803_v37 = vmul.f32 1.442695, %v1802_v35 }
 0x4ed   : > { %v1918_v23 = vpop.xlane.xlu2 %1917 }
 0x4ee   : > { %v1919_v25 = vsub.f32 %v1912_v55, %v1918_v23  ;;  %1930 = vrot.lane.b32.xlu0 %v5561_v34, %s4843_s25 }
 0x4f0   : > { %v1920_v26 = vmul.f32 1.442695, %v1919_v25 }
 0x4f1   : > { %1683 = vrot.lane.b32.xlu1 %v5561_v34, %s4844_s26  ;;  %v1928_v34 = vpack.c.bf16 %v5558_v24, %v5558_v24  ;;  %v4593_v24 = vld [vmem:[%s6749_s5 + $0x14] sm:$0x70] }
 0x4f2   : > { %4790 = vpow2.f32 %v1920_v26  ;;  %v3843_v45 = vor.u32 %v4593_v24, %v3842_v43 }
 0x4f4   : > { %v1500_v49 = vsel %vm1445_vm7, %v3843_v45, 0 }
 0x4f5   : > { %v1567_v27 = vpop.permute.xlu2 %1566  ;;  %1511 = vmatpush.bf16.msrb.mxu1 %v1500_v49 }
 0x4f6   : > { %v1572_v28 = vsel %vm533_vm0, %v1567_v27, 0 }
 0x4f7   : > { %1581 = vmatpush.bf16.msrb.mxu2 %v1572_v28 }
 0x4f8   : > { %v5666_v29 = vpop.eup %4790 }
 0x4f9   : > { %v1922_v30 = vsel %vm1314_vm5, %v5666_v29, 0.0  ;;  %1512 = vmatpush.bf16.msrb.mxu1 %v3835_v56 }
 0x4fa   : > { %1923 = vadd.xlane.f32.xlu2 %v1922_v30 }
 0x4fd   : > { %v2041_v31 = vpop.xlane.xlu1 %2040 }
 0x4fe   : > { %v2042_v32 = vsub.f32 %v2035_v58, %v2041_v31  ;;  %v3839_v58 = vor.u32 %v4590_v54, %v3836_v57  ;;  %v4605_v54 = vld [vmem:[%s6749_s5 + $0x74] sm:$0x70] }
 0x4ff   : > { %v3891_v57 = vor.u32 %v4605_v54, %v3890_v53 }
 0x500   : > { %v2043_v36 = vmul.f32 1.442695, %v2042_v32  ;;  %1525 = vmatpush.bf16.msra.mxu0 %v3839_v58  ;;  %v3892_v58 = vld [vmem:[%s6749_s5 + $0x78] sm:$0x70] }
 0x502   : > { %4792 = vpow2.f32 %v2043_v36 }
 0x503   : > { %4794 = vpow2.f32 %v1803_v37  ;;  %v3866_v37 = vld [vmem:[%s6749_s5 + $0x50] sm:$0xf] }
 0x508   : > { %v5673_v38 = vpop.eup %4792 }
 0x509   : > { %v5675_v39 = vpop.eup %4794  ;;  %v2045_v40 = vsel %vm1314_vm5, %v5673_v38, 0.0 }
 0x50a   : > { %v1805_v42 = vsel %vm1314_vm5, %v5675_v39, 0.0 }
 0x512   : > { %1932 = vrot.lane.b32.xlu2 %v1928_v34, %s4843_s25 }
 0x518   : > { %2046 = vadd.xlane.f32.xlu0 %v2045_v40 }
 0x51b   : > { %1806 = vadd.xlane.f32.xlu1 %v1805_v42  ;;  %v3868_v42 = vld [vmem:[%s6749_s5 + $0x58] sm:$0x70] }
 0x52e   : > { %v2158_v48 = vpop.xlane.xlu2 %2157 }
 0x52f   : > { %v2159_v50 = vsub.f32 %v5635_v60, %v2158_v48  ;;  %v4598_v48 = vld [vmem:[%s6749_s5 + $0x44] sm:$0xf] }
 0x531   : > { %v2160_v55 = vmul.f32 1.442695, %v2159_v50  ;;  %v3860_v50 = vld [vmem:[%s6749_s5 + $0x48] sm:$0xf0] }
 0x532   : > { %v3863_v51 = vor.u32 %v4598_v48, %v3860_v50  ;;  %v4617_v48 = vld [vmem:[%s6749_s5 + $0xd4] sm:$0x70]  ;;  %v3964_v50 = vld [vmem:[%s6749_s5 + $0xd8] sm:$0x70] }
 0x533   : > { %4796 = vpow2.f32 %v2160_v55  ;;  %v4604_v55 = vld [vmem:[%s6749_s5 + $0x74] sm:$0xf] }
 0x534   : > { %2051 = vrot.lane.b32.xlu1 %v1928_v34, %s4845_s16  ;;  %s489_s16 = scalar_lea.vmem %s6759_s15, %s3421_s28 }
 0x539   : > { %v5708_v59 = vpop.eup %4796 }
 0x53a   : > { %v2162_v21 = vsel %vm1314_vm5, %v5708_v59, 0.0 }
 0x53b   : > { %2163 = vadd.xlane.f32.xlu2 %v2162_v21  ;;  %v3895_v21 = vor.u32 %v4604_v55, %v3892_v58  ;;  %v4615_v58 = vld [vmem:[%s6749_s5 + $0xc4] sm:$0xf0] }
 0x53c   : > { %2168 = vrot.lane.b32.xlu1 %v1928_v34, %s4846_s17  ;;  %v4600_v34 = vld [vmem:[%s6749_s5 + $0x54] sm:$0xf] }
 0x53d   : > { %v3871_v43 = vor.u32 %v4600_v34, %v3868_v42  ;;  %v1735_v61 = vsel %vm1445_vm7, %v3895_v21, 0  ;;  %v3940_v34 = vld [vmem:[%s6749_s5 + $0xb8] sm:$0x70]  ;;  %v4614_v21 = vld [vmem:[%s6749_s5 + $0xc4] sm:$0xf] }
 0x53f   : > { %v1618_v44 = vsel %vm1445_vm7, %v3871_v43, 0  ;;  %v3930_v43 = vld [vmem:[%s6749_s5 + $0xa0] sm:$0xf] }
 0x540   : > { %1639 = vmatpush.bf16.msrb.mxu0 %v1618_v44  ;;  %v4610_v44 = vld [vmem:[%s6749_s5 + $0xa4] sm:$0xf] }
 0x544   : > { %1640 = vmatpush.bf16.msrb.mxu0 %v3863_v51 }
 0x54b   : > { %v1562_v60 = vpop.xlane.xlu1 %1561 }
 0x54c   : > { %4798 = vrcp.f32 %v1562_v60  ;;  %v1732_v60 = vsel %vm1445_vm7, %v3891_v57, 0 }
 0x54d   : > { %v1679_v3 = vpop.xlane.xlu0 %1678 }
 0x54e   : > { %4800 = vrcp.f32 %v1679_v3 }
 0x552   : > { %v4799_v62 = vpop.eup %4798  ;;  %v1346_v63 = vpop.f32.mrf.mxu2 }
 0x553   : > { %v1564_v0 = vmul.f32 %v4799_v62, %v5653_v18  ;;  %v1350_v41 = vpack.c.bf16 %v1346_v63, %v1346_v63  ;;  %v3882_v63 = vld [vmem:[%s6749_s5 + $0x60] sm:$0xf] }
 0x554   : > { %v4801_v5 = vpop.eup %4800 }
 0x555   : > { %v1565_v1 = vpack.c.bf16 %v1564_v0, %v1564_v0  ;;  %3848 = vmatmul.msk.bf16.vlgmr.msrb.gmra.mxu1 %vm1294_vm4, %v1350_v41  ;;  %3849 = vmatmul.msk.bf16.vlgmr.msra.gmra.mxu0 %vm1294_vm4, %v1350_v41  ;;  %v1681_v6 = vmul.f32 %v4801_v5, %v5657_v20  ;;  %v4602_v0 = vld [vmem:[%s6749_s5 + $0x64] sm:$0xf] }
 0x556   : > { %1756 = vmatpush.bf16.msra.mxu0 %v1735_v61 }
 0x557   : > { %3851 = vmatmul.msk.bf16.vlgmr.msrb.gmra.mxu2 %vm1314_vm5, %v1565_v1  ;;  %v1682_v12 = vpack.c.bf16 %v1681_v6, %v1681_v6  ;;  %v3884_v1 = vld [vmem:[%s6749_s5 + $0x68] sm:$0xf0]  ;;  %v3914_v6 = vld [vmem:[%s6749_s5 + $0x90] sm:$0xf] }
 0x558   : > { %v3887_v3 = vor.u32 %v4602_v0, %v3884_v1  ;;  %v4621_v0 = vld [vmem:[%s6749_s5 + $0xf4] sm:$0x70]  ;;  %v3988_v1 = vld [vmem:[%s6749_s5 + $0xf8] sm:$0x70] }
 0x55a   : > { %v1348_v4 = vpop.f32.mrf.mxu2  ;;  %1757 = vmatpush.bf16.msra.mxu0 %v3887_v3 }
 0x560   : > { %v1931_v15 = vpop.permute.xlu0 %1930 }
 0x562   : > { %v5717_v7 = vpop.f32.mrf.mxu2 }
 0x563   : > { %v1684_v8 = vpop.permute.xlu1 %1683 }
 0x564   : > { %v1689_v10 = vsel %vm533_vm0, %v1684_v8, 0  ;;  %v4609_v8 = vld [vmem:[%s6749_s5 + $0x94] sm:$0x70] }
 0x565   : > { %1698 = vmatpush.bf16.msra.mxu2 %v1689_v10  ;;  %v4608_v10 = vld [vmem:[%s6749_s5 + $0x94] sm:$0xf] }
 0x568   : > { %3875 = vmatmul.msk.bf16.vlgmr.msra.gmra.mxu2 %vm1314_vm5, %v1682_v12  ;;  %v3915_v12 = vor.u32 %v4609_v8, %v3914_v6 }
 0x569   : > { %1826 = vmatpush.bf16.msrb.mxu2 %v1817_v11  ;;  %v3916_v11 = vld [vmem:[%s6749_s5 + $0x98] sm:$0x70] }
 0x56a   : > { %v1476_v13 = vpop.f32.mrf.mxu2 }
 0x56b   : > { %v3919_v13 = vor.u32 %v4608_v10, %v3916_v11 }
 0x56d   : > { %v1924_v14 = vpop.xlane.xlu2 %1923 }
 0x575   : > { %v1933_v17 = vpop.permute.xlu2 %1932 }
 0x576   : > { %v1935_v18 = vsel %vm1934_vm9, %v1931_v15, %v1933_v17 }
 0x577   : > { %v1940_v19 = vsel %vm533_vm0, %v1935_v18, 0 }
 0x578   : > { %1949 = vmatpush.bf16.msra.mxu2 %v1940_v19  ;;  %v1860_v19 = vsel %vm1445_vm7, %v3915_v12, 0  ;;  %v3978_v12 = vld [vmem:[%s6749_s5 + $0xe0] sm:$0xf] }
 0x58b   : > { %v2047_v31 = vpop.xlane.xlu0 %2046 }
 0x58e   : > { %v1807_v20 = vpop.xlane.xlu1 %1806 }
 0x58f   : > { %4802 = vrcp.f32 %v1807_v20  ;;  %v1863_v20 = vsel %vm1445_vm7, %v3919_v13, 0 }
 0x590   : > { %4804 = vrcp.f32 %v1924_v14 }
 0x591   : > { %4806 = vrcp.f32 %v2047_v31  ;;  %v3908_v31 = vld [vmem:[%s6749_s5 + $0x88] sm:$0xf0] }
 0x595   : > { %v4803_v22 = vpop.eup %4802 }
 0x596   : > { %v1809_v23 = vmul.f32 %v4803_v22, %v5675_v39  ;;  %v4805_v26 = vpop.eup %4804 }
 0x597   : > { %v1926_v27 = vmul.f32 %v4805_v26, %v5666_v29  ;;  %v4807_v36 = vpop.eup %4806  ;;  %v4601_v29 = vld [vmem:[%s6749_s5 + $0x54] sm:$0x70] }
 0x598   : > { %v1810_v25 = vpack.c.bf16 %v1809_v23, %v1809_v23  ;;  %v2049_v39 = vmul.f32 %v4807_v36, %v5673_v38  ;;  %v3867_v40 = vor.u32 %v4601_v29, %v3866_v37  ;;  %v4599_v38 = vld [vmem:[%s6749_s5 + $0x44] sm:$0xf0]  ;;  %v4613_v36 = vld [vmem:[%s6749_s5 + $0xb4] sm:$0x70]  ;;  %v4612_v37 = vld [vmem:[%s6749_s5 + $0xb4] sm:$0xf] }
 0x599   : > { %v1927_v9 = vpack.c.bf16 %v1926_v27, %v1926_v27  ;;  %v3859_v49 = vor.u32 %v4599_v38, %v3858_v47  ;;  %v3906_v27 = vld [vmem:[%s6749_s5 + $0x80] sm:$0xf]  ;;  %v3962_v38 = vld [vmem:[%s6749_s5 + $0xd0] sm:$0xf] }
 0x59a   : > { %3899 = vmatmul.msk.bf16.vlgmr.msrb.gmra.mxu2 %vm1314_vm5, %v1810_v25  ;;  %v1615_v24 = vsel %vm1445_vm7, %v3867_v40, 0  ;;  %v2050_v45 = vpack.c.bf16 %v2049_v39, %v2049_v39  ;;  %v3943_v39 = vor.u32 %v4612_v37, %v3940_v34  ;;  %v3963_v51 = vor.u32 %v4617_v48, %v3962_v38 }
 0x59b   : > { %1626 = vmatpush.bf16.msra.mxu1 %v1615_v24  ;;  %v4611_v24 = vld [vmem:[%s6749_s5 + $0xa4] sm:$0xf0] }
 0x59c   : > { %v1986_v42 = vsel %vm1445_vm7, %v3943_v39, 0  ;;  %v2100_v54 = vsel %vm1445_vm7, %v3963_v51, 0 }
 0x59f   : > { %1627 = vmatpush.bf16.msra.mxu1 %v3859_v49  ;;  %v4616_v49 = vld [vmem:[%s6749_s5 + $0xd4] sm:$0xf] }
 0x5a3   : > { %1743 = vmatpush.bf16.msrb.mxu1 %v1732_v60  ;;  %v3956_v60 = vld [vmem:[%s6749_s5 + $0xc8] sm:$0xf0] }
 0x5a6   : > { %v2052_v28 = vpop.permute.xlu1 %2051 }
 0x5a7   : > { %v2057_v30 = vsel %vm533_vm0, %v2052_v28, 0  ;;  %v4607_v28 = vld [vmem:[%s6749_s5 + $0x84] sm:$0xf0] }
 0x5a8   : > { %2066 = vmatpush.bf16.msrb.mxu2 %v2057_v30  ;;  %v4606_v30 = vld [vmem:[%s6749_s5 + $0x84] sm:$0xf] }
 0x5aa   : > { %3923 = vmatmul.msk.bf16.vlgmr.msra.gmra.mxu2 %vm1314_vm5, %v1927_v9  ;;  %v3907_v9 = vor.u32 %v4607_v28, %v3906_v27 }
 0x5ae   : > { %v2169_v32 = vpop.permute.xlu1 %2168  ;;  %v2164_v46 = vpop.xlane.xlu2 %2163 }
 0x5af   : > { %v2174_v35 = vsel %vm533_vm0, %v2169_v32, 0  ;;  %4808 = vrcp.f32 %v2164_v46  ;;  %v3911_v32 = vor.u32 %v4606_v30, %v3908_v31  ;;  %v3932_v46 = vld [vmem:[%s6749_s5 + $0xa8] sm:$0xf0] }
 0x5b0   : > { %2183 = vmatpush.bf16.msra.mxu2 %v2174_v35  ;;  %v3938_v35 = vld [vmem:[%s6749_s5 + $0xb0] sm:$0xf]  ;;  %v3935_v47 = vor.u32 %v4610_v44, %v3932_v46 }
 0x5b1   : > { %v3939_v29 = vor.u32 %v4613_v36, %v3938_v35 }
 0x5b3   : > { %v1983_v40 = vsel %vm1445_vm7, %v3939_v29, 0 }
 0x5b5   : > { %v4809_v52 = vpop.eup %4808 }
 0x5b6   : > { %v2166_v56 = vmul.f32 %v4809_v52, %v5708_v59  ;;  %v4603_v59 = vld [vmem:[%s6749_s5 + $0x64] sm:$0xf0]  ;;  %v3967_v52 = vor.u32 %v4616_v49, %v3964_v50 }
 0x5b7   : > { %v3883_v41 = vor.u32 %v4603_v59, %v3882_v63  ;;  %v3986_v59 = vld [vmem:[%s6749_s5 + $0xf0] sm:$0xf] }
 0x5b8   : > { %v2167_v62 = vpack.c.bf16 %v2166_v56, %v2166_v56  ;;  %v2103_v55 = vsel %vm1445_vm7, %v3967_v52, 0  ;;  %v3954_v56 = vld [vmem:[%s6749_s5 + $0xc0] sm:$0xf]  ;;  %v3987_v3 = vor.u32 %v4621_v0, %v3986_v59 }
 0x5b9   : > { %1744 = vmatpush.bf16.msrb.mxu1 %v3883_v41  ;;  %v3955_v61 = vor.u32 %v4615_v58, %v3954_v56  ;;  %v4620_v41 = vld [vmem:[%s6749_s5 + $0xf4] sm:$0xf] }
 0x5ba   : > { %3947 = vmatmul.msk.bf16.vlgmr.msrb.gmra.mxu2 %vm1314_vm5, %v2050_v45  ;;  %v3931_v45 = vor.u32 %v4611_v24, %v3930_v43  ;;  %v3991_v6 = vor.u32 %v4620_v41, %v3988_v1  ;;  %v2217_v10 = vsel %vm1445_vm7, %v3987_v3, 0 }
 0x5bc   : > { %v2220_v11 = vsel %vm1445_vm7, %v3991_v6, 0 }
 0x5ca   : > { %3971 = vmatmul.msk.bf16.vlgmr.msra.gmra.mxu2 %vm1314_vm5, %v2167_v62  ;;  %v3959_v62 = vor.u32 %v4614_v21, %v3956_v60 }
 0x5d2   : > { %v5785_v4 = vpop.f32.mrf.mxu1  ;;  %v5787_v5 = vpop.f32.mrf.mxu0 }
 0x5d3   : > { %v1515_v30 = vadd.f32 %v5785_v4, %v5622_v2 }
 0x5da   : > { %v1516_v14 = vpop.f32.mrf.mxu1  ;;  %v1529_v15 = vpop.f32.mrf.mxu0 }
 0x5db   : > { %v1583_v17 = vpop.f32.mrf.mxu2  ;;  %v4619_v14 = vld [vmem:[%s6749_s5 + $0xe4] sm:$0xf0]  ;;  %v4618_v15 = vld [vmem:[%s6749_s5 + $0xe4] sm:$0xf] }
 0x5dc   : > { %v1587_v18 = vpack.c.bf16 %v1583_v17, %v1583_v17  ;;  %v3980_v17 = vld [vmem:[%s6749_s5 + $0xe8] sm:$0xf0] }
 0x5de   : > { %3872 = vmatmul.msk.bf16.vlgmr.msra.gmra.mxu1 %vm1294_vm4, %v1587_v18  ;;  %3873 = vmatmul.msk.bf16.vlgmr.msrb.gmra.mxu0 %vm1294_vm4, %v1587_v18  ;;  %v3979_v18 = vor.u32 %v4619_v14, %v3978_v12  ;;  %v4220_v14 = vld [vmem:[%s6753_s9 + $0x1c0] sm:$0xf] }
 0x5df   : > { %1871 = vmatpush.bf16.msra.mxu1 %v1860_v19  ;;  %1884 = vmatpush.bf16.msrb.mxu0 %v1863_v20  ;;  %v3983_v19 = vor.u32 %v4618_v15, %v3980_v17  ;;  %v4680_v17 = vld [vmem:[%s6753_s9 + $0x1cc] sm:$0xf0] }
 0x5e3   : > { %v1585_v22 = vpop.f32.mrf.mxu2  ;;  %1872 = vmatpush.bf16.msra.mxu1 %v3907_v9  ;;  %1885 = vmatpush.bf16.msrb.mxu0 %v3911_v32  ;;  %v1528_v9 = vadd.f32 %v5787_v5, %v5717_v7 }
 0x5eb   : > { %v1700_v23 = vpop.f32.mrf.mxu2 }
 0x5ec   : > { %v1704_v25 = vpack.c.bf16 %v1700_v23, %v1700_v23 }
 0x5ee   : > { %3896 = vmatmul.msk.bf16.vlgmr.msrb.gmra.mxu1 %vm1294_vm4, %v1704_v25  ;;  %3897 = vmatmul.msk.bf16.vlgmr.msra.gmra.mxu0 %vm1294_vm4, %v1704_v25 }
 0x5ef   : > { %1994 = vmatpush.bf16.msrb.mxu1 %v1983_v40  ;;  %2007 = vmatpush.bf16.msra.mxu0 %v1986_v42 }
 0x5f3   : > { %v1702_v26 = vpop.f32.mrf.mxu2  ;;  %1995 = vmatpush.bf16.msrb.mxu1 %v3931_v45  ;;  %2008 = vmatpush.bf16.msra.mxu0 %v3935_v47 }
 0x61d   : > { %v1828_v53 = vpop.f32.mrf.mxu2 }
 0x61e   : > { %v1832_v57 = vpack.c.bf16 %v1828_v53, %v1828_v53  ;;  %v2250_v53 = vld [vmem:[%s6750_s6] sm:$0x3] }
 0x61f   : > { %v2252_v58 = vperm.slane %v2250_v53, 0  ;;  %v2253_v21 = vperm.slane %v2250_v53, 1 }
 0x620   : > { %3920 = vmatmul.msk.bf16.vlgmr.msra.gmra.mxu1 %vm1294_vm4, %v1832_v57  ;;  %3921 = vmatmul.msk.bf16.vlgmr.msrb.gmra.mxu0 %vm1294_vm4, %v1832_v57 }
 0x621   : > { %2111 = vmatpush.bf16.msra.mxu1 %v2100_v54  ;;  %2124 = vmatpush.bf16.msrb.mxu0 %v2103_v55 }
 0x625   : > { %v1830_v63 = vpop.f32.mrf.mxu2  ;;  %2112 = vmatpush.bf16.msra.mxu1 %v3955_v61  ;;  %2125 = vmatpush.bf16.msrb.mxu0 %v3959_v62 }
 0x62d   : > { %v1951_v8 = vpop.f32.mrf.mxu2 }
 0x62e   : > { %v1955_v13 = vpack.c.bf16 %v1951_v8, %v1951_v8 }
 0x630   : > { %3944 = vmatmul.msk.bf16.vlgmr.msrb.gmra.mxu1 %vm1294_vm4, %v1955_v13  ;;  %3945 = vmatmul.msk.bf16.vlgmr.msra.gmra.mxu0 %vm1294_vm4, %v1955_v13 }
 0x631   : > { %2228 = vmatpush.bf16.msrb.mxu1 %v2217_v10  ;;  %2241 = vmatpush.bf16.msra.mxu0 %v2220_v11  ;;  %v4847_v11 = vmov 240.0  }
 0x632   : > { %4810 = vrcp.f32 %v4847_v11  ;;  %v4636_v11 = vld [vmem:[%s6753_s9 + $0x6c] sm:$0xf0] }
 0x635   : > { %v1953_v20 = vpop.f32.mrf.mxu2  ;;  %2229 = vmatpush.bf16.msrb.mxu1 %v3979_v18  ;;  %2242 = vmatpush.bf16.msra.mxu0 %v3983_v19  ;;  %v4650_v18 = vld [vmem:[%s6753_s9 + $0xe4] sm:$0xf]  ;;  %v4110_v19 = vld [vmem:[%s6753_s9 + $0xf0] sm:$0xf0] }
 0x636   : > { %v4221_v20 = vor.u32 %v4680_v17, %v4220_v14  ;;  %v4046_v14 = vld [vmem:[%s6753_s9 + $0x70] sm:$0xf0] }
 0x638   : > { %v4811_v12 = vpop.eup %4810  ;;  %2699 = vmatpush.bf16.msrb.mxu2 %v4221_v20 }
 0x639   : > { %v2267_v13 = vmul.f32 240.0, %v4811_v12  ;;  %vm2271_vm10 = vweird.f32 %v4811_v12 }
 0x63d   : > { %v2068_v22 = vpop.f32.mrf.mxu2 }
 0x63e   : > { %v2072_v23 = vpack.c.bf16 %v2068_v22, %v2068_v22  ;;  %v4113_v22 = vor.u32 %v4650_v18, %v4110_v19  ;;  %v4662_v18 = vld [vmem:[%s6753_s9 + $0x144] sm:$0xf]  ;;  %v4158_v19 = vld [vmem:[%s6753_s9 + $0x150] sm:$0xf0] }
 0x63f   : > { %v4161_v20 = vor.u32 %v4662_v18, %v4158_v19  ;;  %v4214_v18 = vld [vmem:[%s6753_s9 + $0x1b8] sm:$0xf0] }
 0x640   : > { %3968 = vmatmul.msk.bf16.vlgmr.msra.gmra.mxu1 %vm1294_vm4, %v2072_v23  ;;  %3969 = vmatmul.msk.bf16.vlgmr.msrb.gmra.mxu0 %vm1294_vm4, %v2072_v23  ;;  %v4678_v23 = vld [vmem:[%s6753_s9 + $0x1c4] sm:$0xf] }
 0x641   : > { %2711 = vmatpush.bf16.msra.mxu1 %v4113_v22  ;;  %v4028_v22 = vld [vmem:[%s6753_s9 + $0x40] sm:$0xf] }
 0x645   : > { %v2070_v25 = vpop.f32.mrf.mxu2 }
 0x646   : > { %v4222_v25 = vld [vmem:[%s6753_s9 + $0x1d0] sm:$0xf0] }
 0x64d   : > { %v2185_v26 = vpop.f32.mrf.mxu2 }
 0x64e   : > { %v2189_v27 = vpack.c.bf16 %v2185_v26, %v2185_v26  ;;  %v4092_v26 = vld [vmem:[%s6753_s9 + $0xc0] sm:$0xf] }
 0x650   : > { %3992 = vmatmul.msk.bf16.vlgmr.msrb.gmra.mxu1 %vm1294_vm4, %v2189_v27  ;;  %3993 = vmatmul.msk.bf16.vlgmr.msra.gmra.mxu0 %vm1294_vm4, %v2189_v27  ;;  %v4225_v27 = vor.u32 %v4678_v23, %v4222_v25  ;;  %v4632_v23 = vld [vmem:[%s6753_s9 + $0x4c] sm:$0xf0]  ;;  %v4140_v25 = vld [vmem:[%s6753_s9 + $0x120] sm:$0xf] }
 0x652   : > { %2725 = vmatpush.bf16.msrb.mxu0 %v4225_v27  ;;  %v4660_v27 = vld [vmem:[%s6753_s9 + $0x12c] sm:$0xf0] }
 0x655   : > { %v2187_v28 = vpop.f32.mrf.mxu2 }
 0x656   : > { %v4648_v28 = vld [vmem:[%s6753_s9 + $0xcc] sm:$0xf0] }
 0x65b   : > { %v1629_v31 = vpop.f32.mrf.mxu1  ;;  %v1642_v32 = vpop.f32.mrf.mxu0 }
 0x65c   : > { %v1646_v35 = vadd.f32 %v1629_v31, %v1515_v30  ;;  %v1647_v36 = vadd.f32 %v1642_v32, %v1528_v9  ;;  %v4204_v30 = vld [vmem:[%s6753_s9 + $0x1a0] sm:$0xf]  ;;  %v4676_v9 = vld [vmem:[%s6753_s9 + $0x1ac] sm:$0xf0]  ;;  %v4093_v31 = vor.u32 %v4648_v28, %v4092_v26  ;;  %v4029_v26 = vor.u32 %v4632_v23, %v4028_v22  ;;  %v4630_v28 = vld [vmem:[%s6753_s9 + $0x44] sm:$0xf] }
 0x65d   : > { %v4205_v32 = vor.u32 %v4676_v9, %v4204_v30  ;;  %v4030_v30 = vld [vmem:[%s6753_s9 + $0x50] sm:$0xf0]  ;;  %v4141_v9 = vor.u32 %v4660_v27, %v4140_v25  ;;  %v4641_v22 = vld [vmem:[%s6753_s9 + $0x94] sm:$0xf0]  ;;  %v4196_v23 = vld [vmem:[%s6753_s9 + $0x188] sm:$0xf] }
 0x65e   : > { %v4639_v27 = vld [vmem:[%s6753_s9 + $0x8c] sm:$0xf] }
 0x65f   : > { %2700 = vmatpush.bf16.msrb.mxu2 %v4205_v32  ;;  %v4658_v32 = vld [vmem:[%s6753_s9 + $0x124] sm:$0xf] }
 0x663   : > { %v1631_v37 = vpop.f32.mrf.mxu1  ;;  %v1644_v29 = vpop.f32.mrf.mxu0 }
 0x664   : > { %v4674_v37 = vld [vmem:[%s6753_s9 + $0x1a4] sm:$0xf] }
 0x66b   : > { %v1746_v34 = vpop.f32.mrf.mxu1  ;;  %v1759_v39 = vpop.f32.mrf.mxu0 }
 0x66c   : > { %v1763_v40 = vadd.f32 %v1746_v34, %v1646_v35  ;;  %v1764_v42 = vadd.f32 %v1759_v39, %v1647_v36  ;;  %v4646_v35 = vld [vmem:[%s6753_s9 + $0xc4] sm:$0xf]  ;;  %v4094_v36 = vld [vmem:[%s6753_s9 + $0xd0] sm:$0xf0]  ;;  %v4076_v39 = vld [vmem:[%s6753_s9 + $0xa0] sm:$0xf] }
 0x66d   : > { %v4097_v29 = vor.u32 %v4646_v35, %v4094_v36  ;;  %v4206_v34 = vld [vmem:[%s6753_s9 + $0x1b0] sm:$0xf0] }
 0x66e   : > { %v4142_v35 = vld [vmem:[%s6753_s9 + $0x130] sm:$0xf0] }
 0x66f   : > { %2712 = vmatpush.bf16.msra.mxu1 %v4097_v29  ;;  %v4145_v36 = vor.u32 %v4658_v32, %v4142_v35  ;;  %v4628_v29 = vld [vmem:[%s6753_s9 + $0x2c] sm:$0xf0]  ;;  %v4198_v32 = vld [vmem:[%s6753_s9 + $0x198] sm:$0xf0] }
 0x673   : > { %v1748_v43 = vpop.f32.mrf.mxu1  ;;  %v1761_v24 = vpop.f32.mrf.mxu0 }
 0x674   : > { %v4188_v43 = vld [vmem:[%s6753_s9 + $0x180] sm:$0xf]  ;;  %v4672_v24 = vld [vmem:[%s6753_s9 + $0x18c] sm:$0xf0] }
 0x69d   : > { %v1874_v44 = vpop.f32.mrf.mxu1  ;;  %v1887_v45 = vpop.f32.mrf.mxu0 }
 0x69e   : > { %v1891_v51 = vadd.f32 %v1874_v44, %v1763_v40  ;;  %v1892_v52 = vadd.f32 %v1887_v45, %v1764_v42  ;;  %v4644_v40 = vld [vmem:[%s6753_s9 + $0xac] sm:$0xf0]  ;;  %v4209_v42 = vor.u32 %v4674_v37, %v4206_v34  ;;  %v4642_v44 = vld [vmem:[%s6753_s9 + $0xa4] sm:$0xf]  ;;  %v4012_v37 = vld [vmem:[%s6753_s9 + $0x20] sm:$0xf] }
 0x69f   : > { %v4077_v45 = vor.u32 %v4644_v40, %v4076_v39  ;;  %v4124_v34 = vld [vmem:[%s6753_s9 + $0x100] sm:$0xf]  ;;  %v4013_v39 = vor.u32 %v4628_v29, %v4012_v37  ;;  %v4656_v40 = vld [vmem:[%s6753_s9 + $0x10c] sm:$0xf0]  ;;  %v4637_v37 = vld [vmem:[%s6753_s9 + $0x74] sm:$0xf0] }
 0x6a0   : > { %2726 = vmatpush.bf16.msrb.mxu0 %v4209_v42  ;;  %v4626_v42 = vld [vmem:[%s6753_s9 + $0x24] sm:$0xf]  ;;  %v4180_v29 = vld [vmem:[%s6753_s9 + $0x168] sm:$0xf] }
 0x6a5   : > { %v1876_v46 = vpop.f32.mrf.mxu1  ;;  %v1889_v47 = vpop.f32.mrf.mxu0 }
 0x6a6   : > { %v4078_v46 = vld [vmem:[%s6753_s9 + $0xb0] sm:$0xf0]  ;;  %v4670_v47 = vld [vmem:[%s6753_s9 + $0x184] sm:$0xf] }
 0x6ad   : > { %v1997_v2 = vpop.f32.mrf.mxu1  ;;  %v2010_v4 = vpop.f32.mrf.mxu0 }
 0x6ae   : > { %v2014_v54 = vadd.f32 %v1997_v2, %v1891_v51  ;;  %v2015_v55 = vadd.f32 %v2010_v4, %v1892_v52  ;;  %v4190_v2 = vld [vmem:[%s6753_s9 + $0x190] sm:$0xf0]  ;;  %v2268_v4 = vsub.f32 1.0, %v2267_v13 }
 0x6b5   : > { %v1999_v38 = vpop.f32.mrf.mxu1  ;;  %v2012_v7 = vpop.f32.mrf.mxu0 }
 0x6b6   : > { %v4189_v38 = vor.u32 %v4672_v24, %v4188_v43  ;;  %v4081_v7 = vor.u32 %v4642_v44, %v4078_v46  ;;  %v4014_v43 = vld [vmem:[%s6753_s9 + $0x30] sm:$0xf0]  ;;  %v4125_v24 = vor.u32 %v4656_v40, %v4124_v34  ;;  %v4635_v40 = vld [vmem:[%s6753_s9 + $0x6c] sm:$0xf] }
 0x6b7   : > { %v4017_v44 = vor.u32 %v4626_v42, %v4014_v43  ;;  %v4126_v46 = vld [vmem:[%s6753_s9 + $0x110] sm:$0xf0]  ;;  %v4054_v42 = vld [vmem:[%s6753_s9 + $0x78] sm:$0xf0] }
 0x6b8   : > { %2701 = vmatpush.bf16.msrb.mxu2 %v4189_v38  ;;  %2713 = vmatpush.bf16.msra.mxu1 %v4081_v7  ;;  %v4651_v38 = vld [vmem:[%s6753_s9 + $0xec] sm:$0xf]  ;;  %v4118_v7 = vld [vmem:[%s6753_s9 + $0xf8] sm:$0xf0] }
 0x6bd   : > { %v2114_v5 = vpop.f32.mrf.mxu1  ;;  %v2127_v48 = vpop.f32.mrf.mxu0 }
 0x6be   : > { %v2131_v56 = vadd.f32 %v2114_v5, %v2014_v54  ;;  %v2132_v57 = vadd.f32 %v2127_v48, %v2015_v55  ;;  %v4193_v5 = vor.u32 %v4670_v47, %v4190_v2  ;;  %v2269_v48 = vmul.f32 %v4811_v12, %v2268_v4  ;;  %v4116_v47 = vld [vmem:[%s6753_s9 + $0xe8] sm:$0xf]  ;;  %v4653_v4 = vld [vmem:[%s6753_s9 + $0xf4] sm:$0xf0] }
 0x6c0   : > { %2727 = vmatpush.bf16.msrb.mxu0 %v4193_v5  ;;  %v4117_v5 = vor.u32 %v4653_v4, %v4116_v47  ;;  %v4036_v47 = vld [vmem:[%s6753_s9 + $0x48] sm:$0xf] }
 0x6c5   : > { %v2116_v49 = vpop.f32.mrf.mxu1  ;;  %v2129_v50 = vpop.f32.mrf.mxu0 }
 0x6c6   : > { %v2270_v49 = vadd.f32 %v4811_v12, %v2269_v48  ;;  %v4121_v48 = vor.u32 %v4651_v38, %v4118_v7  ;;  %v4633_v38 = vld [vmem:[%s6753_s9 + $0x54] sm:$0xf0]  ;;  %v4164_v7 = vld [vmem:[%s6753_s9 + $0x148] sm:$0xf] }
 0x6c8   : > { %v5993_v50 = vsel %vm2271_vm10, %v4811_v12, %v2270_v49  ;;  %v4156_v12 = vld [vmem:[%s6753_s9 + $0x140] sm:$0xf] }
 0x6c9   : > { %v3996_v49 = vld [vmem:[%s6753_s9] sm:$0xf] }
 0x6cd   : > { %v2231_v60 = vpop.f32.mrf.mxu1  ;;  %v2244_v61 = vpop.f32.mrf.mxu0 }
 0x6ce   : > { %v2248_v62 = vadd.f32 %v2231_v60, %v2131_v56  ;;  %v2249_v63 = vadd.f32 %v2244_v61, %v2132_v57  ;;  %v4640_v60 = vld [vmem:[%s6753_s9 + $0x8c] sm:$0xf0]  ;;  %v4172_v61 = vld [vmem:[%s6753_s9 + $0x160] sm:$0xf] }
 0x6d0   : > { %v2256_v59 = vadd.f32 %v2252_v58, %v2248_v62  ;;  %v2257_v0 = vadd.f32 %v2253_v21, %v2249_v63  ;;  %v4060_v21 = vld [vmem:[%s6753_s9 + $0x80] sm:$0xf]  ;;  %v4668_v63 = vld [vmem:[%s6753_s9 + $0x16c] sm:$0xf0] }
 0x6d1   : > { %v4061_v62 = vor.u32 %v4640_v60, %v4060_v21 }
 0x6d2   : > { %v5913_v41 = vadd.f32 %v2256_v59, %v5385_v33  ;;  %v5916_v1 = vadd.f32 %v2257_v0, %v5348_v16  ;;  %v4108_v33 = vld [vmem:[%s6753_s9 + $0xe0] sm:$0xf]  ;;  %v4652_v16 = vld [vmem:[%s6753_s9 + $0xec] sm:$0xf0]  ;;  %v4638_v59 = vld [vmem:[%s6753_s9 + $0x84] sm:$0xf] }
 0x6d3   : > { %v4109_v15 = vor.u32 %v4652_v16, %v4108_v33  ;;  %v4062_v0 = vld [vmem:[%s6753_s9 + $0x90] sm:$0xf0]  ;;  %v4664_v33 = vld [vmem:[%s6753_s9 + $0x14c] sm:$0xf0]  ;;  %v4634_v16 = vld [vmem:[%s6753_s9 + $0x64] sm:$0xf] }
 0x6d4   : > { %v2262_v3 = vsel %vm1122_vm2, %v5916_v1, 0.0  ;;  %v4049_v17 = vor.u32 %v4634_v16, %v4046_v14  ;;  %v4086_v16 = vld [vmem:[%s6753_s9 + $0xb8] sm:$0xf0] }
 0x6d5   : > { %v2233_v6 = vpop.f32.mrf.mxu1  ;;  %v2246_v8 = vpop.f32.mrf.mxu0  ;;  %v2263_v10 = vadd.f32 %v2262_v3, %v5913_v41  ;;  %2685 = vmatpush.bf16.msra.mxu3 %v4109_v15  ;;  %v4666_v3 = vld [vmem:[%s6753_s9 + $0x164] sm:$0xf]  ;;  %v4157_v15 = vor.u32 %v4664_v33, %v4156_v12  ;;  %v4643_v33 = vld [vmem:[%s6753_s9 + $0xac] sm:$0xf] }
 0x6d6   : > { %v4174_v6 = vld [vmem:[%s6753_s9 + $0x170] sm:$0xf0] }
 0x6d7   : > { %2264 = vadd.xlane.f32.xlu1 %v2263_v10  ;;  %v4177_v8 = vor.u32 %v4666_v3, %v4174_v6  ;;  %v4044_v10 = vld [vmem:[%s6753_s9 + $0x60] sm:$0xf] }
 0x6d8   : > { %v4045_v13 = vor.u32 %v4636_v11, %v4044_v10  ;;  %v4645_v10 = vld [vmem:[%s6753_s9 + $0xb4] sm:$0xf0]  ;;  %v4212_v11 = vld [vmem:[%s6753_s9 + $0x1a8] sm:$0xf] }
 0x6d9   : > { %2686 = vmatpush.bf16.msra.mxu3 %v4093_v31  ;;  %2728 = vmatpush.bf16.msrb.mxu0 %v4177_v8  ;;  %v4033_v31 = vor.u32 %v4630_v28, %v4030_v30  ;;  %v4084_v8 = vld [vmem:[%s6753_s9 + $0xa8] sm:$0xf]  ;;  %v4070_v28 = vld [vmem:[%s6753_s9 + $0x98] sm:$0xf0] }
 0x6da   : > { %v4085_v12 = vor.u32 %v4645_v10, %v4084_v8  ;;  %v4004_v10 = vld [vmem:[%s6753_s9 + $0x8] sm:$0xf] }
 0x6dd   : > { %2687 = vmatpush.bf16.msra.mxu3 %v4077_v45  ;;  %2729 = vmatpush.bf16.msrb.mxu0 %v4161_v20  ;;  %v4654_v45 = vld [vmem:[%s6753_s9 + $0x104] sm:$0xf]  ;;  %v4068_v20 = vld [vmem:[%s6753_s9 + $0x88] sm:$0xf] }
 0x6de   : > { %v4129_v2 = vor.u32 %v4654_v45, %v4126_v46  ;;  %v4069_v25 = vor.u32 %v4641_v22, %v4068_v20  ;;  %v4667_v45 = vld [vmem:[%s6753_s9 + $0x16c] sm:$0xf]  ;;  %v4182_v46 = vld [vmem:[%s6753_s9 + $0x178] sm:$0xf0] }
 0x6df   : > { %v4185_v4 = vor.u32 %v4667_v45, %v4182_v46 }
 0x6e1   : > { %2688 = vmatpush.bf16.msra.mxu3 %v4061_v62  ;;  %2730 = vmatpush.bf16.msrb.mxu0 %v4145_v36  ;;  %v4681_v62 = vld [vmem:[%s6753_s9 + $0x1d4] sm:$0xf0]  ;;  %v4052_v36 = vld [vmem:[%s6753_s9 + $0x68] sm:$0xf] }
 0x6e2   : > { %v4053_v34 = vor.u32 %v4637_v37, %v4052_v36 }
 0x6e5   : > { %2689 = vmatpush.bf16.msra.mxu3 %v4045_v13  ;;  %2731 = vmatpush.bf16.msrb.mxu0 %v4129_v2  ;;  %v4677_v13 = vld [vmem:[%s6753_s9 + $0x1b4] sm:$0xf0] }
 0x6e6   : > { %v4213_v14 = vor.u32 %v4677_v13, %v4212_v11  ;;  %v4132_v11 = vld [vmem:[%s6753_s9 + $0x108] sm:$0xf] }
 0x6e9   : > { %2690 = vmatpush.bf16.msra.mxu3 %v4029_v26  ;;  %2763 = vmatpush.bf16.msra.mxu0 %v4121_v48  ;;  %v4673_v26 = vld [vmem:[%s6753_s9 + $0x194] sm:$0xf0] }
 0x6ea   : > { %v4197_v30 = vor.u32 %v4673_v26, %v4196_v23 }
 0x6ed   : > { %2691 = vmatpush.bf16.msra.mxu3 %v4013_v39  ;;  %v4669_v39 = vld [vmem:[%s6753_s9 + $0x174] sm:$0xf0] }
 0x74a   : > { %v2265_v51 = vpop.xlane.xlu1 %2264 }
 0x74b   : > { %v2273_v52 = vmul.f32 %v5993_v50, %v2265_v51  ;;  %v4624_v51 = vld [vmem:[%s6753_s9 + $0xc] sm:$0xf0] }
 0x74d   : > { %v5997_v53 = vsub.f32 %v5913_v41, %v2273_v52  ;;  %v6000_v54 = vsub.f32 %v5916_v1, %v2273_v52  ;;  %v4173_v41 = vor.u32 %v4668_v63, %v4172_v61  ;;  %v4065_v1 = vor.u32 %v4638_v59, %v4062_v0  ;;  %v4622_v52 = vld [vmem:[%s6753_s9 + $0x4] sm:$0xf]  ;;  %v4228_v61 = vld [vmem:[%s6753_s9 + $0x1c8] sm:$0xf]  ;;  %v4647_v63 = vld [vmem:[%s6753_s9 + $0xcc] sm:$0xf] }
 0x74e   : > { %v4229_v59 = vor.u32 %v4681_v62, %v4228_v61  ;;  %v4102_v0 = vld [vmem:[%s6753_s9 + $0xd8] sm:$0xf0]  ;;  %v4629_v61 = vld [vmem:[%s6753_s9 + $0x34] sm:$0xf0]  ;;  %v4148_v62 = vld [vmem:[%s6753_s9 + $0x128] sm:$0xf] }
 0x74f   : > { %v2276_v55 = vmul.f32 %v5997_v53, %v5997_v53  ;;  %v2277_v56 = vmul.f32 %v6000_v54, %v6000_v54  ;;  %2702 = vmatpush.bf16.msrb.mxu2 %v4173_v41  ;;  %2714 = vmatpush.bf16.msra.mxu1 %v4065_v1  ;;  %v4679_v41 = vld [vmem:[%s6753_s9 + $0x1cc] sm:$0xf]  ;;  %v4230_v1 = vld [vmem:[%s6753_s9 + $0x1d8] sm:$0xf0]  ;;  %v4105_v3 = vor.u32 %v4647_v63, %v4102_v0  ;;  %v4661_v63 = vld [vmem:[%s6753_s9 + $0x134] sm:$0xf0] }
 0x750   : > { %v4233_v6 = vor.u32 %v4679_v41, %v4230_v1  ;;  %v4022_v0 = vld [vmem:[%s6753_s9 + $0x38] sm:$0xf0]  ;;  %v4659_v41 = vld [vmem:[%s6753_s9 + $0x12c] sm:$0xf]  ;;  %v4149_v1 = vor.u32 %v4661_v63, %v4148_v62  ;;  %v4344_v63 = vld [vmem:[%s6755_s11 + $0xd0] sm:$0xf] }
 0x751   : > { %v2278_v57 = vsel %vm1122_vm2, %v2277_v56, 0.0  ;;  %v3998_v56 = vld [vmem:[%s6753_s9 + $0x10] sm:$0xf0]  ;;  %2764 = vmatpush.bf16.msra.mxu0 %v4105_v3  ;;  %v4150_v3 = vld [vmem:[%s6753_s9 + $0x138] sm:$0xf0] }
 0x752   : > { %v2279_v58 = vadd.f32 %v2278_v57, %v2276_v55  ;;  %v3997_v55 = vor.u32 %v4624_v51, %v3996_v49  ;;  %v4100_v57 = vld [vmem:[%s6753_s9 + $0xc8] sm:$0xf]  ;;  %v4001_v21 = vor.u32 %v4622_v52, %v3998_v56  ;;  %v4631_v49 = vld [vmem:[%s6753_s9 + $0x4c] sm:$0xf]  ;;  %v4038_v51 = vld [vmem:[%s6753_s9 + $0x58] sm:$0xf0]  ;;  %v4037_v56 = vor.u32 %v4633_v38, %v4036_v47 }
 0x753   : > { %2703 = vmatpush.bf16.msrb.mxu2 %v4157_v15  ;;  %2715 = vmatpush.bf16.msra.mxu1 %v4049_v17  ;;  %v4089_v15 = vor.u32 %v4643_v33, %v4086_v16  ;;  %v4675_v17 = vld [vmem:[%s6753_s9 + $0x1ac] sm:$0xf]  ;;  %v4153_v13 = vor.u32 %v4659_v41, %v4150_v3  ;;  %v4625_v33 = vld [vmem:[%s6753_s9 + $0x14] sm:$0xf0]  ;;  %v4280_v41 = vld [vmem:[%s6755_s11 + $0x50] sm:$0xf] }
 0x754   : > { %2280 = vadd.xlane.f32.xlu0 %v2279_v58  ;;  %v4649_v58 = vld [vmem:[%s6753_s9 + $0xd4] sm:$0xf0]  ;;  %2692 = vmatpush.bf16.msra.mxu3 %v3997_v55  ;;  %v4217_v19 = vor.u32 %v4675_v17, %v4214_v18  ;;  %v4663_v52 = vld [vmem:[%s6753_s9 + $0x14c] sm:$0xf]  ;;  %v4134_v17 = vld [vmem:[%s6753_s9 + $0x118] sm:$0xf0]  ;;  %v4005_v20 = vor.u32 %v4625_v33, %v4004_v10 }
 0x755   : > { %v4101_v60 = vor.u32 %v4649_v58, %v4100_v57  ;;  %2765 = vmatpush.bf16.msra.mxu0 %v4089_v15  ;;  %v4041_v57 = vor.u32 %v4631_v49, %v4038_v51  ;;  %v4166_v58 = vld [vmem:[%s6753_s9 + $0x158] sm:$0xf0]  ;;  %v4623_v16 = vld [vmem:[%s6753_s9 + $0xc] sm:$0xf]  ;;  %v4745_v47 = vld [vmem:[%s6755_s11 + $0x1f4] sm:$0xf0] }
 0x756   : > { %v4655_v15 = vld [vmem:[%s6753_s9 + $0x10c] sm:$0xf]  ;;  %v4711_v49 = vld [vmem:[%s6755_s11 + $0xe4] sm:$0xf0]  ;;  %v4741_v10 = vld [vmem:[%s6755_s11 + $0x1d4] sm:$0xf0] }
 0x757   : > { %2704 = vmatpush.bf16.msrb.mxu2 %v4141_v9  ;;  %2716 = vmatpush.bf16.msra.mxu1 %v4033_v31  ;;  %v4073_v9 = vor.u32 %v4639_v27, %v4070_v28  ;;  %v4671_v31 = vld [vmem:[%s6753_s9 + $0x18c] sm:$0xf]  ;;  %v2260_v28 = vld [vmem:[%s6751_s7] sm:$0x3] }
 0x758   : > { %2751 = vmatpush.bf16.msrb.mxu3 %v4229_v59  ;;  %v4201_v35 = vor.u32 %v4671_v31, %v4198_v32  ;;  %v4627_v59 = vld [vmem:[%s6753_s9 + $0x2c] sm:$0xf]  ;;  %v2297_v32 = vperm.slane %v2260_v28, 0  ;;  %v4336_v33 = vld [vmem:[%s6755_s11 + $0xc0] sm:$0xf] }
 0x759   : > { %2766 = vmatpush.bf16.msra.mxu0 %v4073_v9  ;;  %v4025_v8 = vor.u32 %v4627_v59, %v4022_v0  ;;  %v2261_v9 = vld [vmem:[%s6752_s8] sm:$0x3]  ;;  %v4709_v59 = vld [vmem:[%s6755_s11 + $0xd4] sm:$0xf0] }
 0x75a   : > { %v2304_v37 = vperm.slane %v2261_v9, 0 }
 0x75b   : > { %2705 = vmatpush.bf16.msrb.mxu2 %v4125_v24  ;;  %2717 = vmatpush.bf16.msra.mxu1 %v4017_v44  ;;  %v4181_v24 = vor.u32 %v4669_v39, %v4180_v29  ;;  %v4057_v44 = vor.u32 %v4635_v40, %v4054_v42  ;;  %v2305_v29 = vperm.slane %v2261_v9, 1  ;;  %v4264_v9 = vld [vmem:[%s6755_s11 + $0x30] sm:$0xf] }
 0x75c   : > { %2752 = vmatpush.bf16.msrb.mxu3 %v4213_v14  ;;  %v4006_v14 = vld [vmem:[%s6753_s9 + $0x18] sm:$0xf0] }
 0x75d   : > { %2767 = vmatpush.bf16.msra.mxu0 %v4057_v44  ;;  %v4009_v22 = vor.u32 %v4623_v16, %v4006_v14  ;;  %v4296_v44 = vld [vmem:[%s6755_s11 + $0x70] sm:$0xf]  ;;  %v4707_v16 = vld [vmem:[%s6755_s11 + $0xc4] sm:$0xf0] }
 0x75f   : > { %2737 = vmatpush.bf16.msra.mxu2 %v4117_v5  ;;  %2718 = vmatpush.bf16.msra.mxu1 %v4001_v21  ;;  %v4665_v5 = vld [vmem:[%s6753_s9 + $0x154] sm:$0xf0]  ;;  %v4020_v21 = vld [vmem:[%s6753_s9 + $0x28] sm:$0xf] }
 0x760   : > { %2753 = vmatpush.bf16.msrb.mxu3 %v4197_v30  ;;  %v4165_v48 = vor.u32 %v4665_v5, %v4164_v7 }
 0x761   : > { %2768 = vmatpush.bf16.msra.mxu0 %v4041_v57  ;;  %v4480_v57 = vld [vmem:[%s6755_s11 + $0x1e0] sm:$0xf] }
 0x763   : > { %2738 = vmatpush.bf16.msra.mxu2 %v4101_v60  ;;  %2777 = vmatpush.bf16.msrb.mxu1 %v4233_v6  ;;  %v4169_v60 = vor.u32 %v4663_v52, %v4166_v58  ;;  %v4021_v6 = vor.u32 %v4629_v61, %v4020_v21  ;;  %v4288_v52 = vld [vmem:[%s6755_s11 + $0x60] sm:$0xf]  ;;  %v4743_v21 = vld [vmem:[%s6755_s11 + $0x1e4] sm:$0xf0] }
 0x764   : > { %2754 = vmatpush.bf16.msrb.mxu3 %v4181_v24  ;;  %v4713_v24 = vld [vmem:[%s6755_s11 + $0xf4] sm:$0xf0]  ;;  %v4727_v61 = vld [vmem:[%s6755_s11 + $0x164] sm:$0xf0]  ;;  %v4481_v3 = vor.u32 %v4743_v21, %v4480_v57  ;;  %v4710_v21 = vld [vmem:[%s6755_s11 + $0xe4] sm:$0xf] }
 0x765   : > { %2769 = vmatpush.bf16.msra.mxu0 %v4025_v8 }
 0x767   : > { %2739 = vmatpush.bf16.msra.mxu2 %v4085_v12  ;;  %2778 = vmatpush.bf16.msrb.mxu1 %v4217_v19  ;;  %v4657_v12 = vld [vmem:[%s6753_s9 + $0x114] sm:$0xf0] }
 0x768   : > { %2755 = vmatpush.bf16.msrb.mxu3 %v4165_v48  ;;  %v4133_v18 = vor.u32 %v4657_v12, %v4132_v11  ;;  %v4352_v48 = vld [vmem:[%s6755_s11 + $0xe0] sm:$0xf]  ;;  %v4408_v11 = vld [vmem:[%s6755_s11 + $0x150] sm:$0xf]  ;;  %v4725_v12 = vld [vmem:[%s6755_s11 + $0x154] sm:$0xf0] }
 0x769   : > { %2770 = vmatpush.bf16.msra.mxu0 %v4009_v22  ;;  %v4353_v62 = vor.u32 %v4711_v49, %v4352_v48  ;;  %v4739_v22 = vld [vmem:[%s6755_s11 + $0x1c4] sm:$0xf0]  ;;  %v4240_v49 = vld [vmem:[%s6755_s11] sm:$0xf] }
 0x76a   : > { %v4699_v48 = vld [vmem:[%s6755_s11 + $0x84] sm:$0xf0] }
 0x76b   : > { %2740 = vmatpush.bf16.msra.mxu2 %v4069_v25  ;;  %2779 = vmatpush.bf16.msrb.mxu1 %v4201_v35  ;;  %v4137_v25 = vor.u32 %v4655_v15, %v4134_v17  ;;  %v2298_v35 = vperm.slane %v2260_v28, 1  ;;  %v4272_v15 = vld [vmem:[%s6755_s11 + $0x40] sm:$0xf]  ;;  %v4691_v17 = vld [vmem:[%s6755_s11 + $0x44] sm:$0xf0] }
 0x76c   : > { %2756 = vmatpush.bf16.msrb.mxu3 %v4149_v1  ;;  %v4693_v1 = vld [vmem:[%s6755_s11 + $0x54] sm:$0xf0]  ;;  %v4273_v28 = vor.u32 %v4691_v17, %v4272_v15 }
 0x76d   : > { %v4281_v14 = vor.u32 %v4693_v1, %v4280_v41  ;;  %v4735_v41 = vld [vmem:[%s6755_s11 + $0x1a4] sm:$0xf0]  ;;  %v4733_v15 = vld [vmem:[%s6755_s11 + $0x194] sm:$0xf0] }
 0x76f   : > { %2741 = vmatpush.bf16.msra.mxu2 %v4053_v34  ;;  %2780 = vmatpush.bf16.msrb.mxu1 %v4185_v4  ;;  %v4729_v4 = vld [vmem:[%s6755_s11 + $0x174] sm:$0xf0] }
 0x770   : > { %2757 = vmatpush.bf16.msrb.mxu3 %v4133_v18 }
 0x773   : > { %2742 = vmatpush.bf16.msra.mxu2 %v4037_v56  ;;  %2781 = vmatpush.bf16.msrb.mxu1 %v4169_v60  ;;  %v4416_v60 = vld [vmem:[%s6755_s11 + $0x160] sm:$0xf] }
 0x774   : > { %v4417_v8 = vor.u32 %v4727_v61, %v4416_v60  ;;  %v4354_v60 = vld [vmem:[%s6755_s11 + $0xe8] sm:$0xf0] }
 0x775   : > { %v4357_v61 = vor.u32 %v4710_v21, %v4354_v60  ;;  %v4314_v21 = vld [vmem:[%s6755_s11 + $0x98] sm:$0xf0]  ;;  %v4740_v60 = vld [vmem:[%s6755_s11 + $0x1d4] sm:$0xf] }
 0x777   : > { %2743 = vmatpush.bf16.msra.mxu2 %v4021_v6  ;;  %2782 = vmatpush.bf16.msrb.mxu1 %v4153_v13  ;;  %v4472_v6 = vld [vmem:[%s6755_s11 + $0x1d0] sm:$0xf]  ;;  %v4345_v13 = vor.u32 %v4709_v59, %v4344_v63  ;;  %v4298_v63 = vld [vmem:[%s6755_s11 + $0x78] sm:$0xf0] }
 0x778   : > { %v4473_v18 = vor.u32 %v4741_v10, %v4472_v6  ;;  %v4346_v6 = vld [vmem:[%s6755_s11 + $0xd8] sm:$0xf0]  ;;  %v4392_v10 = vld [vmem:[%s6755_s11 + $0x130] sm:$0xf] }
 0x77b   : > { %2744 = vmatpush.bf16.msra.mxu2 %v4005_v20  ;;  %2783 = vmatpush.bf16.msrb.mxu1 %v4137_v25  ;;  %v4409_v20 = vor.u32 %v4725_v12, %v4408_v11  ;;  %v4723_v25 = vld [vmem:[%s6755_s11 + $0x144] sm:$0xf0]  ;;  %v4721_v11 = vld [vmem:[%s6755_s11 + $0x134] sm:$0xf0] }
 0x77c   : > { %v4393_v12 = vor.u32 %v4721_v11, %v4392_v10  ;;  %v4306_v10 = vld [vmem:[%s6755_s11 + $0x88] sm:$0xf0]  ;;  %v4738_v11 = vld [vmem:[%s6755_s11 + $0x1c4] sm:$0xf] }
 0x7c7   : > { %v2281_v43 = vpop.xlane.xlu0 %2280 }
 0x7c8   : > { %v2282_v2 = vmul.f32 %v2281_v43, %v5993_v50  ;;  %v4360_v43 = vld [vmem:[%s6755_s11 + $0xf0] sm:$0xf] }
 0x7c9   : > { %v4361_v5 = vor.u32 %v4713_v24, %v4360_v43  ;;  %v4687_v43 = vld [vmem:[%s6755_s11 + $0x24] sm:$0xf0] }
 0x7ca   : > { %v2283_v55 = vadd.f32 1e-05, %v2282_v2  ;;  %v4424_v2 = vld [vmem:[%s6755_s11 + $0x170] sm:$0xf] }
 0x7cb   : > { %v4425_v58 = vor.u32 %v4729_v4, %v4424_v2  ;;  %v4248_v2 = vld [vmem:[%s6755_s11 + $0x10] sm:$0xf]  ;;  %v4685_v4 = vld [vmem:[%s6755_s11 + $0x14] sm:$0xf0] }
 0x7cc   : > { %4812 = vrsqrt.f32 %v2283_v55  ;;  %vm2290_vm12 = vweird.f32 %v2283_v55 }
 0x7d2   : > { %v4813_v19 = vpop.eup %4812 }
 0x7d3   : > { %v2285_v23 = vmul.f32 %v4813_v19, %v2283_v55  ;;  %vm2291_vm11 = vweird.f32 %v4813_v19  ;;  %v4695_v55 = vld [vmem:[%s6755_s11 + $0x64] sm:$0xf0] }
 0x7d4   : > { %vm2292_vm13 = vmor %vm2290_vm12, %vm2291_vm11  ;;  %v4289_v0 = vor.u32 %v4695_v55, %v4288_v52  ;;  %v4712_v52 = vld [vmem:[%s6755_s11 + $0xf4] sm:$0xf]  ;;  %v4362_v55 = vld [vmem:[%s6755_s11 + $0xf8] sm:$0xf0] }
 0x7d5   : > { %v2286_v26 = vmul.f32 %v4813_v19, %v2285_v23  ;;  %v4400_v23 = vld [vmem:[%s6755_s11 + $0x140] sm:$0xf] }
 0x7d7   : > { %v2287_v27 = vmul.f32 0.5, %v2286_v26  ;;  %v4337_v26 = vor.u32 %v4707_v16, %v4336_v33  ;;  %v4290_v33 = vld [vmem:[%s6755_s11 + $0x68] sm:$0xf0] }
 0x7d9   : > { %v2288_v30 = vsub.f32 1.5, %v2287_v27  ;;  %v4328_v27 = vld [vmem:[%s6755_s11 + $0xb0] sm:$0xf] }
 0x7db   : > { %v2289_v31 = vmul.f32 %v4813_v19, %v2288_v30  ;;  %v4705_v30 = vld [vmem:[%s6755_s11 + $0xb4] sm:$0xf0] }
 0x7dd   : > { %v2293_v36 = vsel %vm2292_vm13, %v4813_v19, %v2289_v31  ;;  %v4464_v19 = vld [vmem:[%s6755_s11 + $0x1c0] sm:$0xf]  ;;  %v4689_v31 = vld [vmem:[%s6755_s11 + $0x34] sm:$0xf0] }
 0x7de   : > { %v2294_v34 = vmul.f32 %v2293_v36, %v5997_v53  ;;  %v2295_v39 = vmul.f32 %v2293_v36, %v6000_v54  ;;  %v4697_v53 = vld [vmem:[%s6755_s11 + $0x74] sm:$0xf0]  ;;  %v4488_v54 = vld [vmem:[%s6755_s11 + $0x1f0] sm:$0xf] }
 0x7df   : > { %v4297_v51 = vor.u32 %v4697_v53, %v4296_v44  ;;  %v4489_v56 = vor.u32 %v4745_v47, %v4488_v54  ;;  %v4456_v36 = vld [vmem:[%s6755_s11 + $0x1b0] sm:$0xf]  ;;  %v4701_v47 = vld [vmem:[%s6755_s11 + $0x94] sm:$0xf0] }
 0x7e0   : > { %v2301_v40 = vmul.f32 %v2297_v32, %v2294_v34  ;;  %v2302_v42 = vmul.f32 %v2298_v35, %v2295_v39  ;;  %v4465_v32 = vor.u32 %v4739_v22, %v4464_v19  ;;  %v4401_v35 = vor.u32 %v4723_v25, %v4400_v23  ;;  %v4320_v34 = vld [vmem:[%s6755_s11 + $0xa0] sm:$0xf]  ;;  %v4312_v53 = vld [vmem:[%s6755_s11 + $0x90] sm:$0xf]  ;;  %v4338_v19 = vld [vmem:[%s6755_s11 + $0xc8] sm:$0xf0] }
 0x7e1   : > { %v4265_v39 = vor.u32 %v4689_v31, %v4264_v9  ;;  %v4384_v22 = vld [vmem:[%s6755_s11 + $0x120] sm:$0xf]  ;;  %v4719_v23 = vld [vmem:[%s6755_s11 + $0x124] sm:$0xf0] }
 0x7e2   : > { %v6319_v45 = vadd.f32 %v2304_v37, %v2301_v40  ;;  %v6321_v46 = vadd.f32 %v2305_v29, %v2302_v42  ;;  %v4737_v37 = vld [vmem:[%s6755_s11 + $0x1b4] sm:$0xf0]  ;;  %v4329_v29 = vor.u32 %v4705_v30, %v4328_v27  ;;  %v4703_v40 = vld [vmem:[%s6755_s11 + $0xa4] sm:$0xf0]  ;;  %v4256_v42 = vld [vmem:[%s6755_s11 + $0x20] sm:$0xf]  ;;  %v4385_v25 = vor.u32 %v4719_v23, %v4384_v22 }
 0x7e3   : > { %v4457_v24 = vor.u32 %v4737_v37, %v4456_v36  ;;  %v4321_v44 = vor.u32 %v4703_v40, %v4320_v34  ;;  %v4257_v54 = vor.u32 %v4687_v43, %v4256_v42  ;;  %v4282_v27 = vld [vmem:[%s6755_s11 + $0x58] sm:$0xf0]  ;;  %v4432_v30 = vld [vmem:[%s6755_s11 + $0x180] sm:$0xf]  ;;  %v4731_v9 = vld [vmem:[%s6755_s11 + $0x184] sm:$0xf0] }
 0x7e4   : > { %v6334_v38 = vpack.c.bf16 %v6319_v45, %v6319_v45  ;;  %v6338_v7 = vpack.c.bf16 %v6321_v46, %v6321_v46  ;;  %v4433_v31 = vor.u32 %v4731_v9, %v4432_v30  ;;  %v4744_v36 = vld [vmem:[%s6755_s11 + $0x1f4] sm:$0xf]  ;;  %v4376_v34 = vld [vmem:[%s6755_s11 + $0x110] sm:$0xf]  ;;  %v4690_v43 = vld [vmem:[%s6755_s11 + $0x44] sm:$0xf] }
 0x7e5   : > { %v4458_v22 = vld [vmem:[%s6755_s11 + $0x1b8] sm:$0xf0]  ;;  %v4402_v9 = vld [vmem:[%s6755_s11 + $0x148] sm:$0xf0] }
 0x7e6   : > { %2693 = vmatmul.bf16.vlgmr.msra.gmra.mxu3 %v6334_v38  ;;  %4234 = vmatmul.msk.bf16.vlgmr.msrb.gmra.mxu2 %vm1122_vm2, %v6338_v7 }
 0x7e7   : > { %2719 = vmatmul.bf16.vlgmr.msra.gmra.mxu1 %v6334_v38  ;;  %4235 = vmatmul.msk.bf16.vlgmr.msrb.gmra.mxu0 %vm1122_vm2, %v6338_v7 }
 0x7e8   : > { %3200 = vmatpush.bf16.msrb.mxu2 %v4361_v5  ;;  %3187 = vmatpush.bf16.msra.mxu3 %v4297_v51  ;;  %v4249_v5 = vor.u32 %v4685_v4, %v4248_v2  ;;  %v4683_v51 = vld [vmem:[%s6755_s11 + $0x4] sm:$0xf0]  ;;  %v4482_v4 = vld [vmem:[%s6755_s11 + $0x1e8] sm:$0xf0] }
 0x7e9   : > { %3226 = vmatpush.bf16.msrb.mxu0 %v4489_v56  ;;  %3213 = vmatpush.bf16.msra.mxu1 %v4425_v58  ;;  %v4241_v57 = vor.u32 %v4683_v51, %v4240_v49  ;;  %v4365_v58 = vor.u32 %v4712_v52, %v4362_v55  ;;  %v4688_v49 = vld [vmem:[%s6755_s11 + $0x34] sm:$0xf]  ;;  %v4266_v51 = vld [vmem:[%s6755_s11 + $0x38] sm:$0xf0] }
 0x7ea   : > { %v4728_v52 = vld [vmem:[%s6755_s11 + $0x174] sm:$0xf]  ;;  %v4269_v55 = vor.u32 %v4688_v49, %v4266_v51 }
 0x7ec   : > { %3201 = vmatpush.bf16.msrb.mxu2 %v4353_v62  ;;  %3188 = vmatpush.bf16.msra.mxu3 %v4289_v0  ;;  %v4696_v62 = vld [vmem:[%s6755_s11 + $0x74] sm:$0xf]  ;;  %v4448_v0 = vld [vmem:[%s6755_s11 + $0x1a0] sm:$0xf] }
 0x7ed   : > { %3227 = vmatpush.bf16.msrb.mxu0 %v4481_v3  ;;  %3214 = vmatpush.bf16.msra.mxu1 %v4417_v8  ;;  %v4301_v59 = vor.u32 %v4696_v62, %v4298_v63  ;;  %v4449_v1 = vor.u32 %v4735_v41, %v4448_v0  ;;  %v4708_v3 = vld [vmem:[%s6755_s11 + $0xd4] sm:$0xf]  ;;  %v4474_v62 = vld [vmem:[%s6755_s11 + $0x1d8] sm:$0xf0]  ;;  %v4258_v0 = vld [vmem:[%s6755_s11 + $0x28] sm:$0xf0] }
 0x7ee   : > { %v4349_v8 = vor.u32 %v4708_v3, %v4346_v6  ;;  %v4477_v63 = vor.u32 %v4740_v60, %v4474_v62  ;;  %v4726_v41 = vld [vmem:[%s6755_s11 + $0x164] sm:$0xf]  ;;  %v4418_v3 = vld [vmem:[%s6755_s11 + $0x168] sm:$0xf0] }
 0x7ef   : > { %v4421_v6 = vor.u32 %v4726_v41, %v4418_v3 }
 0x7f0   : > { %3202 = vmatpush.bf16.msrb.mxu2 %v4345_v13  ;;  %3189 = vmatpush.bf16.msra.mxu3 %v4281_v14  ;;  %v4694_v13 = vld [vmem:[%s6755_s11 + $0x64] sm:$0xf]  ;;  %v4440_v14 = vld [vmem:[%s6755_s11 + $0x190] sm:$0xf] }
 0x7f1   : > { %3228 = vmatpush.bf16.msrb.mxu0 %v4473_v18  ;;  %3215 = vmatpush.bf16.msra.mxu1 %v4409_v20  ;;  %v4293_v16 = vor.u32 %v4694_v13, %v4290_v33  ;;  %v4441_v17 = vor.u32 %v4733_v15, %v4440_v14  ;;  %v4706_v18 = vld [vmem:[%s6755_s11 + $0xc4] sm:$0xf]  ;;  %v4466_v13 = vld [vmem:[%s6755_s11 + $0x1c8] sm:$0xf0]  ;;  %v4250_v14 = vld [vmem:[%s6755_s11 + $0x18] sm:$0xf0] }
 0x7f2   : > { %v4341_v20 = vor.u32 %v4706_v18, %v4338_v19  ;;  %v4469_v33 = vor.u32 %v4738_v11, %v4466_v13  ;;  %v4410_v18 = vld [vmem:[%s6755_s11 + $0x158] sm:$0xf0] }
 0x7f4   : > { %3203 = vmatpush.bf16.msrb.mxu2 %v4337_v26  ;;  %3190 = vmatpush.bf16.msra.mxu3 %v4273_v28  ;;  %v4692_v26 = vld [vmem:[%s6755_s11 + $0x54] sm:$0xf] }
 0x7f5   : > { %3229 = vmatpush.bf16.msrb.mxu0 %v4465_v32  ;;  %3216 = vmatpush.bf16.msra.mxu1 %v4401_v35  ;;  %v4285_v28 = vor.u32 %v4692_v26, %v4282_v27  ;;  %v4704_v32 = vld [vmem:[%s6755_s11 + $0xb4] sm:$0xf]  ;;  %v4330_v35 = vld [vmem:[%s6755_s11 + $0xb8] sm:$0xf0]  ;;  %v4242_v26 = vld [vmem:[%s6755_s11 + $0x8] sm:$0xf0] }
 0x7f6   : > { %2745 = vmatmul.bf16.vlgmr.msra.gmra.mxu2 %v6334_v38  ;;  %4236 = vmatmul.msk.bf16.vlgmr.msrb.gmra.mxu3 %vm1122_vm2, %v6338_v7  ;;  %v4333_v37 = vor.u32 %v4704_v32, %v4330_v35  ;;  %v4722_v27 = vld [vmem:[%s6755_s11 + $0x144] sm:$0xf]  ;;  %v4450_v35 = vld [vmem:[%s6755_s11 + $0x1a8] sm:$0xf0] }
 0x7f7   : > { %2771 = vmatmul.bf16.vlgmr.msra.gmra.mxu0 %v6334_v38  ;;  %4237 = vmatmul.msk.bf16.vlgmr.msrb.gmra.mxu1 %vm1122_vm2, %v6338_v7  ;;  %v4313_v38 = vor.u32 %v4701_v47, %v4312_v53  ;;  %v4304_v7 = vld [vmem:[%s6755_s11 + $0x80] sm:$0xf]  ;;  %v4702_v53 = vld [vmem:[%s6755_s11 + $0xa4] sm:$0xf] }
 0x7f8   : > { %3204 = vmatpush.bf16.msrb.mxu2 %v4329_v29  ;;  %3191 = vmatpush.bf16.msra.mxu3 %v4265_v39  ;;  %v4305_v56 = vor.u32 %v4699_v48, %v4304_v7  ;;  %v4490_v29 = vld [vmem:[%s6755_s11 + $0x1f8] sm:$0xf0]  ;;  %v4717_v39 = vld [vmem:[%s6755_s11 + $0x114] sm:$0xf0]  ;;  %v4742_v47 = vld [vmem:[%s6755_s11 + $0x1e4] sm:$0xf] }
 0x7f9   : > { %3230 = vmatpush.bf16.msrb.mxu0 %v4457_v24  ;;  %3217 = vmatpush.bf16.msra.mxu1 %v4393_v12  ;;  %v4493_v40 = vor.u32 %v4744_v36, %v4490_v29  ;;  %v4377_v42 = vor.u32 %v4717_v39, %v4376_v34  ;;  %v4274_v24 = vld [vmem:[%s6755_s11 + $0x48] sm:$0xf0]  ;;  %v4715_v7 = vld [vmem:[%s6755_s11 + $0x104] sm:$0xf0]  ;;  %v4734_v32 = vld [vmem:[%s6755_s11 + $0x1a4] sm:$0xf] }
 0x7fa   : > { %v4453_v36 = vor.u32 %v4734_v32, %v4450_v35  ;;  %v4720_v29 = vld [vmem:[%s6755_s11 + $0x134] sm:$0xf]  ;;  %v4394_v34 = vld [vmem:[%s6755_s11 + $0x138] sm:$0xf0] }
 0x7fb   : > { %v4397_v39 = vor.u32 %v4720_v29, %v4394_v34 }
 0x7fc   : > { %3205 = vmatpush.bf16.msrb.mxu2 %v4321_v44  ;;  %3192 = vmatpush.bf16.msra.mxu3 %v4257_v54  ;;  %v4277_v44 = vor.u32 %v4690_v43, %v4274_v24  ;;  %v4322_v54 = vld [vmem:[%s6755_s11 + $0xa8] sm:$0xf0]  ;;  %v4718_v43 = vld [vmem:[%s6755_s11 + $0x124] sm:$0xf] }
 0x7fd   : > { %3231 = vmatpush.bf16.msrb.mxu0 %v4449_v1  ;;  %3218 = vmatpush.bf16.msra.mxu1 %v4385_v25  ;;  %v4325_v2 = vor.u32 %v4702_v53, %v4322_v54  ;;  %v4682_v25 = vld [vmem:[%s6755_s11 + $0x4] sm:$0xf] }
 0x7fe   : > { %v4245_v30 = vor.u32 %v4682_v25, %v4242_v26 }
 0x800   : > { %3206 = vmatpush.bf16.msrb.mxu2 %v4313_v38  ;;  %3193 = vmatpush.bf16.msra.mxu3 %v4249_v5  ;;  %v4368_v38 = vld [vmem:[%s6755_s11 + $0x100] sm:$0xf]  ;;  %v4485_v5 = vor.u32 %v4742_v47, %v4482_v4  ;;  %v4730_v47 = vld [vmem:[%s6755_s11 + $0x184] sm:$0xf] }
 0x801   : > { %3232 = vmatpush.bf16.msrb.mxu0 %v4441_v17  ;;  %3219 = vmatpush.bf16.msra.mxu1 %v4377_v42  ;;  %v4369_v48 = vor.u32 %v4715_v7, %v4368_v38  ;;  %v4724_v17 = vld [vmem:[%s6755_s11 + $0x154] sm:$0xf]  ;;  %v4442_v42 = vld [vmem:[%s6755_s11 + $0x198] sm:$0xf0] }
 0x802   : > { %v4413_v19 = vor.u32 %v4724_v17, %v4410_v18 }
 0x804   : > { %3207 = vmatpush.bf16.msrb.mxu2 %v4305_v56  ;;  %3194 = vmatpush.bf16.msra.mxu3 %v4241_v57  ;;  %v4426_v56 = vld [vmem:[%s6755_s11 + $0x178] sm:$0xf0] }
 0x805   : > { %3233 = vmatpush.bf16.msrb.mxu0 %v4433_v31  ;;  %3220 = vmatpush.bf16.msra.mxu1 %v4369_v48  ;;  %v4429_v57 = vor.u32 %v4728_v52, %v4426_v56  ;;  %v4405_v31 = vor.u32 %v4722_v27, %v4402_v9  ;;  %v4378_v48 = vld [vmem:[%s6755_s11 + $0x118] sm:$0xf0] }
 0x808   : > { %3252 = vmatpush.bf16.msra.mxu2 %v4365_v58  ;;  %3239 = vmatpush.bf16.msrb.mxu3 %v4301_v59  ;;  %v4700_v58 = vld [vmem:[%s6755_s11 + $0x94] sm:$0xf]  ;;  %v4686_v59 = vld [vmem:[%s6755_s11 + $0x24] sm:$0xf] }
 0x809   : > { %3278 = vmatpush.bf16.msra.mxu0 %v4493_v40  ;;  %3265 = vmatpush.bf16.msrb.mxu1 %v4429_v57  ;;  %v4261_v1 = vor.u32 %v4686_v59, %v4258_v0  ;;  %v4732_v40 = vld [vmem:[%s6755_s11 + $0x194] sm:$0xf]  ;;  %v4370_v59 = vld [vmem:[%s6755_s11 + $0x108] sm:$0xf0] }
 0x80a   : > { %v4445_v24 = vor.u32 %v4732_v40, %v4442_v42 }
 0x80c   : > { %3253 = vmatpush.bf16.msra.mxu2 %v4357_v61  ;;  %3240 = vmatpush.bf16.msrb.mxu3 %v4293_v16  ;;  %v4317_v61 = vor.u32 %v4700_v58, %v4314_v21  ;;  %v4684_v16 = vld [vmem:[%s6755_s11 + $0x14] sm:$0xf] }
 0x80d   : > { %3279 = vmatpush.bf16.msra.mxu0 %v4485_v5  ;;  %3266 = vmatpush.bf16.msrb.mxu1 %v4421_v6  ;;  %v4253_v15 = vor.u32 %v4684_v16, %v4250_v14  ;;  %v4716_v5 = vld [vmem:[%s6755_s11 + $0x114] sm:$0xf] }
 0x80e   : > { %v4381_v57 = vor.u32 %v4716_v5, %v4378_v48 }
 0x810   : > { %3254 = vmatpush.bf16.msra.mxu2 %v4349_v8  ;;  %3241 = vmatpush.bf16.msrb.mxu3 %v4285_v28  ;;  %v4698_v8 = vld [vmem:[%s6755_s11 + $0x84] sm:$0xf]  ;;  %v6670_v28 = vld [vmem:[%s6754_s10] sm:$0xf] }
 0x811   : > { %3280 = vmatpush.bf16.msra.mxu0 %v4477_v63  ;;  %v4309_v12 = vor.u32 %v4698_v8, %v4306_v10  ;;  %3267 = vmatpush.bf16.msrb.mxu1 %v4413_v19  ;;  %v2374_v7 = vperm.slane %v6670_v28, 0  ;;  %v4714_v63 = vld [vmem:[%s6755_s11 + $0x104] sm:$0xf]  ;;  %v2377_v8 = vperm.slane %v6670_v28, 3  ;;  %v2376_v13 = vperm.slane %v6670_v28, 2 }
 0x812   : > { %v4373_v41 = vor.u32 %v4714_v63, %v4370_v59 }
 0x814   : > { %3255 = vmatpush.bf16.msra.mxu2 %v4341_v20  ;;  %3242 = vmatpush.bf16.msrb.mxu3 %v4277_v44  ;;  %v4736_v20 = vld [vmem:[%s6755_s11 + $0x1b4] sm:$0xf]  ;;  %v4386_v44 = vld [vmem:[%s6755_s11 + $0x128] sm:$0xf0] }
 0x815   : > { %3281 = vmatpush.bf16.msra.mxu0 %v4469_v33  ;;  %v4461_v23 = vor.u32 %v4736_v20, %v4458_v22  ;;  %3268 = vmatpush.bf16.msrb.mxu1 %v4405_v31  ;;  %v4389_v38 = vor.u32 %v4718_v43, %v4386_v44 }
 0x818   : > { %3256 = vmatpush.bf16.msra.mxu2 %v4333_v37  ;;  %3243 = vmatpush.bf16.msrb.mxu3 %v4269_v55  ;;  %v2375_v37 = vperm.slane %v6670_v28, 1 }
 0x819   : > { %3282 = vmatpush.bf16.msra.mxu0 %v4461_v23  ;;  %3269 = vmatpush.bf16.msrb.mxu1 %v4397_v39 }
 0x81c   : > { %3257 = vmatpush.bf16.msra.mxu2 %v4325_v2  ;;  %3244 = vmatpush.bf16.msrb.mxu3 %v4261_v1  ;;  %v4434_v2 = vld [vmem:[%s6755_s11 + $0x188] sm:$0xf0] }
 0x81d   : > { %3283 = vmatpush.bf16.msra.mxu0 %v4453_v36  ;;  %v4437_v51 = vor.u32 %v4730_v47, %v4434_v2  ;;  %3270 = vmatpush.bf16.msrb.mxu1 %v4389_v38  ;;  %v2861_v36 = vld [vmem:[%s6756_s12] sm:$0x3] }
 0x81e   : > { %v2863_v34 = vperm.slane %v2861_v36, 0  ;;  %v2864_v40 = vperm.slane %v2861_v36, 1 }
 0x820   : > { %3258 = vmatpush.bf16.msra.mxu2 %v4317_v61  ;;  %3245 = vmatpush.bf16.msrb.mxu3 %v4253_v15 }
 0x821   : > { %3284 = vmatpush.bf16.msra.mxu0 %v4445_v24  ;;  %3271 = vmatpush.bf16.msrb.mxu1 %v4381_v57 }
 0x824   : > { %3259 = vmatpush.bf16.msra.mxu2 %v4309_v12  ;;  %3246 = vmatpush.bf16.msrb.mxu3 %v4245_v30 }
 0x825   : > { %3285 = vmatpush.bf16.msra.mxu0 %v4437_v51  ;;  %3272 = vmatpush.bf16.msrb.mxu1 %v4373_v41 }
 0x864   : > { %v2720_v53 = vpop.f32.mrf.mxu1  ;;  %v2733_v54 = vpop.f32.mrf.mxu0 }
 0x865   : > { %v2721_v4 = vadd.f32 %v2720_v53, %v2375_v37 }
 0x867   : > { %v2734_v49 = vadd.f32 %v2733_v54, %v2721_v4 }
 0x869   : > { %v2790_v52 = vmax.f32 %v2734_v49, 0.0  ;;  %v2694_v55 = vpop.f32.mrf.mxu3  ;;  %v2707_v56 = vpop.f32.mrf.mxu2 }
 0x86a   : > { %v2695_v58 = vadd.f32 %v2694_v55, %v2374_v7 }
 0x86b   : > { %v2794_v21 = vpack.c.bf16 %v2790_v52, %v2790_v52 }
 0x86c   : > { %v2708_v60 = vadd.f32 %v2707_v56, %v2695_v58  ;;  %v2722_v61 = vpop.f32.mrf.mxu1  ;;  %v2735_v62 = vpop.f32.mrf.mxu0 }
 0x86d   : > { %3208 = vmatmul.bf16.vlgmr.msrb.gmra.mxu2 %v2794_v21 }
 0x86e   : > { %v2789_v0 = vmax.f32 %v2708_v60, 0.0 }
 0x870   : > { %v2793_v1 = vpack.c.bf16 %v2789_v0, %v2789_v0 }
 0x871   : > { %v2696_v3 = vpop.f32.mrf.mxu3  ;;  %v2709_v6 = vpop.f32.mrf.mxu2 }
 0x872   : > { %3195 = vmatmul.bf16.vlgmr.msra.gmra.mxu3 %v2793_v1 }
 0x874   : > { %v2772_v10 = vpop.f32.mrf.mxu0  ;;  %v2785_v11 = vpop.f32.mrf.mxu1 }
 0x875   : > { %v2773_v12 = vadd.f32 %v2772_v10, %v2377_v8  ;;  %v3293_v10 = vld [vmem:[%s6757_s13] sm:$0x3] }
 0x877   : > { %v2786_v33 = vadd.f32 %v2785_v11, %v2773_v12  ;;  %v3294_v12 = vld [vmem:[%s6758_s14] sm:$0x3] }
 0x879   : > { %v2792_v16 = vmax.f32 %v2786_v33, 0.0  ;;  %v2746_v14 = vpop.f32.mrf.mxu2  ;;  %v2759_v15 = vpop.f32.mrf.mxu3  ;;  %v3323_v33 = vperm.slane %v3293_v10, 0 }
 0x87a   : > { %v2747_v17 = vadd.f32 %v2746_v14, %v2376_v13  ;;  %v3330_v14 = vperm.slane %v3294_v12, 0 }
 0x87b   : > { %v2796_v18 = vpack.c.bf16 %v2792_v16, %v2792_v16 }
 0x87c   : > { %v2760_v19 = vadd.f32 %v2759_v15, %v2747_v17  ;;  %v2774_v20 = vpop.f32.mrf.mxu0  ;;  %v2787_v22 = vpop.f32.mrf.mxu1  ;;  %v3331_v15 = vperm.slane %v3294_v12, 1 }
 0x87d   : > { %3234 = vmatmul.bf16.vlgmr.msrb.gmra.mxu0 %v2796_v18  ;;  %3260 = vmatmul.bf16.vlgmr.msra.gmra.mxu2 %v2794_v21 }
 0x87e   : > { %v2791_v23 = vmax.f32 %v2760_v19, 0.0 }
 0x880   : > { %v2795_v25 = vpack.c.bf16 %v2791_v23, %v2791_v23 }
 0x881   : > { %v2748_v26 = vpop.f32.mrf.mxu2  ;;  %v2761_v27 = vpop.f32.mrf.mxu3 }
 0x882   : > { %3221 = vmatmul.bf16.vlgmr.msra.gmra.mxu1 %v2795_v25  ;;  %3247 = vmatmul.bf16.vlgmr.msrb.gmra.mxu3 %v2793_v1 }
 0x88d   : > { %3286 = vmatmul.bf16.vlgmr.msra.gmra.mxu0 %v2796_v18 }
 0x892   : > { %3273 = vmatmul.bf16.vlgmr.msrb.gmra.mxu1 %v2795_v25 }
 0x8f0   : > { %v3209_v28 = vpop.f32.mrf.mxu2 }
 0x8f5   : > { %v3196_v30 = vpop.f32.mrf.mxu3 }
 0x8f6   : > { %v3197_v42 = vadd.f32 %v3196_v30, %v2863_v34 }
 0x8f8   : > { %v3211_v9 = vpop.f32.mrf.mxu2  ;;  %v3210_v54 = vadd.f32 %v3209_v28, %v3197_v42 }
 0x8fa   : > { %v3235_v31 = vpop.f32.mrf.mxu0 }
 0x8fd   : > { %v3198_v32 = vpop.f32.mrf.mxu3 }
 0x8ff   : > { %v3222_v35 = vpop.f32.mrf.mxu1 }
 0x900   : > { %v3261_v37 = vpop.f32.mrf.mxu2  ;;  %v3223_v47 = vadd.f32 %v3222_v35, %v3210_v54 }
 0x902   : > { %v3237_v29 = vpop.f32.mrf.mxu0  ;;  %v3236_v5 = vadd.f32 %v3235_v31, %v3223_v47 }
 0x903   : > { %v3357_v29 = vlaneseq }
 0x904   : > { %v3291_v52 = vadd.f32 %v3236_v5, %v6319_v45 }
 0x905   : > { %v3248_v39 = vpop.f32.mrf.mxu3 }
 0x906   : > { %v3249_v44 = vadd.f32 %v3248_v39, %v2864_v40 }
 0x907   : > { %v3224_v43 = vpop.f32.mrf.mxu1 }
 0x908   : > { %v3263_v24 = vpop.f32.mrf.mxu2  ;;  %v3262_v4 = vadd.f32 %v3261_v37, %v3249_v44 }
 0x90a   : > { %v3287_v53 = vpop.f32.mrf.mxu0 }
 0x90d   : > { %v3250_v2 = vpop.f32.mrf.mxu3 }
 0x90f   : > { %v3274_v38 = vpop.f32.mrf.mxu1 }
 0x910   : > { %v3275_v7 = vadd.f32 %v3274_v38, %v3262_v4 }
 0x912   : > { %v3288_v48 = vadd.f32 %v3287_v53, %v3275_v7  ;;  %v3289_v49 = vpop.f32.mrf.mxu0 }
 0x914   : > { %v3292_v51 = vadd.f32 %v3288_v48, %v6321_v46 }
 0x916   : > { %v3295_v55 = vsel %vm1122_vm2, %v3292_v51, 0.0 }
 0x917   : > { %v3276_v56 = vpop.f32.mrf.mxu1  ;;  %v3296_v57 = vadd.f32 %v3295_v55, %v3291_v52 }
 0x919   : > { %3297 = vadd.xlane.f32.xlu0 %v3296_v57 }
 0x98c   : > { %v3298_v58 = vpop.xlane.xlu0 %3297 }
 0x98d   : > { %v3299_v21 = vmul.f32 %v3298_v58, %v5993_v50 }
 0x98f   : > { %v3300_v60 = vsub.f32 %v3291_v52, %v3299_v21  ;;  %v3301_v61 = vsub.f32 %v3292_v51, %v3299_v21 }
 0x991   : > { %v3302_v62 = vmul.f32 %v3300_v60, %v3300_v60  ;;  %v3303_v63 = vmul.f32 %v3301_v61, %v3301_v61 }
 0x993   : > { %v3304_v59 = vsel %vm1122_vm2, %v3303_v63, 0.0 }
 0x994   : > { %v3305_v0 = vadd.f32 %v3304_v59, %v3302_v62 }
 0x996   : > { %3306 = vadd.xlane.f32.xlu0 %v3305_v0 }
 0xa09   : > { %v3307_v41 = vpop.xlane.xlu0 %3306 }
 0xa0a   : > { %v3308_v46 = vmul.f32 %v3307_v41, %v5993_v50  ;;  %v3324_v50 = vperm.slane %v3293_v10, 1 }
 0xa0c   : > { %v3309_v45 = vadd.f32 1e-05, %v3308_v46 }
 0xa0e   : > { %4814 = vrsqrt.f32 %v3309_v45  ;;  %vm3316_vm15 = vweird.f32 %v3309_v45 }
 0xa14   : > { %v4815_v1 = vpop.eup %4814 }
 0xa15   : > { %v3311_v3 = vmul.f32 %v4815_v1, %v3309_v45  ;;  %vm3317_vm14 = vweird.f32 %v4815_v1 }
 0xa16   : > { %vm3318_vm0 = vmor %vm3316_vm15, %vm3317_vm14 }
 0xa17   : > { %v3312_v6 = vmul.f32 %v4815_v1, %v3311_v3 }
 0xa19   : > { %v3313_v8 = vmul.f32 0.5, %v3312_v6 }
 0xa1b   : > { %v3314_v11 = vsub.f32 1.5, %v3313_v8 }
 0xa1d   : > { %v3315_v13 = vmul.f32 %v4815_v1, %v3314_v11 }
 0xa1f   : > { %v3319_v16 = vsel %vm3318_vm0, %v4815_v1, %v3315_v13 }
 0xa20   : > { %v3320_v17 = vmul.f32 %v3319_v16, %v3300_v60  ;;  %v3321_v18 = vmul.f32 %v3319_v16, %v3301_v61 }
 0xa22   : > { %v3327_v19 = vmul.f32 %v3323_v33, %v3320_v17  ;;  %v3328_v20 = vmul.f32 %v3324_v50, %v3321_v18 }
 0xa24   : > { %v3334_v22 = vadd.f32 %v3330_v14, %v3327_v19  ;;  %v3335_v23 = vadd.f32 %v3331_v15, %v3328_v20 }
 0xa26   : > { %v3336_v25 = vrot.slane %v3334_v22, 4  ;;  %v3342_v26 = vsel %vm1122_vm2, %v3335_v23, 0.0  ;;  %vm3359_vm2 = vcmp.lt.s32.totalorder %v3357_v29, 240 }
 0xa27   : > { %v3343_v27 = vrot.slane %v3342_v26, 4 }
 0xa28   : > { %v3337_v28 = vadd.f32 %v3336_v25, %v3334_v22 }
 0xa29   : > { %v3344_v30 = vadd.f32 %v3343_v27, %v3342_v26 }
 0xa2a   : > { %v3338_v9 = vrot.slane %v3337_v28, 2 }
 0xa2b   : > { %v3345_v31 = vrot.slane %v3344_v30, 2 }
 0xa2c   : > { %v3339_v32 = vadd.f32 %v3338_v9, %v3337_v28 }
 0xa2d   : > { %v3346_v35 = vadd.f32 %v3345_v31, %v3344_v30 }
 0xa2e   : > { %v3340_v36 = vrot.slane %v3339_v32, 1 }
 0xa2f   : > { %v3347_v37 = vrot.slane %v3346_v35, 1 }
 0xa30   : > { %v3341_v34 = vadd.f32 %v3340_v36, %v3339_v32 }
 0xa31   : > { %v3348_v39 = vadd.f32 %v3347_v37, %v3346_v35 }
 0xa32   : > { %v3349_v42 = vmul.f32 0.125, %v3341_v34 }
 0xa33   : > { %v3350_v40 = vmul.f32 0.125, %v3348_v39 }
 0xa35   : > { %v3353_v43 = vrot.slane %v3350_v40, 7 }
 0xa37   : > { %v3355_v24 = vsel %vm3354_vm1, %v3349_v42, %v3353_v43 }
 0xa38   : > { %3361 = vst.msk [vmem:[%s489_s16] sm:$0x3] %vm3359_vm2, %v3355_v24 }
 0xa39 PF: > { %s25_s18 = sadd.s32 1, %s4822_s18  }
 0xa3a   : > { %p22_p4 = scmp.ge.s32.totalorder %s25_s18, 4  }
 0xa3c   :  { %24 = sbr.rel (!%p22_p4) target bundleno = 1 (0x1), region = 117 }

</bundles_post_ra>
